<compile_context>
chip_gen: v7x
topology: tpu7x:2x2x1
jax: 0.10.0
libtpu: 0.0.40
codegen_flags: <defaults>
</compile_context>

<pallas_src>
import jax
import jax.numpy as jnp
from jax import lax
from jax.experimental import pallas as pl
from jax.experimental.pallas import tpu as pltpu

K_FOR_MAXPOOL = 5
FILTERS_SIZE = 3


def _normalize(x, extra_scale=None):
    # cosine(A, B) == normalize(A) @ normalize(B)^T; rsqrt lands on the EUP slot.
    # Zero-norm rows (all-zero embedding, e.g. a zero padding vector) get a zero
    # normalized vector (cosine 0) instead of the reference's NaN.
    xf = x.astype(jnp.float32)
    ssq = jnp.sum(xf * xf, axis=-1, keepdims=True)
    inv = jnp.where(ssq > 0.0, lax.rsqrt(ssq), 0.0)
    if extra_scale is not None:
        inv = inv * extra_scale
    return (xf * inv).astype(x.dtype)


def _k_max_pool_sublane(sim, k):
    # sim: (Bt, S, Ls, Lq).  Exact sort-based top-k over the Ls (sublane) axis,
    # implemented as k rounds of (max, first-argmax masking) so ties behave exactly
    # like sort-then-take-last-k.  Requires Ls >= k (asserted in the wrapper).
    # NOTE: max + first-argmax is two XLU reduces per round; a packed (value, index)
    # single-reduce key would halve that but cannot be done exactly in 32 bits.
    Ls = sim.shape[2]
    row = lax.broadcasted_iota(jnp.int32, sim.shape, 2)
    work = sim
    the_max = None
    acc = None
    for t in range(k):
        m = jnp.max(work, axis=2, keepdims=True)                       # (Bt, S, 1, Lq)
        if t == 0:
            the_max = m
        acc = m if acc is None else acc + m
        # first position attaining the max (keeps duplicates, exactly like a sort)
        idx = jnp.min(jnp.where(work == m, row, Ls + 1), axis=2, keepdims=True)
        work = jnp.where(row == idx, -1e30, work)
    return the_max[:, :, 0, :], acc[:, :, 0, :] * (1.0 / float(k))     # (Bt, S, Lq) each


def pdrmm_kernel(qpad_ref, spad_ref, qmask_ref, smask_ref, oh_ref,
                 wconv_ref, wlin_ref, blin_ref, out_ref):
    FS, D, F = wconv_ref.shape
    Bt, Lq = qmask_ref.shape[1], qmask_ref.shape[2]
    S, Ls = smask_ref.shape[2], smask_ref.shape[3]

    qpad = qpad_ref[0]       # (Bt, Lq + FS - 1, D)
    spad = spad_ref[0]       # (Bt, S, Ls + FS - 1, D)
    qmask = qmask_ref[0]     # (Bt, Lq)
    smask = smask_ref[0]     # (Bt, S, Ls)
    oh = oh_ref[0]           # (Bt, 2, S, Lq)  -- [oh_max, oh_avg], pooled in wrapper

    q_emb = qpad[:, 0:Lq, :]       # (Bt, Lq, D)
    s_emb = spad[:, :, 0:Ls, :]    # (Bt, S, Ls, D)

    # --- "conv2d" over the sequence axis as FS accumulated matmuls ---------------
    #   out[i] = sum_t X[i+t] @ W[t]   (trailing FS-1 zero rows added in the wrapper;
    #   equals torch conv2d with padding=(fs//2+1, 0) keeping the last L rows)
    q_conv = jnp.dot(q_emb, wconv_ref[0], preferred_element_type=jnp.float32)
    s_conv = jnp.dot(s_emb, wconv_ref[0], preferred_element_type=jnp.float32)
    for t in range(1, FS):
        wt = wconv_ref[t]
        q_conv = q_conv + jnp.dot(qpad[:, t:t + Lq, :], wt,
                                  preferred_element_type=jnp.float32)
        s_conv = s_conv + jnp.dot(spad[:, :, t:t + Ls, :], wt,
                                  preferred_element_type=jnp.float32)
    # q_conv: (Bt, Lq, F)   s_conv: (Bt, S, Ls, F)

    # --- cosine sims in (S, Ls, Lq) orientation: one batched matmul per stack ----
    q_emb_n = _normalize(q_emb)
    q_conv_n = _normalize(q_conv)
    # (token > 1) sentence mask folded into the sentence normalization scale; the
    # reference masks ONLY the insensitive similarity.
    s_emb_n = _normalize(s_emb, extra_scale=smask[..., None])
    s_conv_n = _normalize(s_conv)

    sim_ins = jnp.einsum('bsld,bqd->bslq', s_emb_n, q_emb_n,
                         preferred_element_type=jnp.float32)            # (Bt, S, Ls, Lq)
    sim_ins = sim_ins * qmask[:, None, None, :]      # question mask: lane-aligned bcast
    sim_sen = jnp.einsum('bslf,bqf->bslq', s_conv_n, q_conv_n,
                         preferred_element_type=jnp.float32)            # (Bt, S, Ls, Lq)

    # --- k-max pooling over the sentence-position (sublane) axis -----------------
    i_max, i_avg = _k_max_pool_sublane(sim_ins, K_FOR_MAXPOOL)          # (Bt, S, Lq)
    c_max, c_avg = _k_max_pool_sublane(sim_sen, K_FOR_MAXPOOL)          # (Bt, S, Lq)

    # linear_per_q on [ins_max, ins_avg, sens_max, sens_avg, oh_max, oh_avg] + sigmoid,
    # then mean over the Lq (lane) axis -> one score per sentence.
    z = (wlin_ref[0] * i_max + wlin_ref[1] * i_avg
         + wlin_ref[2] * c_max + wlin_ref[3] * c_avg
         + wlin_ref[4] * oh[:, 0] + wlin_ref[5] * oh[:, 1]
         + blin_ref[0])                                                 # (Bt, S, Lq)
    lo = jax.nn.sigmoid(z)
    sr = jnp.sum(lo, axis=-1) * (1.0 / float(Lq))                       # (Bt, S)
    out_ref[...] = sr[None]                                             # (1, Bt, S)


def _choose_block_docs(B, S, Lq, Ls, D, F, vmem_budget=8 * 1024 * 1024):
    # Rough per-document f32 working-set estimate; keep a few MiB per grid step
    # (x2 for double buffering fits well under the 32 MiB scoped limit, incl. v7x).
    fs = FILTERS_SIZE
    per_doc = 4 * ((Lq + fs - 1) * D + S * (Ls + fs - 1) * D      # padded embeddings
                   + Lq * F + S * Ls * F                          # conv features
                   + 2 * S * Ls * Lq                              # two sim stacks
                   + 8 * S * Lq)                                  # pooled + tail
    bt = max(1, int(vmem_budget // max(per_doc, 1)))
    if B >= 2:
        bt = min(bt, B // 2)   # keep >= 2 grid steps so both v7x TensorCores get work
    bt = max(1, min(bt, B))
    while B % bt:
        bt -= 1
    return bt


def pdrmm_forward(embeds, conv_filters, lin_w, lin_b, q_tokens, s_tokens,
                  target_sents, target_docs, compute_dtype=jnp.float32):
    B, Lq = q_tokens.shape
    _, S, Ls = s_tokens.shape
    _, D = embeds.shape
    FS = FILTERS_SIZE
    F = conv_filters.shape[0]          # torch layout (nof_filters, 1, FS, emb_dim)
    K = K_FOR_MAXPOOL
    assert Ls >= K, "k-max pooling requires Ls >= k (reference pools over full Ls)"

    # per-tap conv weights: W[t][d, f] = conv_filters[f, 0, t, d]  -> (FS, D, F)
    w_taps = jnp.transpose(conv_filters[:, 0, :, :], (1, 2, 0)).astype(compute_dtype)

    # --- plain-JAX glue: embedding gather, trailing conv zero-pad, masks ---------
    q_emb = jnp.take(embeds, q_tokens, axis=0)                                   # (B, Lq, D)
    s_emb = jnp.take(embeds, s_tokens.reshape(B * S, Ls),
                     axis=0).reshape(B, S, Ls, D)                                # (B, S, Ls, D)
    q_pad = jnp.pad(q_emb, ((0, 0), (0, FS - 1), (0, 0))).astype(compute_dtype)
    s_pad = jnp.pad(s_emb, ((0, 0), (0, 0), (0, FS - 1), (0, 0))).astype(compute_dtype)
    q_mask = (q_tokens > 1).astype(jnp.float32)                                  # (B, Lq)
    s_mask = (s_tokens > 1).astype(jnp.float32)                                  # (B, S, Ls)

    # --- exact count-based pooling of the binary token-identity one-hot sim ------
    # (values are 0/1, so sort-based top-k == count-based; the big [B,S,Lq,Ls] f32
    #  tensor is never materialized)
    # TODO(synk): a non-binary caller-provided similarity_one_hot would need generic
    # lax.top_k pooling here instead of the count-based shortcut.
    cnt = jnp.sum(q_tokens[:, None, :, None] == s_tokens[:, :, None, :],
                  axis=-1).astype(jnp.float32)                                   # (B, S, Lq)
    oh_max = (cnt > 0).astype(jnp.float32)
    oh_avg = jnp.minimum(cnt, float(K)) * (1.0 / float(K))
    oh = jnp.stack([oh_max, oh_avg], axis=1)                                     # (B, 2, S, Lq)

    # --- doc batching: grid over G blocks of Bt documents -------------------------
    Bt = _choose_block_docs(B, S, Lq, Ls, D, F)
    G = B // Bt
    Lqp, Lsp = Lq + FS - 1, Ls + FS - 1
    q_pad_g = q_pad.reshape(G, Bt, Lqp, D)
    s_pad_g = s_pad.reshape(G, Bt, S, Lsp, D)
    q_mask_g = q_mask.reshape(G, Bt, Lq)
    s_mask_g = s_mask.reshape(G, Bt, S, Ls)
    oh_g = oh.reshape(G, Bt, 2, S, Lq)

    sent = pl.pallas_call(
        pdrmm_kernel,
        out_shape=jax.ShapeDtypeStruct((G, Bt, S), jnp.float32),
        grid_spec=pltpu.PrefetchScalarGridSpec(
            num_scalar_prefetch=0,
            grid=(G,),
            in_specs=[
                pl.BlockSpec((1, Bt, Lqp, D), lambda g: (g, 0, 0, 0)),
                pl.BlockSpec((1, Bt, S, Lsp, D), lambda g: (g, 0, 0, 0, 0)),
                pl.BlockSpec((1, Bt, Lq), lambda g: (g, 0, 0)),
                pl.BlockSpec((1, Bt, S, Ls), lambda g: (g, 0, 0, 0)),
                pl.BlockSpec((1, Bt, 2, S, Lq), lambda g: (g, 0, 0, 0, 0)),
                pl.BlockSpec((FS, D, F), lambda g: (0, 0, 0)),
                pl.BlockSpec(memory_space=pltpu.MemorySpace.SMEM),
                pl.BlockSpec(memory_space=pltpu.MemorySpace.SMEM),
            ],
            out_specs=pl.BlockSpec((1, Bt, S), lambda g: (g, 0, 0)),
        ),
        compiler_params=pltpu.CompilerParams(
            dimension_semantics=("parallel",),
            vmem_limit_bytes=32 * 1024 * 1024),
    )(q_pad_g, s_pad_g, q_mask_g, s_mask_g, oh_g, w_taps, lin_w, lin_b)
    sent_output = sent.reshape(B, S)

    # --- plain-JAX glue: tiny scalar BCE losses -----------------------------------
    def bce(p, t):
        p = jnp.clip(p, 1e-7, 1.0 - 1e-7)
        return -(t * jnp.log(p) + (1.0 - t) * jnp.log(1.0 - p))

    t_sents = target_sents.astype(jnp.float32)
    t_docs = target_docs.astype(jnp.float32)
    sentences_average_loss = jnp.mean(jnp.mean(bce(sent_output, t_sents), axis=1))
    document_emitions = jnp.max(sent_output, axis=1)                             # (B,)
    document_average_loss = jnp.mean(bce(document_emitions, t_docs))
    total_loss = (sentences_average_loss + document_average_loss) / 2.0
    return total_loss, sent_output, document_emitions


if __name__ == "__main__":
    key = jax.random.PRNGKey(0)
    V, D, NF = 50, 32, 32          # vocab, embedding dim, nof_filters
    B, S, Lq, Ls = 4, 3, 8, 8      # docs, sentences/doc, question len, sentence len

    k1, k2, k3, k4, k5, k6, k7 = jax.random.split(key, 7)
    embeds = jax.random.normal(k1, (V, D), jnp.float32)
    # PyTorch parameter layout: (nof_filters, 1, filters_size, emb_dim)
    conv_filters = jax.random.normal(k2, (NF, 1, FILTERS_SIZE, D), jnp.float32)
    lin_w = 0.1 * jax.random.normal(k3, (6,), jnp.float32)   # linear_per_q weight (1,6) flat
    lin_b = 0.1 * jax.random.normal(k4, (1,), jnp.float32)   # linear_per_q bias

    q_tokens = jax.random.randint(k5, (B, Lq), 0, V)
    s_tokens = jax.random.randint(k6, (B, S, Ls), 0, V)
    target_sents = jax.random.randint(k7, (B, S), 0, 2)
    target_docs = jnp.max(target_sents, axis=1)

    total_loss, sent_output, doc_emitions = jax.jit(pdrmm_forward)(
        embeds, conv_filters, lin_w, lin_b, q_tokens, s_tokens,
        target_sents, target_docs)
    jax.block_until_ready((total_loss, sent_output, doc_emitions))
    print("KERNEL_OK")
</pallas_src>

<mosaic_0001>
module attributes {stable_mosaic.version = 11 : i64} {
  func.func @pdrmm_kernel(%arg0: i32, %arg1: memref<1x2x10x32xf32, #tpu.memory_space<vmem>>, %arg2: memref<1x2x3x10x32xf32, #tpu.memory_space<vmem>>, %arg3: memref<1x2x8xf32, #tpu.memory_space<vmem>>, %arg4: memref<1x2x3x8xf32, #tpu.memory_space<vmem>>, %arg5: memref<1x2x2x3x8xf32, #tpu.memory_space<vmem>>, %arg6: memref<3x32x32xf32, #tpu.memory_space<vmem>>, %arg7: memref<6xf32, #tpu.memory_space<smem>>, %arg8: memref<1xf32, #tpu.memory_space<smem>>, %arg9: memref<1x2x3xf32, #tpu.memory_space<vmem>>) attributes {dimension_semantics = [#tpu.dimension_semantics<parallel>], iteration_bounds = array<i64: 2>, scalar_prefetch = 0 : i64, scratch_operands = 0 : i64, tpu.core_type = #tpu.core_type<tc>, window_params = [{transform_indices = @transform_0, window_bounds = array<i64: 1, 2, 10, 32>}, {transform_indices = @transform_1, window_bounds = array<i64: 1, 2, 3, 10, 32>}, {transform_indices = @transform_2, window_bounds = array<i64: 1, 2, 8>}, {transform_indices = @transform_3, window_bounds = array<i64: 1, 2, 3, 8>}, {transform_indices = @transform_4, window_bounds = array<i64: 1, 2, 2, 3, 8>}, {pipeline_mode = #tpu.pipeline_mode<synchronous>, transform_indices = @transform_5, window_bounds = array<i64: 3, 32, 32>}, {transform_indices = @transform_6, window_bounds = array<i64: 6>}, {transform_indices = @transform_7, window_bounds = array<i64: 1>}, {transform_indices = @transform_8, window_bounds = array<i64: 1, 2, 3>}]} {
    %c0 = arith.constant 0 : index
    %c0_0 = arith.constant 0 : index
    %c0_1 = arith.constant 0 : index
    %c0_2 = arith.constant 0 : index
    %0 = vector.load %arg1[%c0, %c0_0, %c0_1, %c0_2] : memref<1x2x10x32xf32, #tpu.memory_space<vmem>>, vector<1x2x10x32xf32>
    %1 = vector.shape_cast %0 : vector<1x2x10x32xf32> to vector<2x10x32xf32>
    %c0_3 = arith.constant 0 : index
    %c0_4 = arith.constant 0 : index
    %c0_5 = arith.constant 0 : index
    %c0_6 = arith.constant 0 : index
    %c0_7 = arith.constant 0 : index
    %2 = vector.load %arg2[%c0_3, %c0_4, %c0_5, %c0_6, %c0_7] : memref<1x2x3x10x32xf32, #tpu.memory_space<vmem>>, vector<1x2x3x10x32xf32>
    %3 = vector.shape_cast %2 : vector<1x2x3x10x32xf32> to vector<2x3x10x32xf32>
    %c0_8 = arith.constant 0 : index
    %c0_9 = arith.constant 0 : index
    %c0_10 = arith.constant 0 : index
    %4 = vector.load %arg3[%c0_8, %c0_9, %c0_10] : memref<1x2x8xf32, #tpu.memory_space<vmem>>, vector<1x2x8xf32>
    %5 = vector.shape_cast %4 : vector<1x2x8xf32> to vector<2x8xf32>
    %c0_11 = arith.constant 0 : index
    %c0_12 = arith.constant 0 : index
    %c0_13 = arith.constant 0 : index
    %c0_14 = arith.constant 0 : index
    %6 = vector.load %arg4[%c0_11, %c0_12, %c0_13, %c0_14] : memref<1x2x3x8xf32, #tpu.memory_space<vmem>>, vector<1x2x3x8xf32>
    %7 = vector.shape_cast %6 : vector<1x2x3x8xf32> to vector<2x3x8xf32>
    %c0_15 = arith.constant 0 : index
    %c0_16 = arith.constant 0 : index
    %c0_17 = arith.constant 0 : index
    %c0_18 = arith.constant 0 : index
    %c0_19 = arith.constant 0 : index
    %8 = vector.load %arg5[%c0_15, %c0_16, %c0_17, %c0_18, %c0_19] : memref<1x2x2x3x8xf32, #tpu.memory_space<vmem>>, vector<1x2x2x3x8xf32>
    %9 = vector.shape_cast %8 : vector<1x2x2x3x8xf32> to vector<2x2x3x8xf32>
    %10 = vector.extract_strided_slice %1 {offsets = [0, 0, 0], sizes = [2, 8, 32], strides = [1, 1, 1]} : vector<2x10x32xf32> to vector<2x8x32xf32>
    %11 = vector.extract_strided_slice %3 {offsets = [0, 0, 0, 0], sizes = [2, 3, 8, 32], strides = [1, 1, 1, 1]} : vector<2x3x10x32xf32> to vector<2x3x8x32xf32>
    %c0_20 = arith.constant 0 : index
    %c0_21 = arith.constant 0 : index
    %c0_22 = arith.constant 0 : index
    %12 = vector.load %arg6[%c0_20, %c0_21, %c0_22] : memref<3x32x32xf32, #tpu.memory_space<vmem>>, vector<1x32x32xf32>
    %13 = vector.shape_cast %12 : vector<1x32x32xf32> to vector<32x32xf32>
    %cst = arith.constant dense<0.000000e+00> : vector<2x8x32xf32>
    %14 = tpu.matmul %10, %13, %cst {dimension_numbers = #tpu.dot_dimension_numbers<[2], [0], [0, 1], [1], [0, 0, 0, 1, 1, 1], [], []>} : vector<2x8x32xf32>, vector<32x32xf32>, vector<2x8x32xf32> -> vector<2x8x32xf32>
    %c0_23 = arith.constant 0 : index
    %c0_24 = arith.constant 0 : index
    %c0_25 = arith.constant 0 : index
    %15 = vector.load %arg6[%c0_23, %c0_24, %c0_25] : memref<3x32x32xf32, #tpu.memory_space<vmem>>, vector<1x32x32xf32>
    %16 = vector.shape_cast %15 : vector<1x32x32xf32> to vector<32x32xf32>
    %cst_26 = arith.constant dense<0.000000e+00> : vector<2x3x8x32xf32>
    %17 = tpu.matmul %11, %16, %cst_26 {dimension_numbers = #tpu.dot_dimension_numbers<[3], [0], [0, 1, 2], [1], [0, 0, 0, 1, 0, 2, 1, 1], [], []>} : vector<2x3x8x32xf32>, vector<32x32xf32>, vector<2x3x8x32xf32> -> vector<2x3x8x32xf32>
    %c1 = arith.constant 1 : index
    %c0_27 = arith.constant 0 : index
    %c0_28 = arith.constant 0 : index
    %18 = vector.load %arg6[%c1, %c0_27, %c0_28] : memref<3x32x32xf32, #tpu.memory_space<vmem>>, vector<1x32x32xf32>
    %19 = vector.shape_cast %18 : vector<1x32x32xf32> to vector<32x32xf32>
    %20 = vector.extract_strided_slice %1 {offsets = [0, 1, 0], sizes = [2, 8, 32], strides = [1, 1, 1]} : vector<2x10x32xf32> to vector<2x8x32xf32>
    %cst_29 = arith.constant dense<0.000000e+00> : vector<2x8x32xf32>
    %21 = tpu.matmul %20, %19, %cst_29 {dimension_numbers = #tpu.dot_dimension_numbers<[2], [0], [0, 1], [1], [0, 0, 0, 1, 1, 1], [], []>} : vector<2x8x32xf32>, vector<32x32xf32>, vector<2x8x32xf32> -> vector<2x8x32xf32>
    %22 = arith.addf %14, %21 : vector<2x8x32xf32>
    %23 = vector.extract_strided_slice %3 {offsets = [0, 0, 1, 0], sizes = [2, 3, 8, 32], strides = [1, 1, 1, 1]} : vector<2x3x10x32xf32> to vector<2x3x8x32xf32>
    %cst_30 = arith.constant dense<0.000000e+00> : vector<2x3x8x32xf32>
    %24 = tpu.matmul %23, %19, %cst_30 {dimension_numbers = #tpu.dot_dimension_numbers<[3], [0], [0, 1, 2], [1], [0, 0, 0, 1, 0, 2, 1, 1], [], []>} : vector<2x3x8x32xf32>, vector<32x32xf32>, vector<2x3x8x32xf32> -> vector<2x3x8x32xf32>
    %25 = arith.addf %17, %24 : vector<2x3x8x32xf32>
    %c2 = arith.constant 2 : index
    %c0_31 = arith.constant 0 : index
    %c0_32 = arith.constant 0 : index
    %26 = vector.load %arg6[%c2, %c0_31, %c0_32] : memref<3x32x32xf32, #tpu.memory_space<vmem>>, vector<1x32x32xf32>
    %27 = vector.shape_cast %26 : vector<1x32x32xf32> to vector<32x32xf32>
    %28 = vector.extract_strided_slice %1 {offsets = [0, 2, 0], sizes = [2, 8, 32], strides = [1, 1, 1]} : vector<2x10x32xf32> to vector<2x8x32xf32>
    %cst_33 = arith.constant dense<0.000000e+00> : vector<2x8x32xf32>
    %29 = tpu.matmul %28, %27, %cst_33 {dimension_numbers = #tpu.dot_dimension_numbers<[2], [0], [0, 1], [1], [0, 0, 0, 1, 1, 1], [], []>} : vector<2x8x32xf32>, vector<32x32xf32>, vector<2x8x32xf32> -> vector<2x8x32xf32>
    %30 = arith.addf %22, %29 : vector<2x8x32xf32>
    %31 = vector.extract_strided_slice %3 {offsets = [0, 0, 2, 0], sizes = [2, 3, 8, 32], strides = [1, 1, 1, 1]} : vector<2x3x10x32xf32> to vector<2x3x8x32xf32>
    %cst_34 = arith.constant dense<0.000000e+00> : vector<2x3x8x32xf32>
    %32 = tpu.matmul %31, %27, %cst_34 {dimension_numbers = #tpu.dot_dimension_numbers<[3], [0], [0, 1, 2], [1], [0, 0, 0, 1, 0, 2, 1, 1], [], []>} : vector<2x3x8x32xf32>, vector<32x32xf32>, vector<2x3x8x32xf32> -> vector<2x3x8x32xf32>
    %33 = arith.addf %25, %32 : vector<2x3x8x32xf32>
    %34 = arith.mulf %10, %10 : vector<2x8x32xf32>
    %cst_35 = arith.constant dense<0.000000e+00> : vector<2x8xf32>
    %35 = vector.multi_reduction <add>, %34, %cst_35 [2] : vector<2x8x32xf32> to vector<2x8xf32>
    %36 = vector.shape_cast %35 : vector<2x8xf32> to vector<2x8x1xf32>
    %cst_36 = arith.constant 0.000000e+00 : f32
    %37 = vector.broadcast %cst_36 : f32 to vector<2x8x1xf32>
    %38 = arith.cmpf ogt, %36, %37 : vector<2x8x1xf32>
    %39 = math.rsqrt %36 : vector<2x8x1xf32>
    %cst_37 = arith.constant 0.000000e+00 : f32
    %40 = vector.broadcast %cst_37 : f32 to vector<2x8x1xf32>
    %41 = arith.select %38, %39, %40 : vector<2x8x1xi1>, vector<2x8x1xf32>
    %42 = vector.broadcast %41 : vector<2x8x1xf32> to vector<2x8x32xf32>
    %43 = arith.mulf %10, %42 : vector<2x8x32xf32>
    %44 = arith.mulf %30, %30 : vector<2x8x32xf32>
    %cst_38 = arith.constant dense<0.000000e+00> : vector<2x8xf32>
    %45 = vector.multi_reduction <add>, %44, %cst_38 [2] : vector<2x8x32xf32> to vector<2x8xf32>
    %46 = vector.shape_cast %45 : vector<2x8xf32> to vector<2x8x1xf32>
    %cst_39 = arith.constant 0.000000e+00 : f32
    %47 = vector.broadcast %cst_39 : f32 to vector<2x8x1xf32>
    %48 = arith.cmpf ogt, %46, %47 : vector<2x8x1xf32>
    %49 = math.rsqrt %46 : vector<2x8x1xf32>
    %cst_40 = arith.constant 0.000000e+00 : f32
    %50 = vector.broadcast %cst_40 : f32 to vector<2x8x1xf32>
    %51 = arith.select %48, %49, %50 : vector<2x8x1xi1>, vector<2x8x1xf32>
    %52 = vector.broadcast %51 : vector<2x8x1xf32> to vector<2x8x32xf32>
    %53 = arith.mulf %30, %52 : vector<2x8x32xf32>
    %54 = vector.shape_cast %7 : vector<2x3x8xf32> to vector<2x3x8x1xf32>
    %55 = arith.mulf %11, %11 : vector<2x3x8x32xf32>
    %cst_41 = arith.constant dense<0.000000e+00> : vector<2x3x8xf32>
    %56 = vector.multi_reduction <add>, %55, %cst_41 [3] : vector<2x3x8x32xf32> to vector<2x3x8xf32>
    %57 = vector.shape_cast %56 : vector<2x3x8xf32> to vector<2x3x8x1xf32>
    %cst_42 = arith.constant 0.000000e+00 : f32
    %58 = vector.broadcast %cst_42 : f32 to vector<2x3x8x1xf32>
    %59 = arith.cmpf ogt, %57, %58 : vector<2x3x8x1xf32>
    %60 = math.rsqrt %57 : vector<2x3x8x1xf32>
    %cst_43 = arith.constant 0.000000e+00 : f32
    %61 = vector.broadcast %cst_43 : f32 to vector<2x3x8x1xf32>
    %62 = arith.select %59, %60, %61 : vector<2x3x8x1xi1>, vector<2x3x8x1xf32>
    %63 = arith.mulf %62, %54 : vector<2x3x8x1xf32>
    %64 = vector.broadcast %63 : vector<2x3x8x1xf32> to vector<2x3x8x32xf32>
    %65 = arith.mulf %11, %64 : vector<2x3x8x32xf32>
    %66 = arith.mulf %33, %33 : vector<2x3x8x32xf32>
    %cst_44 = arith.constant dense<0.000000e+00> : vector<2x3x8xf32>
    %67 = vector.multi_reduction <add>, %66, %cst_44 [3] : vector<2x3x8x32xf32> to vector<2x3x8xf32>
    %68 = vector.shape_cast %67 : vector<2x3x8xf32> to vector<2x3x8x1xf32>
    %cst_45 = arith.constant 0.000000e+00 : f32
    %69 = vector.broadcast %cst_45 : f32 to vector<2x3x8x1xf32>
    %70 = arith.cmpf ogt, %68, %69 : vector<2x3x8x1xf32>
    %71 = math.rsqrt %68 : vector<2x3x8x1xf32>
    %cst_46 = arith.constant 0.000000e+00 : f32
    %72 = vector.broadcast %cst_46 : f32 to vector<2x3x8x1xf32>
    %73 = arith.select %70, %71, %72 : vector<2x3x8x1xi1>, vector<2x3x8x1xf32>
    %74 = vector.broadcast %73 : vector<2x3x8x1xf32> to vector<2x3x8x32xf32>
    %75 = arith.mulf %33, %74 : vector<2x3x8x32xf32>
    "tpu.trace_start"() <{level = 10 : i32, message = "bsld,bqd->bslq"}> : () -> ()
    %cst_47 = arith.constant dense<0.000000e+00> : vector<2x3x8x8xf32>
    %76 = tpu.matmul %65, %43, %cst_47 {dimension_numbers = #tpu.dot_dimension_numbers<[3], [2], [1, 2], [1], [0, 0, 0, 1, 0, 2, 1, 1], [0], [0]>} : vector<2x3x8x32xf32>, vector<2x8x32xf32>, vector<2x3x8x8xf32> -> vector<2x3x8x8xf32>
    "tpu.trace_stop"() : () -> ()
    %77 = vector.shape_cast %5 : vector<2x8xf32> to vector<2x1x1x8xf32>
    %78 = vector.broadcast %77 : vector<2x1x1x8xf32> to vector<2x3x8x8xf32>
    %79 = arith.mulf %76, %78 : vector<2x3x8x8xf32>
    "tpu.trace_start"() <{level = 10 : i32, message = "bslf,bqf->bslq"}> : () -> ()
    %cst_48 = arith.constant dense<0.000000e+00> : vector<2x3x8x8xf32>
    %80 = tpu.matmul %75, %53, %cst_48 {dimension_numbers = #tpu.dot_dimension_numbers<[3], [2], [1, 2], [1], [0, 0, 0, 1, 0, 2, 1, 1], [0], [0]>} : vector<2x3x8x32xf32>, vector<2x8x32xf32>, vector<2x3x8x8xf32> -> vector<2x3x8x8xf32>
    "tpu.trace_stop"() : () -> ()
    %81 = tpu.iota {dimensions = array<i32: 2>} : vector<2x3x8x8xi32>
    %cst_49 = arith.constant dense<0xFF800000> : vector<2x3x8xf32>
    %82 = vector.multi_reduction <maximumf>, %79, %cst_49 [2] : vector<2x3x8x8xf32> to vector<2x3x8xf32>
    %83 = vector.shape_cast %82 : vector<2x3x8xf32> to vector<2x3x1x8xf32>
    %84 = vector.broadcast %83 : vector<2x3x1x8xf32> to vector<2x3x8x8xf32>
    %85 = arith.cmpf oeq, %79, %84 : vector<2x3x8x8xf32>
    %c9_i32 = arith.constant 9 : i32
    %86 = vector.broadcast %c9_i32 : i32 to vector<2x3x8x8xi32>
    %87 = arith.select %85, %81, %86 : vector<2x3x8x8xi1>, vector<2x3x8x8xi32>
    %cst_50 = arith.constant dense<2147483647> : vector<2x3x8xi32>
    %88 = vector.multi_reduction <minsi>, %87, %cst_50 [2] : vector<2x3x8x8xi32> to vector<2x3x8xi32>
    %89 = vector.shape_cast %88 : vector<2x3x8xi32> to vector<2x3x1x8xi32>
    %90 = vector.broadcast %89 : vector<2x3x1x8xi32> to vector<2x3x8x8xi32>
    %91 = arith.cmpi eq, %81, %90 : vector<2x3x8x8xi32>
    %cst_51 = arith.constant -1.000000e+30 : f32
    %92 = vector.broadcast %cst_51 : f32 to vector<2x3x8x8xf32>
    %93 = arith.select %91, %92, %79 : vector<2x3x8x8xi1>, vector<2x3x8x8xf32>
    %cst_52 = arith.constant dense<0xFF800000> : vector<2x3x8xf32>
    %94 = vector.multi_reduction <maximumf>, %93, %cst_52 [2] : vector<2x3x8x8xf32> to vector<2x3x8xf32>
    %95 = vector.shape_cast %94 : vector<2x3x8xf32> to vector<2x3x1x8xf32>
    %96 = arith.addf %83, %95 : vector<2x3x1x8xf32>
    %97 = vector.broadcast %95 : vector<2x3x1x8xf32> to vector<2x3x8x8xf32>
    %98 = arith.cmpf oeq, %93, %97 : vector<2x3x8x8xf32>
    %c9_i32_53 = arith.constant 9 : i32
    %99 = vector.broadcast %c9_i32_53 : i32 to vector<2x3x8x8xi32>
    %100 = arith.select %98, %81, %99 : vector<2x3x8x8xi1>, vector<2x3x8x8xi32>
    %cst_54 = arith.constant dense<2147483647> : vector<2x3x8xi32>
    %101 = vector.multi_reduction <minsi>, %100, %cst_54 [2] : vector<2x3x8x8xi32> to vector<2x3x8xi32>
    %102 = vector.shape_cast %101 : vector<2x3x8xi32> to vector<2x3x1x8xi32>
    %103 = vector.broadcast %102 : vector<2x3x1x8xi32> to vector<2x3x8x8xi32>
    %104 = arith.cmpi eq, %81, %103 : vector<2x3x8x8xi32>
    %cst_55 = arith.constant -1.000000e+30 : f32
    %105 = vector.broadcast %cst_55 : f32 to vector<2x3x8x8xf32>
    %106 = arith.select %104, %105, %93 : vector<2x3x8x8xi1>, vector<2x3x8x8xf32>
    %cst_56 = arith.constant dense<0xFF800000> : vector<2x3x8xf32>
    %107 = vector.multi_reduction <maximumf>, %106, %cst_56 [2] : vector<2x3x8x8xf32> to vector<2x3x8xf32>
    %108 = vector.shape_cast %107 : vector<2x3x8xf32> to vector<2x3x1x8xf32>
    %109 = arith.addf %96, %108 : vector<2x3x1x8xf32>
    %110 = vector.broadcast %108 : vector<2x3x1x8xf32> to vector<2x3x8x8xf32>
    %111 = arith.cmpf oeq, %106, %110 : vector<2x3x8x8xf32>
    %c9_i32_57 = arith.constant 9 : i32
    %112 = vector.broadcast %c9_i32_57 : i32 to vector<2x3x8x8xi32>
    %113 = arith.select %111, %81, %112 : vector<2x3x8x8xi1>, vector<2x3x8x8xi32>
    %cst_58 = arith.constant dense<2147483647> : vector<2x3x8xi32>
    %114 = vector.multi_reduction <minsi>, %113, %cst_58 [2] : vector<2x3x8x8xi32> to vector<2x3x8xi32>
    %115 = vector.shape_cast %114 : vector<2x3x8xi32> to vector<2x3x1x8xi32>
    %116 = vector.broadcast %115 : vector<2x3x1x8xi32> to vector<2x3x8x8xi32>
    %117 = arith.cmpi eq, %81, %116 : vector<2x3x8x8xi32>
    %cst_59 = arith.constant -1.000000e+30 : f32
    %118 = vector.broadcast %cst_59 : f32 to vector<2x3x8x8xf32>
    %119 = arith.select %117, %118, %106 : vector<2x3x8x8xi1>, vector<2x3x8x8xf32>
    %cst_60 = arith.constant dense<0xFF800000> : vector<2x3x8xf32>
    %120 = vector.multi_reduction <maximumf>, %119, %cst_60 [2] : vector<2x3x8x8xf32> to vector<2x3x8xf32>
    %121 = vector.shape_cast %120 : vector<2x3x8xf32> to vector<2x3x1x8xf32>
    %122 = arith.addf %109, %121 : vector<2x3x1x8xf32>
    %123 = vector.broadcast %121 : vector<2x3x1x8xf32> to vector<2x3x8x8xf32>
    %124 = arith.cmpf oeq, %119, %123 : vector<2x3x8x8xf32>
    %c9_i32_61 = arith.constant 9 : i32
    %125 = vector.broadcast %c9_i32_61 : i32 to vector<2x3x8x8xi32>
    %126 = arith.select %124, %81, %125 : vector<2x3x8x8xi1>, vector<2x3x8x8xi32>
    %cst_62 = arith.constant dense<2147483647> : vector<2x3x8xi32>
    %127 = vector.multi_reduction <minsi>, %126, %cst_62 [2] : vector<2x3x8x8xi32> to vector<2x3x8xi32>
    %128 = vector.shape_cast %127 : vector<2x3x8xi32> to vector<2x3x1x8xi32>
    %129 = vector.broadcast %128 : vector<2x3x1x8xi32> to vector<2x3x8x8xi32>
    %130 = arith.cmpi eq, %81, %129 : vector<2x3x8x8xi32>
    %cst_63 = arith.constant -1.000000e+30 : f32
    %131 = vector.broadcast %cst_63 : f32 to vector<2x3x8x8xf32>
    %132 = arith.select %130, %131, %119 : vector<2x3x8x8xi1>, vector<2x3x8x8xf32>
    %cst_64 = arith.constant dense<0xFF800000> : vector<2x3x8xf32>
    %133 = vector.multi_reduction <maximumf>, %132, %cst_64 [2] : vector<2x3x8x8xf32> to vector<2x3x8xf32>
    %134 = vector.shape_cast %133 : vector<2x3x8xf32> to vector<2x3x1x8xf32>
    %135 = arith.addf %122, %134 : vector<2x3x1x8xf32>
    %136 = vector.shape_cast %83 : vector<2x3x1x8xf32> to vector<2x3x8xf32>
    %137 = vector.shape_cast %135 : vector<2x3x1x8xf32> to vector<2x3x8xf32>
    %cst_65 = arith.constant 2.000000e-01 : f32
    %138 = vector.broadcast %cst_65 : f32 to vector<2x3x8xf32>
    %139 = arith.mulf %137, %138 : vector<2x3x8xf32>
    %140 = tpu.iota {dimensions = array<i32: 2>} : vector<2x3x8x8xi32>
    %cst_66 = arith.constant dense<0xFF800000> : vector<2x3x8xf32>
    %141 = vector.multi_reduction <maximumf>, %80, %cst_66 [2] : vector<2x3x8x8xf32> to vector<2x3x8xf32>
    %142 = vector.shape_cast %141 : vector<2x3x8xf32> to vector<2x3x1x8xf32>
    %143 = vector.broadcast %142 : vector<2x3x1x8xf32> to vector<2x3x8x8xf32>
    %144 = arith.cmpf oeq, %80, %143 : vector<2x3x8x8xf32>
    %c9_i32_67 = arith.constant 9 : i32
    %145 = vector.broadcast %c9_i32_67 : i32 to vector<2x3x8x8xi32>
    %146 = arith.select %144, %140, %145 : vector<2x3x8x8xi1>, vector<2x3x8x8xi32>
    %cst_68 = arith.constant dense<2147483647> : vector<2x3x8xi32>
    %147 = vector.multi_reduction <minsi>, %146, %cst_68 [2] : vector<2x3x8x8xi32> to vector<2x3x8xi32>
    %148 = vector.shape_cast %147 : vector<2x3x8xi32> to vector<2x3x1x8xi32>
    %149 = vector.broadcast %148 : vector<2x3x1x8xi32> to vector<2x3x8x8xi32>
    %150 = arith.cmpi eq, %140, %149 : vector<2x3x8x8xi32>
    %cst_69 = arith.constant -1.000000e+30 : f32
    %151 = vector.broadcast %cst_69 : f32 to vector<2x3x8x8xf32>
    %152 = arith.select %150, %151, %80 : vector<2x3x8x8xi1>, vector<2x3x8x8xf32>
    %cst_70 = arith.constant dense<0xFF800000> : vector<2x3x8xf32>
    %153 = vector.multi_reduction <maximumf>, %152, %cst_70 [2] : vector<2x3x8x8xf32> to vector<2x3x8xf32>
    %154 = vector.shape_cast %153 : vector<2x3x8xf32> to vector<2x3x1x8xf32>
    %155 = arith.addf %142, %154 : vector<2x3x1x8xf32>
    %156 = vector.broadcast %154 : vector<2x3x1x8xf32> to vector<2x3x8x8xf32>
    %157 = arith.cmpf oeq, %152, %156 : vector<2x3x8x8xf32>
    %c9_i32_71 = arith.constant 9 : i32
    %158 = vector.broadcast %c9_i32_71 : i32 to vector<2x3x8x8xi32>
    %159 = arith.select %157, %140, %158 : vector<2x3x8x8xi1>, vector<2x3x8x8xi32>
    %cst_72 = arith.constant dense<2147483647> : vector<2x3x8xi32>
    %160 = vector.multi_reduction <minsi>, %159, %cst_72 [2] : vector<2x3x8x8xi32> to vector<2x3x8xi32>
    %161 = vector.shape_cast %160 : vector<2x3x8xi32> to vector<2x3x1x8xi32>
    %162 = vector.broadcast %161 : vector<2x3x1x8xi32> to vector<2x3x8x8xi32>
    %163 = arith.cmpi eq, %140, %162 : vector<2x3x8x8xi32>
    %cst_73 = arith.constant -1.000000e+30 : f32
    %164 = vector.broadcast %cst_73 : f32 to vector<2x3x8x8xf32>
    %165 = arith.select %163, %164, %152 : vector<2x3x8x8xi1>, vector<2x3x8x8xf32>
    %cst_74 = arith.constant dense<0xFF800000> : vector<2x3x8xf32>
    %166 = vector.multi_reduction <maximumf>, %165, %cst_74 [2] : vector<2x3x8x8xf32> to vector<2x3x8xf32>
    %167 = vector.shape_cast %166 : vector<2x3x8xf32> to vector<2x3x1x8xf32>
    %168 = arith.addf %155, %167 : vector<2x3x1x8xf32>
    %169 = vector.broadcast %167 : vector<2x3x1x8xf32> to vector<2x3x8x8xf32>
    %170 = arith.cmpf oeq, %165, %169 : vector<2x3x8x8xf32>
    %c9_i32_75 = arith.constant 9 : i32
    %171 = vector.broadcast %c9_i32_75 : i32 to vector<2x3x8x8xi32>
    %172 = arith.select %170, %140, %171 : vector<2x3x8x8xi1>, vector<2x3x8x8xi32>
    %cst_76 = arith.constant dense<2147483647> : vector<2x3x8xi32>
    %173 = vector.multi_reduction <minsi>, %172, %cst_76 [2] : vector<2x3x8x8xi32> to vector<2x3x8xi32>
    %174 = vector.shape_cast %173 : vector<2x3x8xi32> to vector<2x3x1x8xi32>
    %175 = vector.broadcast %174 : vector<2x3x1x8xi32> to vector<2x3x8x8xi32>
    %176 = arith.cmpi eq, %140, %175 : vector<2x3x8x8xi32>
    %cst_77 = arith.constant -1.000000e+30 : f32
    %177 = vector.broadcast %cst_77 : f32 to vector<2x3x8x8xf32>
    %178 = arith.select %176, %177, %165 : vector<2x3x8x8xi1>, vector<2x3x8x8xf32>
    %cst_78 = arith.constant dense<0xFF800000> : vector<2x3x8xf32>
    %179 = vector.multi_reduction <maximumf>, %178, %cst_78 [2] : vector<2x3x8x8xf32> to vector<2x3x8xf32>
    %180 = vector.shape_cast %179 : vector<2x3x8xf32> to vector<2x3x1x8xf32>
    %181 = arith.addf %168, %180 : vector<2x3x1x8xf32>
    %182 = vector.broadcast %180 : vector<2x3x1x8xf32> to vector<2x3x8x8xf32>
    %183 = arith.cmpf oeq, %178, %182 : vector<2x3x8x8xf32>
    %c9_i32_79 = arith.constant 9 : i32
    %184 = vector.broadcast %c9_i32_79 : i32 to vector<2x3x8x8xi32>
    %185 = arith.select %183, %140, %184 : vector<2x3x8x8xi1>, vector<2x3x8x8xi32>
    %cst_80 = arith.constant dense<2147483647> : vector<2x3x8xi32>
    %186 = vector.multi_reduction <minsi>, %185, %cst_80 [2] : vector<2x3x8x8xi32> to vector<2x3x8xi32>
    %187 = vector.shape_cast %186 : vector<2x3x8xi32> to vector<2x3x1x8xi32>
    %188 = vector.broadcast %187 : vector<2x3x1x8xi32> to vector<2x3x8x8xi32>
    %189 = arith.cmpi eq, %140, %188 : vector<2x3x8x8xi32>
    %cst_81 = arith.constant -1.000000e+30 : f32
    %190 = vector.broadcast %cst_81 : f32 to vector<2x3x8x8xf32>
    %191 = arith.select %189, %190, %178 : vector<2x3x8x8xi1>, vector<2x3x8x8xf32>
    %cst_82 = arith.constant dense<0xFF800000> : vector<2x3x8xf32>
    %192 = vector.multi_reduction <maximumf>, %191, %cst_82 [2] : vector<2x3x8x8xf32> to vector<2x3x8xf32>
    %193 = vector.shape_cast %192 : vector<2x3x8xf32> to vector<2x3x1x8xf32>
    %194 = arith.addf %181, %193 : vector<2x3x1x8xf32>
    %195 = vector.shape_cast %142 : vector<2x3x1x8xf32> to vector<2x3x8xf32>
    %196 = vector.shape_cast %194 : vector<2x3x1x8xf32> to vector<2x3x8xf32>
    %cst_83 = arith.constant 2.000000e-01 : f32
    %197 = vector.broadcast %cst_83 : f32 to vector<2x3x8xf32>
    %198 = arith.mulf %196, %197 : vector<2x3x8xf32>
    %c0_84 = arith.constant 0 : index
    %199 = memref.load %arg7[%c0_84] : memref<6xf32, #tpu.memory_space<smem>>
    %200 = vector.broadcast %199 : f32 to vector<2x3x8xf32>
    %201 = arith.mulf %200, %136 : vector<2x3x8xf32>
    %c1_85 = arith.constant 1 : index
    %202 = memref.load %arg7[%c1_85] : memref<6xf32, #tpu.memory_space<smem>>
    %203 = vector.broadcast %202 : f32 to vector<2x3x8xf32>
    %204 = arith.mulf %203, %139 : vector<2x3x8xf32>
    %205 = arith.addf %201, %204 : vector<2x3x8xf32>
    %c2_86 = arith.constant 2 : index
    %206 = memref.load %arg7[%c2_86] : memref<6xf32, #tpu.memory_space<smem>>
    %207 = vector.broadcast %206 : f32 to vector<2x3x8xf32>
    %208 = arith.mulf %207, %195 : vector<2x3x8xf32>
    %209 = arith.addf %205, %208 : vector<2x3x8xf32>
    %c3 = arith.constant 3 : index
    %210 = memref.load %arg7[%c3] : memref<6xf32, #tpu.memory_space<smem>>
    %211 = vector.broadcast %210 : f32 to vector<2x3x8xf32>
    %212 = arith.mulf %211, %198 : vector<2x3x8xf32>
    %213 = arith.addf %209, %212 : vector<2x3x8xf32>
    %c4 = arith.constant 4 : index
    %214 = memref.load %arg7[%c4] : memref<6xf32, #tpu.memory_space<smem>>
    %215 = vector.extract_strided_slice %9 {offsets = [0, 0, 0, 0], sizes = [2, 1, 3, 8], strides = [1, 1, 1, 1]} : vector<2x2x3x8xf32> to vector<2x1x3x8xf32>
    %216 = vector.shape_cast %215 : vector<2x1x3x8xf32> to vector<2x3x8xf32>
    %217 = vector.broadcast %214 : f32 to vector<2x3x8xf32>
    %218 = arith.mulf %217, %216 : vector<2x3x8xf32>
    %219 = arith.addf %213, %218 : vector<2x3x8xf32>
    %c5 = arith.constant 5 : index
    %220 = memref.load %arg7[%c5] : memref<6xf32, #tpu.memory_space<smem>>
    %221 = vector.extract_strided_slice %9 {offsets = [0, 1, 0, 0], sizes = [2, 1, 3, 8], strides = [1, 1, 1, 1]} : vector<2x2x3x8xf32> to vector<2x1x3x8xf32>
    %222 = vector.shape_cast %221 : vector<2x1x3x8xf32> to vector<2x3x8xf32>
    %223 = vector.broadcast %220 : f32 to vector<2x3x8xf32>
    %224 = arith.mulf %223, %222 : vector<2x3x8xf32>
    %225 = arith.addf %219, %224 : vector<2x3x8xf32>
    %c0_87 = arith.constant 0 : index
    %226 = memref.load %arg8[%c0_87] : memref<1xf32, #tpu.memory_space<smem>>
    %227 = vector.broadcast %226 : f32 to vector<2x3x8xf32>
    %228 = arith.addf %225, %227 : vector<2x3x8xf32>
    %229 = arith.negf %228 : vector<2x3x8xf32>
    %230 = math.exp %229 : vector<2x3x8xf32>
    %cst_88 = arith.constant 1.000000e+00 : f32
    %231 = vector.broadcast %cst_88 : f32 to vector<2x3x8xf32>
    %232 = arith.addf %231, %230 : vector<2x3x8xf32>
    %233 = arith.divf %231, %232 : vector<2x3x8xf32>
    %cst_89 = arith.constant dense<0.000000e+00> : vector<2x3xf32>
    %234 = vector.multi_reduction <add>, %233, %cst_89 [2] : vector<2x3x8xf32> to vector<2x3xf32>
    %cst_90 = arith.constant 1.250000e-01 : f32
    %235 = vector.broadcast %cst_90 : f32 to vector<2x3xf32>
    %236 = arith.mulf %234, %235 : vector<2x3xf32>
    %237 = vector.shape_cast %236 : vector<2x3xf32> to vector<1x2x3xf32>
    %c0_91 = arith.constant 0 : index
    %c0_92 = arith.constant 0 : index
    %c0_93 = arith.constant 0 : index
    %238 = vector.load %arg9[%c0_91, %c0_92, %c0_93] : memref<1x2x3xf32, #tpu.memory_space<vmem>>, vector<1x2x3xf32>
    tpu.vector_store %arg9[%c0_91, %c0_92, %c0_93], %237 {strides = array<i32>} : memref<1x2x3xf32, #tpu.memory_space<vmem>>, vector<1x2x3xf32>,
    return
  }
  func.func @transform_0(%arg0: i32) -> (i32, i32, i32, i32) {
    %c0_i32 = arith.constant 0 : i32
    %c0_i32_0 = arith.constant 0 : i32
    %c0_i32_1 = arith.constant 0 : i32
    %c0_i32_2 = arith.constant 0 : i32
    return %arg0, %c0_i32, %c0_i32_0, %c0_i32_1 : i32, i32, i32, i32
  }
  func.func @transform_1(%arg0: i32) -> (i32, i32, i32, i32, i32) {
    %c0_i32 = arith.constant 0 : i32
    %c0_i32_0 = arith.constant 0 : i32
    %c0_i32_1 = arith.constant 0 : i32
    %c0_i32_2 = arith.constant 0 : i32
    %c0_i32_3 = arith.constant 0 : i32
    return %arg0, %c0_i32, %c0_i32_0, %c0_i32_1, %c0_i32_2 : i32, i32, i32, i32, i32
  }
  func.func @transform_2(%arg0: i32) -> (i32, i32, i32) {
    %c0_i32 = arith.constant 0 : i32
    %c0_i32_0 = arith.constant 0 : i32
    %c0_i32_1 = arith.constant 0 : i32
    return %arg0, %c0_i32, %c0_i32_0 : i32, i32, i32
  }
  func.func @transform_3(%arg0: i32) -> (i32, i32, i32, i32) {
    %c0_i32 = arith.constant 0 : i32
    %c0_i32_0 = arith.constant 0 : i32
    %c0_i32_1 = arith.constant 0 : i32
    %c0_i32_2 = arith.constant 0 : i32
    return %arg0, %c0_i32, %c0_i32_0, %c0_i32_1 : i32, i32, i32, i32
  }
  func.func @transform_4(%arg0: i32) -> (i32, i32, i32, i32, i32) {
    %c0_i32 = arith.constant 0 : i32
    %c0_i32_0 = arith.constant 0 : i32
    %c0_i32_1 = arith.constant 0 : i32
    %c0_i32_2 = arith.constant 0 : i32
    %c0_i32_3 = arith.constant 0 : i32
    return %arg0, %c0_i32, %c0_i32_0, %c0_i32_1, %c0_i32_2 : i32, i32, i32, i32, i32
  }
  func.func @transform_5(%arg0: i32) -> (i32, i32, i32) {
    %c0_i32 = arith.constant 0 : i32
    %c0_i32_0 = arith.constant 0 : i32
    %c0_i32_1 = arith.constant 0 : i32
    %c0_i32_2 = arith.constant 0 : i32
    return %c0_i32, %c0_i32_0, %c0_i32_1 : i32, i32, i32
  }
  func.func @transform_6(%arg0: i32) -> i32 {
    %c0_i32 = arith.constant 0 : i32
    %c0_i32_0 = arith.constant 0 : i32
    return %c0_i32 : i32
  }
  func.func @transform_7(%arg0: i32) -> i32 {
    %c0_i32 = arith.constant 0 : i32
    %c0_i32_0 = arith.constant 0 : i32
    return %c0_i32 : i32
  }
  func.func @transform_8(%arg0: i32) -> (i32, i32, i32) {
    %c0_i32 = arith.constant 0 : i32
    %c0_i32_0 = arith.constant 0 : i32
    %c0_i32_1 = arith.constant 0 : i32
    return %arg0, %c0_i32, %c0_i32_0 : i32, i32, i32
  }
}

</mosaic_0001>

<bundles_post_ra>
// kernel: pdrmm_forward.1
= control target key start
LH: loop header
LB: loop body
LE: loop exit
PB: predicated region body
PF: predicated region fallthrough
CT: control target
= control target key end

     0   :  { %s4755_s0 = inlined_call_operand.vmem [shape: f32[2,2,10,32], index: 0, kind: input, shape index: {}]   ;;  %s4756_s1 = inlined_call_operand.vmem [shape: f32[2,2,3,10,32], index: 1, kind: input, shape index: {}]   ;;  %s4757_s2 = inlined_call_operand.vmem [shape: f32[2,2,8], index: 2, kind: input, shape index: {}]   ;;  %s4758_s3 = inlined_call_operand.vmem [shape: f32[2,2,3,8], index: 3, kind: input, shape index: {}]   ;;  %s4759_s4 = inlined_call_operand.vmem [shape: f32[2,2,2,3,8], index: 4, kind: input, shape index: {}]   ;;  %s4760_s5 = inlined_call_operand.vmem [shape: f32[3,32,32], index: 5, kind: input, shape index: {}]   ;;  %s4761_s6 = inlined_call_operand.vmem [shape: f32[6], index: 6, kind: input, shape index: {}]   ;;  %s4762_s7 = inlined_call_operand.<no memory space> [shape: f32[1], index: 7, kind: input, shape index: {}]   ;;  %s4763_s8 = inlined_call_operand.vmem [shape: f32[2,2,3], index: 8, kind: output, shape index: {}]  }
   0x1   :  { %13 = sst [smem:[#allocation2]] %s4762_s7 }
   0x2   :  { %14 = vsyncpa [#allocation4], 0  ;;  %s3595_s29 = smov 0  }
   0x3 LB: > { %s3601_s30 = sadd.s32 4294967295, %s3541_s29   ;;  %p3100_p0 = scmp.ge.s32.totalorder %s3541_s29, 1  ;;  %s3541_s29 = sphi %s3595_s29, %s20_s29  }
   0x4   : > { %p244_p1 = scmp.lt.s32.totalorder %s3541_s29, 3  ;;  %s260_s7 = sshll.u32 %s4761_s6, 4  ;;  %s261_s7 = int_to_ptr.vmem [resolvable:$true] %s260_s7 }
   0x5   : > { %p3446_p3 = scmp.eq.s32.totalorder %s3601_s30, 0  ;;  %s3516_s12 = scalar_lea.vmem %s261_s7, 16 }
   0x6   : > { %p3608_p2 = pnand %p3100_p0, %p244_p1  ;;  %p3517_p6 = scmp.ne.s32.totalorder %s261_s7, %s3516_s12 }
   0x7   : > { %p3524_p10 = scmp.lt.s32.totalorder %s261_s7, %s261_s7  ;;  %p3525_p11 = scmp.lt.s32.totalorder %s3516_s12, %s3516_s12 }
   0x8   : > { %p3442_p4 = pneg %p3608_p2 }
   0x9   : > { %p3526_p12 = por %p3525_p11, %p3524_p10 }
   0xa   : > { %p3443_p5 = pnand %p3446_p3, %p3442_p4 }
   0xc   : > { %p3518_p7 = pneg %p3443_p5 }
   0xe   : > { %p3519_p8 = pnand %p3518_p7, %p3517_p6 }
  0x10   : > { %p3520_p9 = pneg %p3519_p8 }
  0x12   : > { %p3527_p13 = pnand %p3526_p12, %p3520_p9 }
  0x14   : > { %3530 = shalt.err (!%p3527_p13)
}
  0x15   : > { %s3543_s13 = smov [#allocation3]   ;;  %315 = sbr.rel (%p3608_p2) target bundleno = 1123 (0x463), region = 52 }
  0x16   : > { %3445 = dma.vmem_to_smem (!%p3443_p5), %s261_s7, 16, %s3543_s13, [#allocation4]  }
  0x1c   : > { %3536 = dma.done.wait (%p3446_p3), [#allocation4], 16  }
  0x1d   : > { %3538 = vsyncadd (%p3446_p3), [#allocation4], 4294967280 }
  0x1e   : > { %321 = sfence }
  0x1f   : > { %v3114_v0 = vld [vmem:[%s4760_s5 + $0x20] sm:$0xff]  ;;  %v3115_v1 = vld [vmem:[%s4760_s5 + $0x28] sm:$0xff]  ;;  %v3116_v2 = vld [vmem:[%s4760_s5 + $0x30] sm:$0xff]  ;;  %p368_p0 = scmp.lt.s32.totalorder %s3601_s30, 1  ;;  %vm432_vm0 = vcmask 1046528   ;;  %vm439_vm1 = vcmask 261120  }
  0x20   : > { %v3371_v3 = vpack.c.bf16 %v3115_v1, %v3114_v0  ;;  %v3117_v4 = vld [vmem:[%s4760_s5 + $0x38] sm:$0xff]  ;;  %v419_v6 = vld [vmem:[%s4760_s5] sm:$0xff]  ;;  %v420_v7 = vld [vmem:[%s4760_s5 + $0x8] sm:$0xff]  ;;  %vm847_vm2 = vcmask 1045504   ;;  %vm3545_vm3 = vmmov 0   ;;  %vm1651_vm11 = vcmask 64512  }
  0x21   : > { %v3375_v5 = vpack.c.bf16 %v3117_v4, %v3116_v2  ;;  %s4766_s30 = smov (!%p368_p0, %s3601_s30), 1  ;;  %v3379_v8 = vpack.c.bf16 %v420_v7, %v419_v6  ;;  %v421_v9 = vld [vmem:[%s4760_s5 + $0x10] sm:$0xff]  ;;  %v422_v10 = vld [vmem:[%s4760_s5 + $0x18] sm:$0xff]  ;;  %v3134_v11 = vld [vmem:[%s4760_s5 + $0x40] sm:$0xff]  ;;  %s2804_s12 = sld [smem:[#allocation3]] }
  0x22   : > { %3372 = vmatprep.subr.bf16.mxu0 %v3371_v3  ;;  %3388 = vmatprep.subr.bf16.mxu1 %v3371_v3  ;;  %s3176_s26 = sshll.u32 %s4766_s30, 5  ;;  %s3437_s27 = smul.u32 96, %s4766_s30  ;;  %v3135_v19 = vld [vmem:[%s4760_s5 + $0x48] sm:$0xff]  ;;  %v3383_v24 = vpack.c.bf16 %v422_v10, %v421_v9  ;;  %v3136_v57 = vld [vmem:[%s4760_s5 + $0x50] sm:$0xff]  ;;  %v3137_v58 = vld [vmem:[%s4760_s5 + $0x58] sm:$0xff] }
  0x23   : > { %3374 = vmatpush3.bf16.msra.mxu0 %v3371_v3  ;;  %3390 = vmatpush3.bf16.msra.mxu1 %v3371_v3  ;;  %s372_s10 = scalar_lea.vmem %s4755_s0, %s3176_s26  ;;  %v3709_v36 = vpack.c.bf16 %v3135_v19, %v3134_v11  ;;  %v3407_v62 = vpack.c.bf16 %v3137_v58, %v3136_v57  ;;  %s3177_s25 = sshll.u32 %s4766_s30, 3 }
  0x24   : > { %3376 = vmatprep.subr.bf16.mxu0 %v3375_v5  ;;  %3392 = vmatprep.subr.bf16.mxu1 %v3375_v5  ;;  %s3662_s18 = scalar_lea.vmem %s4756_s1, %s3437_s27  ;;  %v3664_v12 = vld [vmem:[%s372_s10] sm:$0xff]  ;;  %v3666_v13 = vld [vmem:[%s372_s10 + $0x8] sm:$0x3]  ;;  %v3668_v14 = vld [vmem:[%s372_s10 + $0x10] sm:$0xff]  ;;  %s386_s28 = scalar_lea.vmem %s4758_s3, %s3177_s25 }
  0x25   : > { %v433_v15 = vrot.slane %v3664_v12, 1  ;;  %v434_v16 = vrot.slane %v3666_v13, 1  ;;  %v3672_v17 = vld [vmem:[%s372_s10 + $0x18] sm:$0x3]  ;;  %v436_v18 = vrot.slane %v3668_v14, 1  ;;  %v3680_v21 = vld [vmem:[%s3662_s18] sm:$0xff]  ;;  %v1066_v30 = vmul.f32 %v3664_v12, %v3664_v12 }
  0x26   : > { %v437_v20 = vrot.slane %v3672_v17, 1  ;;  %v3683_v22 = vld [vmem:[%s3662_s18 + $0x8] sm:$0x3]  ;;  %v3686_v23 = vld [vmem:[%s3662_s18 + $0x10] sm:$0xff]  ;;  %v610_v26 = vrot.slane %v3680_v21, 1  ;;  %v3695_v29 = vld [vmem:[%s3662_s18 + $0x20] sm:$0xff]  ;;  %v1067_v60 = vmul.f32 %v3668_v14, %v3668_v14  ;;  %v1140_v61 = vmul.f32 %v3680_v21, %v3680_v21 }
  0x27   : > { %3378 = vmatpush3.bf16.msra.mxu0 %v3375_v5  ;;  %3394 = vmatpush3.bf16.msra.mxu1 %v3375_v5  ;;  %v435_v25 = vsel %vm432_vm0, %v433_v15, %v434_v16  ;;  %v611_v27 = vrot.slane %v3683_v22, 1  ;;  %v3692_v28 = vld [vmem:[%s3662_s18 + $0x18] sm:$0x3]  ;;  %v613_v32 = vrot.slane %v3686_v23, 1  ;;  %v3704_v34 = vld [vmem:[%s3662_s18 + $0x28] sm:$0x3]  ;;  %v1141_v5 = vmul.f32 %v3686_v23, %v3686_v23 }
  0x28   : > { %3380 = vmatprep.subr.bf16.mxu0 %v3379_v8  ;;  %3396 = vmatprep.subr.bf16.mxu1 %v3379_v8  ;;  %v438_v31 = vsel %vm432_vm0, %v436_v18, %v437_v20  ;;  %v614_v33 = vrot.slane %v3692_v28, 1  ;;  %v3707_v35 = vld [vmem:[%s3662_s18 + $0x30] sm:$0xff]  ;;  %v616_v38 = vrot.slane %v3695_v29, 1  ;;  %v617_v39 = vrot.slane %v3704_v34, 1  ;;  %v3716_v40 = vld [vmem:[%s3662_s18 + $0x38] sm:$0x3] }
  0x29   : > { %3251 = vmatprep.mubr.msk.f32.mxu0 %vm439_vm1, %v435_v25  ;;  %v612_v37 = vsel %vm432_vm0, %v610_v26, %v611_v27  ;;  %v619_v41 = vrot.slane %v3707_v35, 1  ;;  %v3720_v42 = vld [vmem:[%s3662_s18 + $0x40] sm:$0xff]  ;;  %v849_v43 = vrot.slane %v3666_v13, 2  ;;  %v620_v45 = vrot.slane %v3716_v40, 1  ;;  %v3727_v46 = vld [vmem:[%s3662_s18 + $0x48] sm:$0x3] }
  0x2a   : > { %3252 = vmatmul.mubr.msk.f32.vlgmr.msra.gmra.mrb[0].mxu0 %vm439_vm1, %v438_v31  ;;  %3273 = vmatprep.mubr.msk.f32.mxu1 %vm439_vm1, %v612_v37  ;;  %v615_v44 = vsel %vm432_vm0, %v613_v32, %v614_v33  ;;  %v622_v47 = vrot.slane %v3720_v42, 1  ;;  %v3731_v48 = vld [vmem:[%s3662_s18 + $0x50] sm:$0xff]  ;;  %v618_v49 = vsel %vm432_vm0, %v616_v38, %v617_v39  ;;  %v623_v50 = vrot.slane %v3727_v46, 1  ;;  %v3737_v51 = vld [vmem:[%s3662_s18 + $0x58] sm:$0x3]  ;;  %s3108_s9 = sshll.u32 %s4766_s30, 1 }
  0x2b   : > { %3382 = vmatpush3.bf16.msra.mxu0 %v3379_v8  ;;  %3274 = vmatmul.mubr.msk.f32.vlgmr.msra.gmra.mrb[0].mxu1 %vm439_vm1, %v615_v44  ;;  %v1068_v52 = vsel %vm439_vm1, %v1066_v30, 0.0  ;;  %v848_v53 = vrot.slane %v3664_v12, 2  ;;  %v621_v54 = vsel %vm432_vm0, %v619_v41, %v620_v45  ;;  %v625_v55 = vrot.slane %v3731_v48, 1  ;;  %v3838_v45 = vld [vmem:[%s386_s28] sm:$0x7]  ;;  %s381_s11 = scalar_lea.vmem %s4757_s2, %s3108_s9  ;;  %s3163_s13 = sld [smem:[#allocation3 + $0x1]] }
  0x2c   : > { %3384 = vmatprep.subr.bf16.mxu0 %v3383_v24  ;;  %3398 = vmatpush3.bf16.msra.mxu1 %v3379_v8  ;;  %v626_v56 = vrot.slane %v3737_v51, 1  ;;  %v624_v59 = vsel %vm432_vm0, %v622_v47, %v623_v50  ;;  %v1071_v1 = vsel %vm439_vm1, %v1067_v60, 0.0  ;;  %v852_v2 = vrot.slane %v3672_v17, 2  ;;  %s3164_s14 = sld [smem:[#allocation3 + $0x2]]  ;;  %s4233_s15 = sld [smem:[#allocation3 + $0x3]] }
  0x2d   : > { %3276 = vmatprep.mubr.msk.f32.mxu1 %vm439_vm1, %v618_v49  ;;  %3400 = vmatprep.subr.bf16.mxu1 %v3383_v24  ;;  %v850_v63 = vsel %vm847_vm2, %v848_v53, %v849_v43  ;;  %v851_v3 = vrot.slane %v3668_v14, 2  ;;  %v1146_v4 = vsel %vm439_vm1, %v1140_v61, 0.0  ;;  %v1143_v6 = vmul.f32 %v3707_v35, %v3707_v35  ;;  %v3843_v49 = vld [vmem:[%s386_s28 + $0x4] sm:$0x7]  ;;  %s4242_s16 = sld [smem:[#allocation3 + $0x4]]  ;;  %s3178_s17 = sshll.u32 %s4766_s30, 4 }
  0x2e   : > { %3262 = vmatprep.mubr.msk.f32.mxu0 %vm439_vm1, %v3664_v12  ;;  %1069 = vadd.xlane.f32.xlu0 %v1068_v52  ;;  %v627_v0 = vsel %vm432_vm0, %v625_v55, %v626_v56  ;;  %v1149_v8 = vsel %vm439_vm1, %v1141_v5, 0.0  ;;  %v1144_v10 = vmul.f32 %v3720_v42, %v3720_v42  ;;  %v1142_v11 = vmul.f32 %v3695_v29, %v3695_v29  ;;  %s4255_s18 = sld [smem:[#allocation3 + $0x5]]  ;;  %s4264_s21 = scalar_lea.vmem %s4759_s4, %s3178_s17 }
  0x2f   : > { %3386 = vmatpush3.bf16.msra.mxu0 %v3383_v24  ;;  %3277 = vmatmul.mubr.msk.f32.gmra.mrb[2].mxu1 %vm439_vm1, %v621_v54  ;;  %v853_v7 = vsel %vm847_vm2, %v851_v3, %v852_v2  ;;  %v1155_v9 = vsel %vm439_vm1, %v1143_v6, 0.0  ;;  %v936_v13 = vrot.slane %v3683_v22, 2  ;;  %v935_v15 = vrot.slane %v3680_v21, 2  ;;  %s2898_s22 = sld [smem:[#allocation2]]  ;;  %s395_s25 = scalar_lea.vmem %s4763_s8, %s3108_s9 }
  0x30   : > { %3404 = vmatprep.subr.bf16.mxu0 %v3709_v36  ;;  %3402 = vmatpush3.bf16.msra.mxu1 %v3383_v24  ;;  %v1158_v16 = vsel %vm439_vm1, %v1144_v10, 0.0  ;;  %v1152_v17 = vsel %vm439_vm1, %v1142_v11, 0.0  ;;  %v1145_v18 = vmul.f32 %v3731_v48, %v3731_v48  ;;  %v939_v19 = vrot.slane %v3692_v28, 2 }
  0x31   : > { %3279 = vmatprep.mubr.msk.f32.mxu1 %vm439_vm1, %v624_v59  ;;  %3412 = vmatprep.subr.bf16.mxu1 %v3709_v36  ;;  %v938_v20 = vrot.slane %v3686_v23, 2  ;;  %v937_v22 = vsel %vm847_vm2, %v935_v15, %v936_v13  ;;  %v941_v24 = vrot.slane %v3695_v29, 2  ;;  %v942_v25 = vrot.slane %v3704_v34, 2 }
  0x32   : > { %3263 = vmatmul.mubr.msk.f32.vlgmr.msra.gmra.mrb[0].mxu0 %vm439_vm1, %v3668_v14  ;;  %1072 = vadd.xlane.f32.xlu1 %v1071_v1  ;;  %v1161_v26 = vsel %vm439_vm1, %v1145_v18, 0.0  ;;  %v944_v28 = vrot.slane %v3707_v35, 2  ;;  %v945_v30 = vrot.slane %v3716_v40, 2  ;;  %v947_v32 = vrot.slane %v3720_v42, 2 }
  0x33   : > { %3406 = vmatpush3.bf16.msra.mxu0 %v3709_v36  ;;  %3307 = vmatprep.mubr.msk.f32.mxu0 %vm439_vm1, %v850_v63  ;;  %v940_v27 = vsel %vm847_vm2, %v938_v20, %v939_v19  ;;  %v943_v31 = vsel %vm847_vm2, %v941_v24, %v942_v25  ;;  %v948_v33 = vrot.slane %v3727_v46, 2  ;;  %v951_v37 = vrot.slane %v3737_v51, 2 }
  0x34   : > { %3280 = vmatmul.mubr.msk.f32.gmra.mrb[4].mxu1 %vm439_vm1, %v627_v0  ;;  %3408 = vmatprep.subr.bf16.mxu0 %v3407_v62  ;;  %v946_v34 = vsel %vm847_vm2, %v944_v28, %v945_v30  ;;  %v1098_v38 = vlaneseq  ;;  %v3544_v51 = vmov 0.0  }
  0x35   : > { %3290 = vmatprep.mubr.msk.f32.mxu1 %vm439_vm1, %v3680_v21  ;;  %1147 = vadd.xlane.f32.xlu0 %v1146_v4  ;;  %v949_v39 = vsel %vm847_vm2, %v947_v32, %v948_v33 }
  0x36   : > { %1150 = vadd.xlane.f32.xlu1 %v1149_v8  ;;  %v3828_v41 = vshrl.u32 %v1098_v38, 7 }
  0x37   : > { %3410 = vmatpush3.bf16.msra.mxu0 %v3407_v62 }
  0x38   : > { %3291 = vmatmul.mubr.msk.f32.vlgmr.msra.gmra.mrb[0].mxu1 %vm439_vm1, %v3686_v23  ;;  %v1107_v43 = vsub.s32 1, %v3828_v41  ;;  %v3836_v44 = vsub.s32 0, %v3828_v41  ;;  %3327 = vmatprep.subr.mxu0 %v3544_v51 }
  0x39   : > { %3414 = vmatpush3.bf16.msra.mxu1 %v3709_v36  ;;  %3293 = vmatprep.mubr.msk.f32.mxu1 %vm439_vm1, %v3695_v29  ;;  %v950_v36 = vrot.slane %v3731_v48, 2 }
  0x3a   : > { %3308 = vmatmul.mubr.msk.f32.vlgmr.msra.gmra.mrb[0].mxu0 %vm439_vm1, %v853_v7  ;;  %3416 = vmatprep.subr.bf16.mxu1 %v3407_v62  ;;  %v1108_v46 = vrot.slane %v3838_v45, %v1107_v43  ;;  %v1101_v47 = vrot.slane %v3838_v45, %v3836_v44  ;;  %v1129_v50 = vrot.slane %v3843_v49, %v1107_v43 }
  0x3b   : > { %1156 = vadd.xlane.f32.xlu0 %v1155_v9  ;;  %1159 = vadd.xlane.f32.xlu1 %v1158_v16  ;;  %v952_v40 = vsel %vm847_vm2, %v950_v36, %v951_v37  ;;  %v1122_v52 = vrot.slane %v3843_v49, %v3836_v44 }
  0x3c   : > { %3294 = vmatmul.mubr.msk.f32.gmra.mrb[2].mxu1 %vm439_vm1, %v3707_v35  ;;  %3329 = vmatprep.mubr.msk.f32.mxu0 %vm3545_vm3, %v3544_v51 }
  0x3d   : > { %3418 = vmatpush3.bf16.msra.mxu1 %v3407_v62  ;;  %3296 = vmatprep.mubr.msk.f32.mxu1 %vm439_vm1, %v3720_v42 }
  0x3e   : > { %3419 = vmatprep.subr.mxu1 %v3544_v51 }
  0x3f   : > { %1153 = vadd.xlane.f32.xlu0 %v1152_v17  ;;  %1162 = vadd.xlane.f32.xlu1 %v1161_v26 }
  0x40   : > { %3297 = vmatmul.mubr.msk.f32.gmra.mrb[4].mxu1 %vm439_vm1, %v3731_v48 }
  0x41   : > { %3318 = vmatprep.mubr.msk.f32.mxu1 %vm439_vm1, %v937_v22 }
  0x44   : > { %3319 = vmatmul.mubr.msk.f32.vlgmr.msra.gmra.mrb[0].mxu1 %vm439_vm1, %v940_v27 }
  0x45   : > { %3321 = vmatprep.mubr.msk.f32.mxu1 %vm439_vm1, %v943_v31 }
  0x48   : > { %3322 = vmatmul.mubr.msk.f32.gmra.mrb[2].mxu1 %vm439_vm1, %v946_v34 }
  0x49   : > { %3324 = vmatprep.mubr.msk.f32.mxu1 %vm439_vm1, %v949_v39 }
  0x4c   : > { %3325 = vmatmul.mubr.msk.f32.gmra.mrb[4].mxu1 %vm439_vm1, %v952_v40 }
  0x4d   : > { %3335 = vmatprep.mubr.msk.f32.mxu1 %vm3545_vm3, %v3544_v51 }
  0x50   : > { %1110 = vbcast.lane.b32.xlu1 %v1108_v46, 256 }
  0x54   : > { %1131 = vbcast.lane.b32.xlu1 %v1129_v50, 256 }
  0x55   : > { %1103 = vbcast.lane.b32.xlu0 %v1101_v47, 256 }
  0x59   : > { %1124 = vbcast.lane.b32.xlu0 %v1122_v52, 256 }
  0xbb   : > { %v1070_v53 = vpop.xlane.xlu0 %1069 }
  0xbc   : > { %3460 = vrsqrt.f32 %v1070_v53  ;;  %vm1074_vm4 = vcmp.gt.f32.partialorder %v1070_v53, 0.0 }
  0xbf   : > { %v1073_v54 = vpop.xlane.xlu1 %1072 }
  0xc0   : > { %3462 = vrsqrt.f32 %v1073_v54  ;;  %vm1075_vm5 = vcmp.gt.f32.partialorder %v1073_v54, 0.0 }
  0xc2   : > { %v1148_v55 = vpop.xlane.xlu0 %1147 }
  0xc3   : > { %3464 = vrsqrt.f32 %v1148_v55  ;;  %v1151_v58 = vpop.xlane.xlu1 %1150  ;;  %vm1164_vm6 = vcmp.gt.f32.partialorder %v1148_v55, 0.0  ;;  %v1114_v55 = vsub.s32 2, %v3828_v41 }
  0xc4   : > { %3466 = vrsqrt.f32 %v1151_v58  ;;  %vm1165_vm7 = vcmp.gt.f32.partialorder %v1151_v58, 0.0 }
  0xc5   : > { %v1115_v58 = vrot.slane %v3838_v45, %v1114_v55 }
  0xc6   : > { %v3461_v56 = vpop.eup %3460 }
  0xc7   : > { %v1078_v57 = vsel %vm1074_vm4, %v3461_v56, 0.0  ;;  %v3546_v56 = vmov 1966171168  }
  0xc8   : > { %v1157_v59 = vpop.xlane.xlu0 %1156  ;;  %v1080_v60 = vmul.f32 %v1078_v57, %v3664_v12  ;;  %v1160_v61 = vpop.xlane.xlu1 %1159  ;;  %v1436_v57 = vunpack.c.l.s4 %v3546_v56 }
  0xc9   : > { %3468 = vrsqrt.f32 %v1157_v59  ;;  %vm1167_vm8 = vcmp.gt.f32.partialorder %v1157_v59, 0.0  ;;  %vm1168_vm9 = vcmp.gt.f32.partialorder %v1160_v61, 0.0 }
  0xca   : > { %3328 = vmatpush3.xpose.msk.msra.mxu0 %vm439_vm1, %v1080_v60  ;;  %3420 = vmatpush3.xpose.msk.msra.mxu1 %vm439_vm1, %v1080_v60  ;;  %v3463_v63 = vpop.eup %3462  ;;  %3470 = vrsqrt.f32 %v1160_v61  ;;  %v1437_v59 = vunpack.c.0.s8 %v1436_v57  ;;  %v1136_v60 = vrot.slane %v3843_v49, %v1114_v55  ;;  %v3154_v61 = vld.sshfl [vmem:[%s381_s11] sm:$0x11 pattern:$0x75316420] }
  0xcb   : > { %3338 = vmatprep.subr.mxu0 %v3544_v51  ;;  %3349 = vmatprep.subr.mxu1 %v3544_v51  ;;  %v1079_v1 = vsel %vm1075_vm5, %v3463_v63, 0.0 }
  0xcc   : > { %v3857_v62 = vpop.xlane.xlu0 %1153  ;;  %v3861_v2 = vpop.xlane.xlu1 %1162  ;;  %v1081_v5 = vmul.f32 %v1079_v1, %v3668_v14  ;;  %v1440_v63 = vsub.s32 %v1437_v59, %v3828_v41 }
  0xcd   : > { %v3465_v0 = vpop.eup %3464  ;;  %vm1166_vm12 = vcmp.gt.f32.partialorder %v3857_v62, 0.0  ;;  %vm1169_vm15 = vcmp.gt.f32.partialorder %v3861_v2, 0.0 }
  0xce   : > { %v1176_v12 = vsel %vm1164_vm6, %v3465_v0, 0.0  ;;  %v3467_v6 = vpop.eup %3466  ;;  %v1434_v0 = vcombine.high %v3154_v61, %v3154_v61 }
  0xcf   : > { %v1177_v9 = vsel %vm1165_vm7, %v3467_v6, 0.0 }
  0xd0   : > { %v1104_v3 = vpop.permute.xlu0 %1103  ;;  %v1111_v10 = vpop.permute.xlu1 %1110  ;;  %v1448_v1 = vrot.slane %v1434_v0, %v1440_v63 }
  0xd1   : > { %v1182_v4 = vmul.f32 %v1176_v12, %v1104_v3  ;;  %v1183_v13 = vmul.f32 %v1177_v9, %v1111_v10 }
  0xd3   : > { %v1188_v7 = vmul.f32 %v1182_v4, %v3680_v21  ;;  %v3469_v8 = vpop.eup %3468  ;;  %v1189_v17 = vmul.f32 %v1183_v13, %v3686_v23  ;;  %v1441_v4 = vrot.slane %v3154_v61, %v1440_v63 }
  0xd4   : > { %v1125_v11 = vpop.permute.xlu0 %1124  ;;  %v1179_v15 = vsel %vm1167_vm8, %v3469_v8, 0.0  ;;  %v3471_v14 = vpop.eup %3470 }
  0xd5   : > { %3330 = vmatmul.mubr.msk.f32.vlgmr.msra.gmra.mrb[2].mxu0 %vm439_vm1, %v1188_v7  ;;  %v1185_v16 = vmul.f32 %v1179_v15, %v1125_v11  ;;  %v1180_v21 = vsel %vm1168_vm9, %v3471_v14, 0.0  ;;  %v1132_v18 = vpop.permute.xlu1 %1131  ;;  %v3934_v45 = vrot.slane %v1441_v4, %v3836_v44 }
  0xd6   : > { %3332 = vmatprep.mubr.msk.f32.mxu0 %vm3545_vm3, %v3544_v51  ;;  %3339 = vmatpush3.xpose.msk.msra.mxu0 %vm439_vm1, %v1081_v5  ;;  %v1186_v20 = vmul.f32 %v1180_v21, %v1132_v18 }
  0xd7   : > { %3360 = vmatprep.subr.mxu0 %v3544_v51  ;;  %v1191_v19 = vmul.f32 %v1185_v16, %v3707_v35 }
  0xd8   : > { %v1192_v22 = vmul.f32 %v1186_v20, %v3720_v42 }
  0xd9   : > { %3333 = vmatmul.mubr.msk.f32.gmra.mrb[4].mxu0 %vm439_vm1, %v1189_v17 }
  0xda   : > { %3340 = vmatprep.mubr.msk.f32.mxu0 %vm3545_vm3, %v3544_v51 }
  0xdd   : > { %3341 = vmatmul.mubr.msk.f32.vlgmr.msra.gmra.mrb[6].mxu0 %vm439_vm1, %v1191_v19 }
  0xde   : > { %3343 = vmatprep.mubr.msk.f32.mxu0 %vm3545_vm3, %v3544_v51 }
  0xe1   : > { %3344 = vmatmul.mubr.msk.f32.gmra.mrb[8].mxu0 %vm439_vm1, %v1192_v22 }
  0xe2   : > { %3346 = vmatprep.mubr.msk.f32.mxu0 %vm3545_vm3, %v3544_v51 }
 0x10d   : > { %v3882_v23 = vpop.f32.mrb[0].mxu0 }
 0x10e   : > { %v1083_v35 = vmul.f32 %v3882_v23, %v3882_v23  ;;  %v3886_v24 = vpop.f32.mrb[1].mxu0 }
 0x10f   : > { %v1082_v42 = vmul.f32 %v3886_v24, %v3886_v24 }
 0x110   : > { %v1087_v25 = vsel %vm439_vm1, %v1083_v35, 0.0  ;;  %v3959_v35 = vrot.slane %v1448_v1, %v3836_v44 }
 0x111   : > { %1088 = vadd.xlane.f32.xlu1 %v1087_v25  ;;  %v1084_v26 = vsel %vm439_vm1, %v1082_v42, 0.0 }
 0x112   : > { %1085 = vadd.xlane.f32.xlu0 %v1084_v26 }
 0x117   : > { %v3892_v27 = vpop.f32.mrb[0].mxu1 }
 0x118   : > { %v1195_v28 = vmul.f32 %v3892_v27, %v3892_v27  ;;  %v3896_v30 = vpop.f32.mrb[1].mxu1 }
 0x119   : > { %v1194_v31 = vmul.f32 %v3896_v30, %v3896_v30 }
 0x11a   : > { %v1203_v32 = vsel %vm439_vm1, %v1195_v28, 0.0 }
 0x11b   : > { %v3901_v33 = vpop.f32.mrb[2].mxu1  ;;  %1204 = vadd.xlane.f32.xlu1 %v1203_v32  ;;  %v1200_v34 = vsel %vm439_vm1, %v1194_v31, 0.0 }
 0x11c   : > { %v1197_v36 = vmul.f32 %v3901_v33, %v3901_v33  ;;  %v3906_v37 = vpop.f32.mrb[3].mxu1  ;;  %1201 = vadd.xlane.f32.xlu0 %v1200_v34 }
 0x11d   : > { %v1196_v39 = vmul.f32 %v3906_v37, %v3906_v37 }
 0x11e   : > { %v1209_v40 = vsel %vm439_vm1, %v1197_v36, 0.0 }
 0x11f   : > { %v3911_v43 = vpop.f32.mrb[4].mxu1  ;;  %1210 = vadd.xlane.f32.xlu1 %v1209_v40  ;;  %v1206_v46 = vsel %vm439_vm1, %v1196_v39, 0.0 }
 0x120   : > { %v1199_v47 = vmul.f32 %v3911_v43, %v3911_v43  ;;  %v3916_v50 = vpop.f32.mrb[5].mxu1  ;;  %1207 = vadd.xlane.f32.xlu0 %v1206_v46 }
 0x121   : > { %v1198_v52 = vmul.f32 %v3916_v50, %v3916_v50 }
 0x122   : > { %v1215_v53 = vsel %vm439_vm1, %v1199_v47, 0.0 }
 0x123   : > { %1216 = vadd.xlane.f32.xlu1 %v1215_v53  ;;  %v1212_v54 = vsel %vm439_vm1, %v1198_v52, 0.0 }
 0x127   : > { %1213 = vadd.xlane.f32.xlu1 %v1212_v54 }
 0x136   : > { %1117 = vbcast.lane.b32.xlu0 %v1115_v58, 256 }
 0x138   : > { %1138 = vbcast.lane.b32.xlu1 %v1136_v60, 256 }
 0x19e   : > { %v1089_v12 = vpop.xlane.xlu1 %1088 }
 0x19f   : > { %3472 = vrsqrt.f32 %v1089_v12  ;;  %v1086_v3 = vpop.xlane.xlu0 %1085  ;;  %vm1091_vm10 = vcmp.gt.f32.partialorder %v1089_v12, 0.0 }
 0x1a0   : > { %3474 = vrsqrt.f32 %v3857_v62  ;;  %vm1090_vm13 = vcmp.gt.f32.partialorder %v1086_v3, 0.0 }
 0x1a1   : > { %3476 = vrsqrt.f32 %v1086_v3 }
 0x1a8   : > { %v3936_v5 = vpop.xlane.xlu1 %1204  ;;  %v1320_v49 = vpop.f32.mrb[2].mxu0 }
 0x1a9   : > { %v3473_v6 = vpop.eup %3472  ;;  %v1202_v7 = vpop.xlane.xlu0 %1201  ;;  %v3939_v8 = vmul.f32 %v3934_v45, %v1320_v49  ;;  %vm1219_vm0 = vcmp.gt.f32.partialorder %v3936_v5, 0.0 }
 0x1aa   : > { %v3331_v9 = vpop.f32.mrb[3].mxu0  ;;  %v1095_v10 = vsel %vm1091_vm10, %v3473_v6, 0.0  ;;  %3478 = vrsqrt.f32 %v1202_v7  ;;  %v3475_v19 = vpop.eup %3474  ;;  %vm1218_vm14 = vcmp.gt.f32.partialorder %v1202_v7, 0.0 }
 0x1ab   : > { %3480 = vrsqrt.f32 %v3861_v2  ;;  %v1097_v11 = vmul.f32 %v3882_v23, %v1095_v10  ;;  %v1652_v13 = vsel %vm1651_vm11, %v3939_v8, -inf  ;;  %v3477_v22 = vpop.eup %3476  ;;  %v1178_v31 = vsel %vm1166_vm12, %v3475_v19, 0.0 }
 0x1ac   : > { %3482 = vrsqrt.f32 %v3936_v5  ;;  %v3946_v15 = vpop.xlane.xlu1 %1210  ;;  %v1653_v16 = vrot.slane %v1652_v13, 4  ;;  %v1325_v14 = vpop.f32.mrb[4].mxu0  ;;  %v1094_v36 = vsel %vm1090_vm13, %v3477_v22, 0.0 }
 0x1ad   : > { %v3948_v17 = vpop.xlane.xlu0 %1207  ;;  %3361 = vmatpush3.xpose.msk.msra.mxu0 %vm439_vm1, %v1097_v11  ;;  %v3952_v21 = vmul.f32 %v3934_v45, %v1325_v14  ;;  %v3334_v18 = vpop.f32.mrb[5].mxu0  ;;  %3484 = vrsqrt.f32 %v3946_v15  ;;  %v1096_v58 = vmul.f32 %v1094_v36, %v3886_v24  ;;  %vm1221_vm4 = vcmp.gt.f32.partialorder %v3946_v15, 0.0 }
 0x1ae   : > { %v1654_v20 = vmax.f32 %v1652_v13, %v1653_v16  ;;  %3486 = vrsqrt.f32 %v3948_v17  ;;  %vm1220_vm5 = vcmp.gt.f32.partialorder %v3948_v17, 0.0 }
 0x1af   : > { %v1659_v23 = vsel %vm1651_vm11, %v3952_v21, -inf }
 0x1b0   : > { %v3962_v42 = vpop.xlane.xlu1 %1216  ;;  %v1655_v25 = vrot.slane %v1654_v20, 2  ;;  %v1660_v26 = vrot.slane %v1659_v23, 4  ;;  %v1412_v28 = vpop.f32.mrb[6].mxu0 }
 0x1b1   : > { %v1118_v62 = vpop.permute.xlu0 %1117  ;;  %v3965_v32 = vmul.f32 %v3959_v35, %v1412_v28  ;;  %v3342_v34 = vpop.f32.mrb[7].mxu0  ;;  %vm1223_vm10 = vcmp.gt.f32.partialorder %v3962_v42, 0.0 }
 0x1b2   : > { %v1184_v39 = vmul.f32 %v1178_v31, %v1118_v62  ;;  %v1656_v40 = vmax.f32 %v1654_v20, %v1655_v25  ;;  %v1661_v46 = vmax.f32 %v1659_v23, %v1660_v26 }
 0x1b3   : > { %v1673_v55 = vsel %vm1651_vm11, %v3965_v32, -inf }
 0x1b4   : > { %v3479_v44 = vpop.eup %3478  ;;  %v1190_v47 = vmul.f32 %v1184_v39, %v3695_v29  ;;  %v3968_v52 = vpop.xlane.xlu1 %1213  ;;  %v1657_v53 = vrot.slane %v1656_v40, 1  ;;  %v1662_v54 = vrot.slane %v1661_v46, 2  ;;  %v1674_v0 = vrot.slane %v1673_v55, 4 }
 0x1b5   : > { %v1417_v56 = vpop.f32.mrb[8].mxu0  ;;  %v3481_v57 = vpop.eup %3480  ;;  %v1230_v59 = vsel %vm1218_vm14, %v3479_v44, 0.0  ;;  %3488 = vrsqrt.f32 %v3968_v52  ;;  %vm1222_vm8 = vcmp.gt.f32.partialorder %v3968_v52, 0.0 }
 0x1b6   : > { %v3345_v60 = vpop.f32.mrb[9].mxu0  ;;  %v3483_v61 = vpop.eup %3482  ;;  %v3975_v63 = vmax.f32 %v1656_v40, %v1657_v53  ;;  %3336 = vmatmul.mubr.msk.f32.vlgmr.msra.gmra.mrb[6].mxu1 %vm439_vm1, %v1190_v47  ;;  %v1663_v29 = vmax.f32 %v1661_v46, %v1662_v54  ;;  %3490 = vrsqrt.f32 %v3962_v42  ;;  %v3983_v24 = vmul.f32 %v3959_v35, %v1417_v56 }
 0x1b7   : > { %3350 = vmatpush3.xpose.msk.msra.mxu1 %vm439_vm1, %v1096_v58  ;;  %3351 = vmatprep.mubr.msk.f32.mxu1 %vm3545_vm3, %v3544_v51  ;;  %v1236_v1 = vmul.f32 %v1230_v59, %v3896_v30  ;;  %v3485_v3 = vpop.eup %3484  ;;  %v1231_v4 = vsel %vm1219_vm0, %v3483_v61, 0.0  ;;  %v1181_v6 = vsel %vm1169_vm15, %v3481_v57, 0.0  ;;  %v1675_v11 = vmax.f32 %v1673_v55, %v1674_v0 }
 0x1b8   : > { %vm1694_vm2 = vcmp.eq.f32.partialorder %v3939_v8, %v3975_v63  ;;  %v1139_v12 = vpop.permute.xlu1 %1138  ;;  %v3487_v7 = vpop.eup %3486  ;;  %v1664_v10 = vrot.slane %v1663_v29, 1  ;;  %v1680_v13 = vsel %vm1651_vm11, %v3983_v24, -inf  ;;  %v1237_v2 = vmul.f32 %v3892_v27, %v1231_v4 }
 0x1b9   : > { %v1700_v49 = vsel %vm1694_vm2, %v3828_v41, 9  ;;  %v1187_v5 = vmul.f32 %v1181_v6, %v1139_v12  ;;  %v1681_v14 = vrot.slane %v1680_v13, 4  ;;  %v1233_v18 = vsel %vm1221_vm4, %v3485_v3, 0.0 }
 0x1ba   : > { %v1706_v9 = vsel %vm1651_vm11, %v1700_v49, 2147483647  ;;  %3352 = vmatmul.mubr.msk.f32.vlgmr.msra.gmra.mrb[8].mxu1 %vm439_vm1, %v1236_v1  ;;  %v4001_v16 = vmax.f32 %v1663_v29, %v1664_v10  ;;  %v1232_v19 = vsel %vm1220_vm5, %v3487_v7, 0.0  ;;  %v1676_v20 = vrot.slane %v1675_v11, 2 }
 0x1bb   : > { %v1707_v30 = vrot.slane %v1706_v9, 4  ;;  %3354 = vmatprep.mubr.msk.f32.mxu1 %vm3545_vm3, %v3544_v51  ;;  %v1193_v15 = vmul.f32 %v1187_v5, %v3731_v48  ;;  %v1682_v22 = vmax.f32 %v1680_v13, %v1681_v14  ;;  %v1239_v48 = vmul.f32 %v3901_v33, %v1233_v18 }
 0x1bc   : > { %vm1695_vm7 = vcmp.eq.f32.partialorder %v3952_v21, %v4001_v16  ;;  %v1677_v26 = vmax.f32 %v1675_v11, %v1676_v20  ;;  %v1238_v28 = vmul.f32 %v1232_v19, %v3906_v37 }
 0x1bd   : > { %vm1708_vm6 = vcmp.lt.s32.totalorder %v1706_v9, %v1707_v30  ;;  %3347 = vmatmul.mubr.msk.f32.gmra.mrb[10].mxu0 %vm439_vm1, %v1193_v15  ;;  %v1701_v25 = vsel %vm1695_vm7, %v3828_v41, 9  ;;  %v1683_v62 = vrot.slane %v1682_v22, 2 }
 0x1be   : > { %v1709_v17 = vsel %vm1708_vm6, %v1706_v9, %v1707_v30  ;;  %3355 = vmatmul.mubr.msk.f32.gmra.mrb[10].mxu1 %vm439_vm1, %v1237_v2  ;;  %3362 = vmatprep.mubr.msk.f32.mxu0 %vm3545_vm3, %v3544_v51  ;;  %v1716_v31 = vsel %vm1651_vm11, %v1701_v25, 2147483647  ;;  %v1678_v40 = vrot.slane %v1677_v26, 1 }
 0x1bf   : > { %v3489_v23 = vpop.eup %3488  ;;  %v1710_v27 = vrot.slane %v1709_v17, 2  ;;  %3357 = vmatprep.mubr.msk.f32.mxu1 %vm3545_vm3, %v3544_v51  ;;  %v1717_v39 = vrot.slane %v1716_v31, 4  ;;  %v1684_v44 = vmax.f32 %v1682_v22, %v1683_v62 }
 0x1c0   : > { %v3491_v34 = vpop.eup %3490  ;;  %v1234_v36 = vsel %vm1222_vm8, %v3489_v23, 0.0  ;;  %v4019_v37 = vmax.f32 %v1677_v26, %v1678_v40 }
 0x1c1   : > { %vm1711_vm9 = vcmp.lt.s32.totalorder %v1709_v17, %v1710_v27  ;;  %3363 = vmatmul.mubr.msk.f32.vlgmr.msra.gmra.mrb[12].mxu0 %vm439_vm1, %v1239_v48  ;;  %vm1718_vm12 = vcmp.lt.s32.totalorder %v1716_v31, %v1717_v39  ;;  %v1235_v47 = vsel %vm1223_vm10, %v3491_v34, 0.0  ;;  %v1240_v52 = vmul.f32 %v1234_v36, %v3916_v50 }
 0x1c2   : > { %v1712_v46 = vsel %vm1711_vm9, %v1709_v17, %v1710_v27  ;;  %3358 = vmatmul.mubr.msk.f32.gmra.mrb[12].mxu1 %vm439_vm1, %v1238_v28  ;;  %3365 = vmatprep.mubr.msk.f32.mxu0 %vm3545_vm3, %v3544_v51  ;;  %v1719_v53 = vsel %vm1718_vm12, %v1716_v31, %v1717_v39  ;;  %v1685_v54 = vrot.slane %v1684_v44, 1  ;;  %vm1697_vm14 = vcmp.eq.f32.partialorder %v3965_v32, %v4019_v37 }
 0x1c3   : > { %v1713_v33 = vrot.slane %v1712_v46, 1  ;;  %v1720_v55 = vrot.slane %v1719_v53, 2  ;;  %v1703_v56 = vsel %vm1697_vm14, %v3828_v41, 9  ;;  %v1241_v58 = vmul.f32 %v3911_v43, %v1235_v47 }
 0x1c4   : > { %v4028_v57 = vmax.f32 %v1684_v44, %v1685_v54  ;;  %v1736_v50 = vsel %vm1651_vm11, %v1703_v56, 2147483647 }
 0x1c5   : > { %vm1714_vm13 = vcmp.lt.s32.totalorder %v1712_v46, %v1713_v33  ;;  %3366 = vmatmul.mubr.msk.f32.gmra.mrb[14].mxu0 %vm439_vm1, %v1240_v52  ;;  %vm1721_vm0 = vcmp.lt.s32.totalorder %v1719_v53, %v1720_v55  ;;  %v1737_v61 = vrot.slane %v1736_v50, 4 }
 0x1c6   : > { %v1715_v42 = vsel %vm1714_vm13, %v1712_v46, %v1713_v33  ;;  %3368 = vmatprep.mubr.msk.f32.mxu0 %vm3545_vm3, %v3544_v51  ;;  %v1722_v60 = vsel %vm1721_vm0, %v1719_v53, %v1720_v55  ;;  %vm1698_vm2 = vcmp.eq.f32.partialorder %v3983_v24, %v4028_v57 }
 0x1c7   : > { %vm1766_vm15 = vcmp.eq.s32.totalorder %v3828_v41, %v1715_v42  ;;  %v1723_v43 = vrot.slane %v1722_v60, 1  ;;  %v1704_v0 = vsel %vm1698_vm2, %v3828_v41, 9  ;;  %vm1738_vm4 = vcmp.lt.s32.totalorder %v1736_v50, %v1737_v61 }
 0x1c8   : > { %v4037_v59 = vsel %vm1766_vm15, -1e+30, %v3939_v8  ;;  %v1746_v12 = vsel %vm1651_vm11, %v1704_v0, 2147483647  ;;  %v1739_v51 = vsel %vm1738_vm4, %v1736_v50, %v1737_v61 }
 0x1c9   : > { %v1778_v29 = vsel %vm1651_vm11, %v4037_v59, -inf  ;;  %3369 = vmatmul.mubr.msk.f32.gmra.mrb[16].mxu0 %vm439_vm1, %v1241_v58  ;;  %vm1724_vm3 = vcmp.lt.s32.totalorder %v1722_v60, %v1723_v43  ;;  %v1747_v8 = vrot.slane %v1746_v12, 4  ;;  %v1740_v49 = vrot.slane %v1739_v51, 2 }
 0x1ca   : > { %v1779_v1 = vrot.slane %v1778_v29, 4  ;;  %v1725_v4 = vsel %vm1724_vm3, %v1722_v60, %v1723_v43 }
 0x1cb   : > { %vm1767_vm5 = vcmp.eq.s32.totalorder %v3828_v41, %v1725_v4  ;;  %vm1748_vm6 = vcmp.lt.s32.totalorder %v1746_v12, %v1747_v8  ;;  %vm1741_vm7 = vcmp.lt.s32.totalorder %v1739_v51, %v1740_v49 }
 0x1cc   : > { %v1780_v3 = vmax.f32 %v1778_v29, %v1779_v1  ;;  %v4048_v7 = vsel %vm1767_vm5, -1e+30, %v3952_v21  ;;  %v1749_v9 = vsel %vm1748_vm6, %v1746_v12, %v1747_v8  ;;  %v1742_v5 = vsel %vm1741_vm7, %v1739_v51, %v1740_v49 }
 0x1cd   : > { %v1785_v10 = vsel %vm1651_vm11, %v4048_v7, -inf  ;;  %v1750_v30 = vrot.slane %v1749_v9, 2  ;;  %v1743_v2 = vrot.slane %v1742_v5, 1 }
 0x1ce   : > { %v1781_v6 = vrot.slane %v1780_v3, 2  ;;  %v1786_v13 = vrot.slane %v1785_v10, 4 }
 0x1cf   : > { %vm1751_vm1 = vcmp.lt.s32.totalorder %v1749_v9, %v1750_v30  ;;  %vm1744_vm8 = vcmp.lt.s32.totalorder %v1742_v5, %v1743_v2 }
 0x1d0   : > { %v1782_v11 = vmax.f32 %v1780_v3, %v1781_v6  ;;  %v1787_v14 = vmax.f32 %v1785_v10, %v1786_v13  ;;  %v1752_v18 = vsel %vm1751_vm1, %v1749_v9, %v1750_v30  ;;  %v1745_v19 = vsel %vm1744_vm8, %v1742_v5, %v1743_v2 }
 0x1d1   : > { %v1753_v20 = vrot.slane %v1752_v18, 1  ;;  %vm1769_vm9 = vcmp.eq.s32.totalorder %v3828_v41, %v1745_v19 }
 0x1d2   : > { %v1783_v15 = vrot.slane %v1782_v11, 1  ;;  %v1788_v21 = vrot.slane %v1787_v14, 2  ;;  %v4054_v22 = vsel %vm1769_vm9, -1e+30, %v3965_v32 }
 0x1d3   : > { %vm1754_vm10 = vcmp.lt.s32.totalorder %v1752_v18, %v1753_v20  ;;  %v1799_v25 = vsel %vm1651_vm11, %v4054_v22, -inf }
 0x1d4   : > { %v1784_v17 = vmax.f32 %v1782_v11, %v1783_v15  ;;  %v1789_v27 = vmax.f32 %v1787_v14, %v1788_v21  ;;  %v1800_v48 = vrot.slane %v1799_v25, 4  ;;  %v1755_v28 = vsel %vm1754_vm10, %v1752_v18, %v1753_v20 }
 0x1d5   : > { %vm1770_vm13 = vcmp.eq.s32.totalorder %v3828_v41, %v1755_v28 }
 0x1d6   : > { %v4057_v23 = vadd.f32 %v1784_v17, %v3975_v63  ;;  %vm1826_vm12 = vcmp.eq.f32.partialorder %v4037_v59, %v1784_v17  ;;  %v1790_v62 = vrot.slane %v1789_v27, 1  ;;  %v1801_v34 = vmax.f32 %v1799_v25, %v1800_v48 }
 0x1d7   : > { %v1832_v26 = vsel %vm1826_vm12, %v3828_v41, 9  ;;  %v4066_v36 = vsel %vm1770_vm13, -1e+30, %v3983_v24 }
 0x1d8   : > { %v1838_v31 = vsel %vm1651_vm11, %v1832_v26, 2147483647  ;;  %v1791_v39 = vmax.f32 %v1789_v27, %v1790_v62  ;;  %v1806_v40 = vsel %vm1651_vm11, %v4066_v36, -inf  ;;  %v1802_v46 = vrot.slane %v1801_v34, 2 }
 0x1d9   : > { %v1839_v32 = vrot.slane %v1838_v31, 4  ;;  %v1807_v44 = vrot.slane %v1806_v40, 4 }
 0x1da   : > { %v4071_v47 = vadd.f32 %v1791_v39, %v4001_v16  ;;  %vm1827_vm15 = vcmp.eq.f32.partialorder %v4048_v7, %v1791_v39  ;;  %v1803_v54 = vmax.f32 %v1801_v34, %v1802_v46 }
 0x1db   : > { %vm1840_vm14 = vcmp.lt.s32.totalorder %v1838_v31, %v1839_v32  ;;  %v1833_v53 = vsel %vm1827_vm15, %v3828_v41, 9  ;;  %v1808_v55 = vmax.f32 %v1806_v40, %v1807_v44 }
 0x1dc   : > { %v1841_v33 = vsel %vm1840_vm14, %v1838_v31, %v1839_v32  ;;  %v1848_v24 = vsel %vm1651_vm11, %v1833_v53, 2147483647  ;;  %v1804_v56 = vrot.slane %v1803_v54, 1 }
 0x1dd   : > { %v1842_v52 = vrot.slane %v1841_v33, 2  ;;  %v1849_v42 = vrot.slane %v1848_v24, 4  ;;  %v1809_v58 = vrot.slane %v1808_v55, 2 }
 0x1de   : > { %v1805_v61 = vmax.f32 %v1803_v54, %v1804_v56 }
 0x1df   : > { %vm1843_vm0 = vcmp.lt.s32.totalorder %v1841_v33, %v1842_v52  ;;  %vm1850_vm2 = vcmp.lt.s32.totalorder %v1848_v24, %v1849_v42  ;;  %v1810_v29 = vmax.f32 %v1808_v55, %v1809_v58 }
 0x1e0   : > { %v1844_v50 = vsel %vm1843_vm0, %v1841_v33, %v1842_v52  ;;  %v1851_v43 = vsel %vm1850_vm2, %v1848_v24, %v1849_v42  ;;  %v4077_v1 = vadd.f32 %v1805_v61, %v4019_v37  ;;  %vm1829_vm3 = vcmp.eq.f32.partialorder %v4054_v22, %v1805_v61 }
 0x1e1   : > { %v1845_v60 = vrot.slane %v1844_v50, 1  ;;  %v1852_v0 = vrot.slane %v1851_v43, 2  ;;  %v1835_v51 = vsel %vm1829_vm3, %v3828_v41, 9  ;;  %v1811_v8 = vrot.slane %v1810_v29, 1 }
 0x1e2   : > { %v1868_v3 = vsel %vm1651_vm11, %v1835_v51, 2147483647 }
 0x1e3   : > { %vm1846_vm4 = vcmp.lt.s32.totalorder %v1844_v50, %v1845_v60  ;;  %vm1853_vm6 = vcmp.lt.s32.totalorder %v1851_v43, %v1852_v0  ;;  %v1869_v6 = vrot.slane %v1868_v3, 4  ;;  %v1812_v9 = vmax.f32 %v1810_v29, %v1811_v8 }
 0x1e4   : > { %v1847_v12 = vsel %vm1846_vm4, %v1844_v50, %v1845_v60  ;;  %v1854_v49 = vsel %vm1853_vm6, %v1851_v43, %v1852_v0 }
 0x1e5   : > { %vm1898_vm5 = vcmp.eq.s32.totalorder %v3828_v41, %v1847_v12  ;;  %v1855_v5 = vrot.slane %v1854_v49, 1  ;;  %vm1870_vm7 = vcmp.lt.s32.totalorder %v1868_v3, %v1869_v6  ;;  %v4089_v11 = vadd.f32 %v1812_v9, %v4028_v57 }
 0x1e6   : > { %v4084_v4 = vsel %vm1898_vm5, -1e+30, %v4037_v59  ;;  %vm1830_vm1 = vcmp.eq.f32.partialorder %v4066_v36, %v1812_v9  ;;  %v1871_v13 = vsel %vm1870_vm7, %v1868_v3, %v1869_v6 }
 0x1e7   : > { %v1910_v10 = vsel %vm1651_vm11, %v4084_v4, -inf  ;;  %vm1856_vm8 = vcmp.lt.s32.totalorder %v1854_v49, %v1855_v5  ;;  %v1836_v2 = vsel %vm1830_vm1, %v3828_v41, 9  ;;  %v1872_v14 = vrot.slane %v1871_v13, 2 }
 0x1e8   : > { %v1911_v30 = vrot.slane %v1910_v10, 4  ;;  %v1857_v15 = vsel %vm1856_vm8, %v1854_v49, %v1855_v5  ;;  %v1878_v18 = vsel %vm1651_vm11, %v1836_v2, 2147483647 }
 0x1e9   : > { %vm1899_vm9 = vcmp.eq.s32.totalorder %v3828_v41, %v1857_v15  ;;  %v1879_v19 = vrot.slane %v1878_v18, 4  ;;  %vm1873_vm10 = vcmp.lt.s32.totalorder %v1871_v13, %v1872_v14 }
 0x1ea   : > { %v1912_v59 = vmax.f32 %v1910_v10, %v1911_v30  ;;  %v4096_v17 = vsel %vm1899_vm9, -1e+30, %v4048_v7  ;;  %v1874_v27 = vsel %vm1873_vm10, %v1871_v13, %v1872_v14 }
 0x1eb   : > { %v1917_v21 = vsel %vm1651_vm11, %v4096_v17, -inf  ;;  %vm1880_vm12 = vcmp.lt.s32.totalorder %v1878_v18, %v1879_v19  ;;  %v1875_v48 = vrot.slane %v1874_v27, 1 }
 0x1ec   : > { %v1913_v20 = vrot.slane %v1912_v59, 2  ;;  %v1918_v26 = vrot.slane %v1917_v21, 4  ;;  %v1881_v28 = vsel %vm1880_vm12, %v1878_v18, %v1879_v19 }
 0x1ed   : > { %v1882_v31 = vrot.slane %v1881_v28, 2  ;;  %vm1876_vm13 = vcmp.lt.s32.totalorder %v1874_v27, %v1875_v48 }
 0x1ee   : > { %v1914_v25 = vmax.f32 %v1912_v59, %v1913_v20  ;;  %v1919_v32 = vmax.f32 %v1917_v21, %v1918_v26  ;;  %v1877_v34 = vsel %vm1876_vm13, %v1874_v27, %v1875_v48 }
 0x1ef   : > { %vm1883_vm14 = vcmp.lt.s32.totalorder %v1881_v28, %v1882_v31  ;;  %vm1901_vm15 = vcmp.eq.s32.totalorder %v3828_v41, %v1877_v34 }
 0x1f0   : > { %v1915_v62 = vrot.slane %v1914_v25, 1  ;;  %v1920_v40 = vrot.slane %v1919_v32, 2  ;;  %v1884_v7 = vsel %vm1883_vm14, %v1881_v28, %v1882_v31  ;;  %v4102_v46 = vsel %vm1901_vm15, -1e+30, %v4054_v22 }
 0x1f1   : > { %v1885_v44 = vrot.slane %v1884_v7, 1  ;;  %v1931_v53 = vsel %vm1651_vm11, %v4102_v46, -inf }
 0x1f2   : > { %v1916_v39 = vmax.f32 %v1914_v25, %v1915_v62  ;;  %v1921_v52 = vmax.f32 %v1919_v32, %v1920_v40  ;;  %v1932_v55 = vrot.slane %v1931_v53, 4 }
 0x1f3   : > { %vm1886_vm2 = vcmp.lt.s32.totalorder %v1884_v7, %v1885_v44 }
 0x1f4   : > { %v4105_v33 = vadd.f32 %v1916_v39, %v4057_v23  ;;  %vm1958_vm0 = vcmp.eq.f32.partialorder %v4084_v4, %v1916_v39  ;;  %v1922_v42 = vrot.slane %v1921_v52, 1  ;;  %v1887_v56 = vsel %vm1886_vm2, %v1884_v7, %v1885_v44 }
 0x1f5   : > { %v1964_v54 = vsel %vm1958_vm0, %v3828_v41, 9  ;;  %v1933_v58 = vmax.f32 %v1931_v53, %v1932_v55  ;;  %vm1902_vm4 = vcmp.eq.s32.totalorder %v3828_v41, %v1887_v56 }
 0x1f6   : > { %v1970_v24 = vsel %vm1651_vm11, %v1964_v54, 2147483647  ;;  %v1923_v23 = vmax.f32 %v1921_v52, %v1922_v42  ;;  %v4114_v50 = vsel %vm1902_vm4, -1e+30, %v4066_v36 }
 0x1f7   : > { %v1971_v22 = vrot.slane %v1970_v24, 4  ;;  %v1934_v60 = vrot.slane %v1933_v58, 2  ;;  %v1938_v61 = vsel %vm1651_vm11, %v4114_v50, -inf }
 0x1f8   : > { %v4119_v43 = vadd.f32 %v1923_v23, %v4071_v47  ;;  %vm1959_vm5 = vcmp.eq.f32.partialorder %v4096_v17, %v1923_v23  ;;  %v1939_v0 = vrot.slane %v1938_v61, 4 }
 0x1f9   : > { %vm1972_vm3 = vcmp.lt.s32.totalorder %v1970_v24, %v1971_v22  ;;  %v1965_v51 = vsel %vm1959_vm5, %v3828_v41, 9  ;;  %v1935_v8 = vmax.f32 %v1933_v58, %v1934_v60 }
 0x1fa   : > { %v1973_v29 = vsel %vm1972_vm3, %v1970_v24, %v1971_v22  ;;  %v1980_v3 = vsel %vm1651_vm11, %v1965_v51, 2147483647  ;;  %v1940_v36 = vmax.f32 %v1938_v61, %v1939_v0 }
 0x1fb   : > { %v1974_v12 = vrot.slane %v1973_v29, 2  ;;  %v1981_v49 = vrot.slane %v1980_v3, 4  ;;  %v1936_v6 = vrot.slane %v1935_v8, 1 }
 0x1fc   : > { %v1941_v10 = vrot.slane %v1940_v36, 2 }
 0x1fd   : > { %vm1975_vm6 = vcmp.lt.s32.totalorder %v1973_v29, %v1974_v12  ;;  %vm1982_vm7 = vcmp.lt.s32.totalorder %v1980_v3, %v1981_v49  ;;  %v1937_v30 = vmax.f32 %v1935_v8, %v1936_v6 }
 0x1fe   : > { %v1976_v9 = vsel %vm1975_vm6, %v1973_v29, %v1974_v12  ;;  %v1983_v47 = vsel %vm1982_vm7, %v1980_v3, %v1981_v49  ;;  %v1942_v13 = vmax.f32 %v1940_v36, %v1941_v10 }
 0x1ff   : > { %v1977_v5 = vrot.slane %v1976_v9, 1  ;;  %v1984_v2 = vrot.slane %v1983_v47, 2  ;;  %v4125_v59 = vadd.f32 %v1937_v30, %v4077_v1  ;;  %vm1961_vm8 = vcmp.eq.f32.partialorder %v4102_v46, %v1937_v30 }
 0x200   : > { %v1967_v14 = vsel %vm1961_vm8, %v3828_v41, 9  ;;  %v1943_v18 = vrot.slane %v1942_v13, 1 }
 0x201   : > { %vm1978_vm1 = vcmp.lt.s32.totalorder %v1976_v9, %v1977_v5  ;;  %vm1985_vm10 = vcmp.lt.s32.totalorder %v1983_v47, %v1984_v2  ;;  %v2000_v19 = vsel %vm1651_vm11, %v1967_v14, 2147483647 }
 0x202   : > { %v1979_v15 = vsel %vm1978_vm1, %v1976_v9, %v1977_v5  ;;  %v1986_v21 = vsel %vm1985_vm10, %v1983_v47, %v1984_v2  ;;  %v2001_v27 = vrot.slane %v2000_v19, 4  ;;  %v1944_v25 = vmax.f32 %v1942_v13, %v1943_v18 }
 0x203   : > { %vm2030_vm9 = vcmp.eq.s32.totalorder %v3828_v41, %v1979_v15  ;;  %v1987_v26 = vrot.slane %v1986_v21, 1 }
 0x204   : > { %v4132_v20 = vsel %vm2030_vm9, -1e+30, %v4084_v4  ;;  %vm2002_vm12 = vcmp.lt.s32.totalorder %v2000_v19, %v2001_v27  ;;  %v4137_v28 = vadd.f32 %v1944_v25, %v4089_v11  ;;  %vm1962_vm13 = vcmp.eq.f32.partialorder %v4114_v50, %v1944_v25 }
 0x205   : > { %v2042_v1 = vsel %vm1651_vm11, %v4132_v20, -inf  ;;  %vm1988_vm14 = vcmp.lt.s32.totalorder %v1986_v21, %v1987_v26  ;;  %v2003_v31 = vsel %vm2002_vm12, %v2000_v19, %v2001_v27  ;;  %v1968_v62 = vsel %vm1962_vm13, %v3828_v41, 9 }
 0x206   : > { %v2043_v48 = vrot.slane %v2042_v1, 4  ;;  %v1989_v32 = vsel %vm1988_vm14, %v1986_v21, %v1987_v26  ;;  %v2004_v34 = vrot.slane %v2003_v31, 2  ;;  %v2010_v39 = vsel %vm1651_vm11, %v1968_v62, 2147483647 }
 0x207   : > { %vm2031_vm15 = vcmp.eq.s32.totalorder %v3828_v41, %v1989_v32  ;;  %v2011_v40 = vrot.slane %v2010_v39, 4 }
 0x208   : > { %v2044_v4 = vmax.f32 %v2042_v1, %v2043_v48  ;;  %v4144_v44 = vsel %vm2031_vm15, -1e+30, %v4096_v17  ;;  %vm2005_vm0 = vcmp.lt.s32.totalorder %v2003_v31, %v2004_v34 }
 0x209   : > { %v2049_v11 = vsel %vm1651_vm11, %v4144_v44, -inf  ;;  %v2006_v52 = vsel %vm2005_vm0, %v2003_v31, %v2004_v34  ;;  %vm2012_vm2 = vcmp.lt.s32.totalorder %v2010_v39, %v2011_v40 }
 0x20a   : > { %v2045_v7 = vrot.slane %v2044_v4, 2  ;;  %v2050_v54 = vrot.slane %v2049_v11, 4  ;;  %v2007_v55 = vrot.slane %v2006_v52, 1  ;;  %v2013_v24 = vsel %vm2012_vm2, %v2010_v39, %v2011_v40 }
 0x20b   : > { %v2014_v42 = vrot.slane %v2013_v24, 2 }
 0x20c   : > { %v2046_v53 = vmax.f32 %v2044_v4, %v2045_v7  ;;  %v2051_v22 = vmax.f32 %v2049_v11, %v2050_v54  ;;  %vm2008_vm4 = vcmp.lt.s32.totalorder %v2006_v52, %v2007_v55 }
 0x20d   : > { %v2009_v58 = vsel %vm2008_vm4, %v2006_v52, %v2007_v55  ;;  %vm2015_vm3 = vcmp.lt.s32.totalorder %v2013_v24, %v2014_v42 }
 0x20e   : > { %v2047_v56 = vrot.slane %v2046_v53, 1  ;;  %v2052_v60 = vrot.slane %v2051_v22, 2  ;;  %vm2033_vm5 = vcmp.eq.s32.totalorder %v3828_v41, %v2009_v58  ;;  %v2016_v17 = vsel %vm2015_vm3, %v2013_v24, %v2014_v42 }
 0x20f   : > { %v4150_v61 = vsel %vm2033_vm5, -1e+30, %v4102_v46  ;;  %v2017_v29 = vrot.slane %v2016_v17, 1 }
 0x210   : > { %v2048_v23 = vmax.f32 %v2046_v53, %v2047_v56  ;;  %v2053_v12 = vmax.f32 %v2051_v22, %v2052_v60  ;;  %v2063_v51 = vsel %vm1651_vm11, %v4150_v61, -inf }
 0x211   : > { %v2064_v3 = vrot.slane %v2063_v51, 4  ;;  %vm2018_vm7 = vcmp.lt.s32.totalorder %v2016_v17, %v2017_v29 }
 0x212   : > { %v4153_v0 = vadd.f32 %v2048_v23, %v4105_v33  ;;  %vm2090_vm6 = vcmp.eq.f32.partialorder %v4132_v20, %v2048_v23  ;;  %v2054_v49 = vrot.slane %v2053_v12, 1  ;;  %v2019_v6 = vsel %vm2018_vm7, %v2016_v17, %v2017_v29 }
 0x213   : > { %v2096_v8 = vsel %vm2090_vm6, %v3828_v41, 9  ;;  %v2065_v9 = vmax.f32 %v2063_v51, %v2064_v3  ;;  %vm2034_vm1 = vcmp.eq.s32.totalorder %v3828_v41, %v2019_v6 }
 0x214   : > { %v2102_v36 = vsel %vm1651_vm11, %v2096_v8, 2147483647  ;;  %v2055_v33 = vmax.f32 %v2053_v12, %v2054_v49  ;;  %v4162_v10 = vsel %vm2034_vm1, -1e+30, %v4114_v50 }
 0x215   : > { %v2103_v46 = vrot.slane %v2102_v36, 4  ;;  %v2066_v5 = vrot.slane %v2065_v9, 2  ;;  %v2070_v30 = vsel %vm1651_vm11, %v4162_v10, -inf }
 0x216   : > { %v4167_v13 = vadd.f32 %v2055_v33, %v4119_v43  ;;  %vm2091_vm9 = vcmp.eq.f32.partialorder %v4144_v44, %v2055_v33  ;;  %v2071_v2 = vrot.slane %v2070_v30, 4 }
 0x217   : > { %vm2104_vm8 = vcmp.lt.s32.totalorder %v2102_v36, %v2103_v46  ;;  %v2097_v14 = vsel %vm2091_vm9, %v3828_v41, 9  ;;  %v2067_v18 = vmax.f32 %v2065_v9, %v2066_v5 }
 0x218   : > { %v2105_v47 = vsel %vm2104_vm8, %v2102_v36, %v2103_v46  ;;  %v2112_v19 = vsel %vm1651_vm11, %v2097_v14, 2147483647  ;;  %v2072_v50 = vmax.f32 %v2070_v30, %v2071_v2 }
 0x219   : > { %v2106_v15 = vrot.slane %v2105_v47, 2  ;;  %v2113_v21 = vrot.slane %v2112_v19, 4  ;;  %v2068_v27 = vrot.slane %v2067_v18, 1 }
 0x21a   : > { %v2073_v1 = vrot.slane %v2072_v50, 2 }
 0x21b   : > { %vm2107_vm10 = vcmp.lt.s32.totalorder %v2105_v47, %v2106_v15  ;;  %vm2114_vm12 = vcmp.lt.s32.totalorder %v2112_v19, %v2113_v21  ;;  %v2069_v48 = vmax.f32 %v2067_v18, %v2068_v27  ;;  %v4194_v18 = vstv %s2804_s12 }
 0x21c   : > { %v2108_v25 = vsel %vm2107_vm10, %v2105_v47, %v2106_v15  ;;  %v2115_v43 = vsel %vm2114_vm12, %v2112_v19, %v2113_v21  ;;  %v2074_v31 = vmax.f32 %v2072_v50, %v2073_v1  ;;  %v2806_v21 = vmul.f32 %v4194_v18, %v3975_v63 }
 0x21d   : > { %v2109_v26 = vrot.slane %v2108_v25, 1  ;;  %v2116_v62 = vrot.slane %v2115_v43, 2  ;;  %v4173_v4 = vadd.f32 %v2069_v48, %v4125_v59  ;;  %vm2093_vm14 = vcmp.eq.f32.partialorder %v4150_v61, %v2069_v48 }
 0x21e   : > { %v2099_v34 = vsel %vm2093_vm14, %v3828_v41, 9  ;;  %v2075_v39 = vrot.slane %v2074_v31, 1  ;;  %v4198_v1 = vstv %s3163_s13 }
 0x21f   : > { %vm2110_vm13 = vcmp.lt.s32.totalorder %v2108_v25, %v2109_v26  ;;  %vm2117_vm0 = vcmp.lt.s32.totalorder %v2115_v43, %v2116_v62  ;;  %v2132_v40 = vsel %vm1651_vm11, %v2099_v34, 2147483647 }
 0x220   : > { %v2111_v32 = vsel %vm2110_vm13, %v2108_v25, %v2109_v26  ;;  %v2118_v11 = vsel %vm2117_vm0, %v2115_v43, %v2116_v62  ;;  %v2133_v52 = vrot.slane %v2132_v40, 4  ;;  %v2076_v53 = vmax.f32 %v2074_v31, %v2075_v39 }
 0x221   : > { %vm2162_vm15 = vcmp.eq.s32.totalorder %v3828_v41, %v2111_v32  ;;  %v2119_v59 = vrot.slane %v2118_v11, 1 }
 0x222   : > { %v2168_v7 = vsel %vm2162_vm15, -1e+30, %v4132_v20  ;;  %vm2134_vm2 = vcmp.lt.s32.totalorder %v2132_v40, %v2133_v52  ;;  %v4182_v24 = vadd.f32 %v2076_v53, %v4137_v28  ;;  %vm2094_vm4 = vcmp.eq.f32.partialorder %v4162_v10, %v2076_v53 }
 0x223   : > { %v2174_v54 = vsel %vm1651_vm11, %v2168_v7, -inf  ;;  %vm2120_vm3 = vcmp.lt.s32.totalorder %v2118_v11, %v2119_v59  ;;  %v2135_v42 = vsel %vm2134_vm2, %v2132_v40, %v2133_v52  ;;  %v2100_v56 = vsel %vm2094_vm4, %v3828_v41, 9 }
 0x224   : > { %v2175_v55 = vrot.slane %v2174_v54, 4  ;;  %v2121_v58 = vsel %vm2120_vm3, %v2118_v11, %v2119_v59  ;;  %v2136_v20 = vrot.slane %v2135_v42, 2  ;;  %v2142_v23 = vsel %vm1651_vm11, %v2100_v56, 2147483647 }
 0x225   : > { %vm2163_vm5 = vcmp.eq.s32.totalorder %v3828_v41, %v2121_v58  ;;  %v2143_v60 = vrot.slane %v2142_v23, 4  ;;  %v2807_v40 = vmul.f32 %v4194_v18, %v4001_v16 }
 0x226   : > { %v2176_v22 = vmax.f32 %v2174_v54, %v2175_v55  ;;  %v2169_v29 = vsel %vm2163_vm5, -1e+30, %v4144_v44  ;;  %vm2137_vm6 = vcmp.lt.s32.totalorder %v2135_v42, %v2136_v20 }
 0x227   : > { %v2181_v28 = vsel %vm1651_vm11, %v2169_v29, -inf  ;;  %v2138_v12 = vsel %vm2137_vm6, %v2135_v42, %v2136_v20  ;;  %vm2144_vm7 = vcmp.lt.s32.totalorder %v2142_v23, %v2143_v60 }
 0x228   : > { %v2177_v17 = vrot.slane %v2176_v22, 2  ;;  %v2182_v8 = vrot.slane %v2181_v28, 4  ;;  %v2139_v3 = vrot.slane %v2138_v12, 1  ;;  %v2145_v36 = vsel %vm2144_vm7, %v2142_v23, %v2143_v60 }
 0x229   : > { %v2146_v49 = vrot.slane %v2145_v36, 2  ;;  %v2810_v60 = vmul.f32 %v4194_v18, %v4028_v57 }
 0x22a   : > { %v2178_v51 = vmax.f32 %v2176_v22, %v2177_v17  ;;  %v2183_v46 = vmax.f32 %v2181_v28, %v2182_v8  ;;  %vm2140_vm1 = vcmp.lt.s32.totalorder %v2138_v12, %v2139_v3 }
 0x22b   : > { %v2141_v9 = vsel %vm2140_vm1, %v2138_v12, %v2139_v3  ;;  %vm2147_vm8 = vcmp.lt.s32.totalorder %v2145_v36, %v2146_v49 }
 0x22c   : > { %v2179_v6 = vrot.slane %v2178_v51, 1  ;;  %v2184_v5 = vrot.slane %v2183_v46, 2  ;;  %vm2165_vm9 = vcmp.eq.s32.totalorder %v3828_v41, %v2141_v9  ;;  %v2148_v44 = vsel %vm2147_vm8, %v2145_v36, %v2146_v49 }
 0x22d   : > { %v2171_v30 = vsel %vm2165_vm9, -1e+30, %v4150_v61  ;;  %v2149_v47 = vrot.slane %v2148_v44, 1 }
 0x22e   : > { %v2180_v33 = vmax.f32 %v2178_v51, %v2179_v6  ;;  %v2185_v15 = vmax.f32 %v2183_v46, %v2184_v5  ;;  %v2195_v14 = vsel %vm1651_vm11, %v2171_v30, -inf }
 0x22f   : > { %v2196_v19 = vrot.slane %v2195_v14, 4  ;;  %vm2150_vm10 = vcmp.lt.s32.totalorder %v2148_v44, %v2149_v47 }
 0x230   : > { %v2216_v2 = vadd.f32 %v2180_v33, %v4153_v0  ;;  %v2186_v27 = vrot.slane %v2185_v15, 1  ;;  %v2151_v25 = vsel %vm2150_vm10, %v2148_v44, %v2149_v47 }
 0x231   : > { %v2197_v26 = vmax.f32 %v2195_v14, %v2196_v19  ;;  %vm2166_vm12 = vcmp.eq.s32.totalorder %v3828_v41, %v2151_v25 }
 0x232   : > { %v2222_v50 = vmul.f32 0.2, %v2216_v2  ;;  %v2187_v0 = vmax.f32 %v2185_v15, %v2186_v27  ;;  %v2172_v48 = vsel %vm2166_vm12, -1e+30, %v4162_v10 }
 0x233   : > { %v2198_v43 = vrot.slane %v2197_v26, 2  ;;  %v2202_v31 = vsel %vm1651_vm11, %v2172_v48, -inf }
 0x234   : > { %v2814_v61 = vmul.f32 %v4198_v1, %v2222_v50  ;;  %v2217_v32 = vadd.f32 %v2187_v0, %v4167_v13  ;;  %v2203_v63 = vrot.slane %v2202_v31, 4  ;;  %v2809_v13 = vmul.f32 %v4194_v18, %v4019_v37 }
 0x235   : > { %v2199_v34 = vmax.f32 %v2197_v26, %v2198_v43 }
 0x236   : > { %v4204_v62 = vadd.f32 %v2814_v61, %v2806_v21  ;;  %v2223_v39 = vmul.f32 0.2, %v2217_v32  ;;  %v2204_v7 = vmax.f32 %v2202_v31, %v2203_v63  ;;  %v4257_v31 = vstv %s3164_s14 }
 0x237   : > { %v2200_v11 = vrot.slane %v2199_v34, 1 }
 0x238   : > { %v2815_v52 = vmul.f32 %v4198_v1, %v2223_v39  ;;  %v2205_v53 = vrot.slane %v2204_v7, 2 }
 0x239   : > { %v2201_v54 = vmax.f32 %v2199_v34, %v2200_v11  ;;  %v4269_v34 = vstv %s4233_s15 }
 0x23a   : > { %v4210_v10 = vadd.f32 %v2815_v52, %v2807_v40  ;;  %v2206_v59 = vmax.f32 %v2204_v7, %v2205_v53 }
 0x23b   : > { %v2219_v55 = vadd.f32 %v2201_v54, %v4173_v4 }
 0x23c   : > { %v2207_v42 = vrot.slane %v2206_v59, 1 }
 0x23d   : > { %v2225_v56 = vmul.f32 0.2, %v2219_v55 }
 0x23e   : > { %v2208_v22 = vmax.f32 %v2206_v59, %v2207_v42 }
 0x23f   : > { %v2817_v58 = vmul.f32 %v4198_v1, %v2225_v56 }
 0x240   : > { %v2220_v16 = vadd.f32 %v2208_v22, %v4182_v24 }
 0x241   : > { %v4217_v20 = vadd.f32 %v2817_v58, %v2809_v13  ;;  %v415_v13 = vld [vmem:[%s4264_s21] sm:$0x7]  ;;  %v2855_v58 = vstv %s4242_s16 }
 0x242   : > { %v2226_v23 = vmul.f32 0.2, %v2220_v16 }
 0x244   : > { %v2818_v17 = vmul.f32 %v4198_v1, %v2226_v23 }
 0x246   : > { %v4222_v29 = vadd.f32 %v2818_v17, %v2810_v60 }
 0x289   : > { %v1330_v4 = vpop.f32.mrb[6].mxu1 }
 0x28a   : > { %v4225_v28 = vmul.f32 %v3934_v45, %v1330_v4  ;;  %v3337_v37 = vpop.f32.mrb[7].mxu1 }
 0x28c   : > { %v1666_v12 = vsel %vm1651_vm11, %v4225_v28, -inf }
 0x28d   : > { %v1667_v51 = vrot.slane %v1666_v12, 4  ;;  %v4229_v24 = vpop.f32.mrb[8].mxu1 }
 0x28e   : > { %v2228_v8 = vsel %vm1651_vm11, %v4229_v24, -inf  ;;  %v3353_v3 = vpop.f32.mrb[9].mxu1 }
 0x28f   : > { %v1668_v57 = vmax.f32 %v1666_v12, %v1667_v51  ;;  %v2229_v36 = vrot.slane %v2228_v8, 4 }
 0x290   : > { %v1422_v45 = vpop.f32.mrb[10].mxu0 }
 0x291   : > { %v1669_v49 = vrot.slane %v1668_v57, 2  ;;  %v2230_v6 = vmax.f32 %v2228_v8, %v2229_v36  ;;  %v4236_v46 = vmul.f32 %v3959_v35, %v1422_v45  ;;  %v3348_v9 = vpop.f32.mrb[11].mxu0  ;;  %v4238_v33 = vpop.f32.mrb[10].mxu1  ;;  %v4296_v36 = vmul.f32 %v2855_v58, %v415_v13 }
 0x292   : > { %v2235_v30 = vsel %vm1651_vm11, %v4238_v33, -inf  ;;  %v3356_v47 = vpop.f32.mrb[11].mxu1 }
 0x293   : > { %v1670_v5 = vmax.f32 %v1668_v57, %v1669_v49  ;;  %v2231_v44 = vrot.slane %v2230_v6, 2  ;;  %v1687_v2 = vsel %vm1651_vm11, %v4236_v46, -inf  ;;  %v2236_v15 = vrot.slane %v2235_v30, 4 }
 0x294   : > { %v1688_v35 = vrot.slane %v1687_v2, 4  ;;  %v4246_v50 = vpop.f32.mrb[12].mxu0  ;;  %v2877_v49 = vstv %s4255_s18 }
 0x295   : > { %v1671_v14 = vrot.slane %v1670_v5, 1  ;;  %v2232_v19 = vmax.f32 %v2230_v6, %v2231_v44  ;;  %v2237_v21 = vmax.f32 %v2235_v30, %v2236_v15  ;;  %v2249_v27 = vsel %vm1651_vm11, %v4246_v50, -inf  ;;  %v4250_v25 = vpop.f32.mrb[12].mxu1  ;;  %v3364_v26 = vpop.f32.mrb[13].mxu0 }
 0x296   : > { %v1689_v48 = vmax.f32 %v1687_v2, %v1688_v35  ;;  %v3359_v43 = vpop.f32.mrb[13].mxu1  ;;  %v2250_v39 = vrot.slane %v2249_v27, 4  ;;  %v2242_v53 = vsel %vm1651_vm11, %v4250_v25, -inf }
 0x297   : > { %v4252_v61 = vmax.f32 %v1670_v5, %v1671_v14  ;;  %v2233_v0 = vrot.slane %v2232_v19, 1  ;;  %v2238_v32 = vrot.slane %v2237_v21, 2  ;;  %v2243_v8 = vrot.slane %v2242_v53, 4 }
 0x298   : > { %v4271_v40 = vpop.f32.mrb[14].mxu0  ;;  %v1690_v11 = vrot.slane %v1689_v48, 2  ;;  %v2251_v4 = vmax.f32 %v2249_v27, %v2250_v39 }
 0x299   : > { %vm1696_vm13 = vcmp.eq.f32.partialorder %v4225_v28, %v4252_v61  ;;  %v4266_v63 = vmax.f32 %v2232_v19, %v2233_v0  ;;  %v2239_v52 = vmax.f32 %v2237_v21, %v2238_v32  ;;  %v3367_v54 = vpop.f32.mrb[15].mxu0  ;;  %v4279_v55 = vmul.f32 %v4194_v18, %v4252_v61 }
 0x29a   : > { %v1702_v7 = vsel %vm1696_vm13, %v3828_v41, 9  ;;  %v1691_v16 = vmax.f32 %v1689_v48, %v1690_v11  ;;  %v2252_v9 = vrot.slane %v2251_v4, 2  ;;  %v2256_v30 = vsel %vm1651_vm11, %v4271_v40, -inf }
 0x29b   : > { %v1726_v59 = vsel %vm1651_vm11, %v1702_v7, 2147483647  ;;  %vm2270_vm14 = vcmp.eq.f32.partialorder %v4229_v24, %v4266_v63  ;;  %v2828_v42 = vmul.f32 %v4257_v31, %v4266_v63  ;;  %v2240_v17 = vrot.slane %v2239_v52, 1 }
 0x29c   : > { %v1727_v56 = vrot.slane %v1726_v59, 4  ;;  %v2276_v22 = vsel %vm2270_vm14, %v3828_v41, 9  ;;  %v4292_v37 = vpop.f32.mrb[16].mxu0  ;;  %v1692_v51 = vrot.slane %v1691_v16, 1  ;;  %v2244_v2 = vmax.f32 %v2242_v53, %v2243_v8 }
 0x29d   : > { %v2282_v23 = vsel %vm1651_vm11, %v2276_v22, 2147483647  ;;  %v4290_v60 = vadd.f32 %v2828_v42, %v4204_v62  ;;  %v3370_v3 = vpop.f32.mrb[17].mxu0  ;;  %v4299_v6 = vmax.f32 %v2239_v52, %v2240_v17  ;;  %v2253_v32 = vmax.f32 %v2251_v4, %v2252_v9 }
 0x29e   : > { %vm1728_vm15 = vcmp.lt.s32.totalorder %v1726_v59, %v1727_v56  ;;  %v2283_v12 = vrot.slane %v2282_v23, 4  ;;  %v4301_v62 = vmax.f32 %v1691_v16, %v1692_v51  ;;  %v2245_v7 = vrot.slane %v2244_v2, 2 }
 0x29f   : > { %v1729_v57 = vsel %vm1728_vm15, %v1726_v59, %v1727_v56  ;;  %vm2271_vm2 = vcmp.eq.f32.partialorder %v4238_v33, %v4299_v6  ;;  %v2829_v44 = vmul.f32 %v4257_v31, %v4299_v6  ;;  %v2257_v11 = vrot.slane %v2256_v30, 4 }
 0x2a0   : > { %v1730_v45 = vrot.slane %v1729_v57, 2  ;;  %vm2284_vm0 = vcmp.lt.s32.totalorder %v2282_v23, %v2283_v12  ;;  %vm1699_vm3 = vcmp.eq.f32.partialorder %v4236_v46, %v4301_v62  ;;  %v2277_v19 = vsel %vm2271_vm2, %v3828_v41, 9 }
 0x2a1   : > { %v2285_v5 = vsel %vm2284_vm0, %v2282_v23, %v2283_v12  ;;  %v1705_v14 = vsel %vm1699_vm3, %v3828_v41, 9  ;;  %v4314_v35 = vadd.f32 %v2829_v44, %v4210_v10  ;;  %v2292_v26 = vsel %vm1651_vm11, %v2277_v19, 2147483647 }
 0x2a2   : > { %vm1731_vm4 = vcmp.lt.s32.totalorder %v1729_v57, %v1730_v45  ;;  %v2286_v47 = vrot.slane %v2285_v5, 2  ;;  %v1756_v27 = vsel %vm1651_vm11, %v1705_v14, 2147483647  ;;  %v2293_v43 = vrot.slane %v2292_v26, 4 }
 0x2a3   : > { %v1732_v15 = vsel %vm1731_vm4, %v1729_v57, %v1730_v45  ;;  %v1757_v48 = vrot.slane %v1756_v27, 4  ;;  %v2254_v53 = vrot.slane %v2253_v32, 1  ;;  %v2246_v23 = vmax.f32 %v2244_v2, %v2245_v7 }
 0x2a4   : > { %v1733_v21 = vrot.slane %v1732_v15, 1  ;;  %vm2287_vm5 = vcmp.lt.s32.totalorder %v2285_v5, %v2286_v47  ;;  %vm2294_vm1 = vcmp.lt.s32.totalorder %v2292_v26, %v2293_v43  ;;  %v4337_v44 = vmax.f32 %v2256_v30, %v2257_v11 }
 0x2a5   : > { %v2288_v0 = vsel %vm2287_vm5, %v2285_v5, %v2286_v47  ;;  %vm1758_vm7 = vcmp.lt.s32.totalorder %v1756_v27, %v1757_v48  ;;  %v2295_v54 = vsel %vm2294_vm1, %v2292_v26, %v2293_v43  ;;  %v4325_v16 = vmax.f32 %v2253_v32, %v2254_v53 }
 0x2a6   : > { %vm1734_vm6 = vcmp.lt.s32.totalorder %v1732_v15, %v1733_v21  ;;  %v2289_v39 = vrot.slane %v2288_v0, 1  ;;  %v1759_v10 = vsel %vm1758_vm7, %v1756_v27, %v1757_v48  ;;  %v2296_v13 = vrot.slane %v2295_v54, 2 }
 0x2a7   : > { %v1735_v52 = vsel %vm1734_vm6, %v1732_v15, %v1733_v21  ;;  %v1760_v56 = vrot.slane %v1759_v10, 2  ;;  %vm2273_vm14 = vcmp.eq.f32.partialorder %v4246_v50, %v4325_v16  ;;  %v2247_v5 = vrot.slane %v2246_v23, 1 }
 0x2a8   : > { %vm1768_vm8 = vcmp.eq.s32.totalorder %v3828_v41, %v1735_v52  ;;  %vm2290_vm9 = vcmp.lt.s32.totalorder %v2288_v0, %v2289_v39  ;;  %vm2297_vm13 = vcmp.lt.s32.totalorder %v2295_v54, %v2296_v13  ;;  %v2279_v9 = vsel %vm2273_vm14, %v3828_v41, 9 }
 0x2a9   : > { %v4320_v59 = vsel %vm1768_vm8, -1e+30, %v4225_v28  ;;  %v2291_v42 = vsel %vm2290_vm9, %v2288_v0, %v2289_v39  ;;  %vm1761_vm12 = vcmp.lt.s32.totalorder %v1759_v10, %v1760_v56  ;;  %v2298_v51 = vsel %vm2297_vm13, %v2295_v54, %v2296_v13 }
 0x2aa   : > { %v1792_v22 = vsel %vm1651_vm11, %v4320_v59, -inf  ;;  %vm2342_vm10 = vcmp.eq.s32.totalorder %v3828_v41, %v2291_v42  ;;  %v1762_v12 = vsel %vm1761_vm12, %v1759_v10, %v1760_v56  ;;  %v2299_v45 = vrot.slane %v2298_v51, 1 }
 0x2ab   : > { %v1793_v17 = vrot.slane %v1792_v22, 4  ;;  %v4328_v4 = vsel %vm2342_vm10, -1e+30, %v4229_v24  ;;  %v1763_v57 = vrot.slane %v1762_v12, 1  ;;  %v2831_v24 = vmul.f32 %v4257_v31, %v4325_v16 }
 0x2ac   : > { %v2354_v28 = vsel %vm1651_vm11, %v4328_v4, -inf  ;;  %vm2300_vm0 = vcmp.lt.s32.totalorder %v2298_v51, %v2299_v45  ;;  %v2312_v19 = vsel %vm1651_vm11, %v2279_v9, 2147483647  ;;  %v4351_v43 = vmax.f32 %v2246_v23, %v2247_v5 }
 0x2ad   : > { %v1794_v8 = vmax.f32 %v1792_v22, %v1793_v17  ;;  %v2355_v3 = vrot.slane %v2354_v28, 4  ;;  %vm1764_vm15 = vcmp.lt.s32.totalorder %v1762_v12, %v1763_v57  ;;  %v2301_v14 = vsel %vm2300_vm0, %v2298_v51, %v2299_v45 }
 0x2ae   : > { %v1765_v15 = vsel %vm1764_vm15, %v1762_v12, %v1763_v57  ;;  %v4341_v21 = vadd.f32 %v2831_v24, %v4217_v20  ;;  %vm2343_vm4 = vcmp.eq.s32.totalorder %v3828_v41, %v2301_v14  ;;  %v2313_v48 = vrot.slane %v2312_v19, 4  ;;  %v416_v12 = vld [vmem:[%s4264_s21 + $0x4] sm:$0x7] }
 0x2af   : > { %v1795_v47 = vrot.slane %v1794_v8, 2  ;;  %v2356_v2 = vmax.f32 %v2354_v28, %v2355_v3  ;;  %vm1771_vm2 = vcmp.eq.s32.totalorder %v3828_v41, %v1765_v15  ;;  %v4349_v0 = vsel %vm2343_vm4, -1e+30, %v4238_v33 }
 0x2b0   : > { %v4346_v30 = vsel %vm1771_vm2, -1e+30, %v4236_v46  ;;  %v2361_v7 = vsel %vm1651_vm11, %v4349_v0, -inf  ;;  %vm2314_vm3 = vcmp.lt.s32.totalorder %v2312_v19, %v2313_v48  ;;  %vm2272_vm5 = vcmp.eq.f32.partialorder %v4250_v25, %v4351_v43 }
 0x2b1   : > { %v1796_v27 = vmax.f32 %v1794_v8, %v1795_v47  ;;  %v2357_v26 = vrot.slane %v2356_v2, 2  ;;  %v1813_v20 = vsel %vm1651_vm11, %v4346_v30, -inf  ;;  %v2362_v52 = vrot.slane %v2361_v7, 4 }
 0x2b2   : > { %v1814_v11 = vrot.slane %v1813_v20, 4  ;;  %v2315_v53 = vsel %vm2314_vm3, %v2312_v19, %v2313_v48  ;;  %v2278_v10 = vsel %vm2272_vm5, %v3828_v41, 9  ;;  %v2259_v48 = vrot.slane %v4337_v44, 2 }
 0x2b3   : > { %v1797_v32 = vrot.slane %v1796_v27, 1  ;;  %v2358_v39 = vmax.f32 %v2356_v2, %v2357_v26  ;;  %v2363_v42 = vmax.f32 %v2361_v7, %v2362_v52  ;;  %v2316_v56 = vrot.slane %v2315_v53, 2 }
 0x2b4   : > { %v1815_v54 = vmax.f32 %v1813_v20, %v1814_v11  ;;  %v2302_v13 = vsel %vm1651_vm11, %v2278_v10, 2147483647  ;;  %v4376_v2 = vmul.f32 %v2877_v49, %v416_v12 }
 0x2b5   : > { %v1798_v46 = vmax.f32 %v1796_v27, %v1797_v32  ;;  %v2359_v33 = vrot.slane %v2358_v39, 1  ;;  %v2303_v17 = vrot.slane %v2302_v13, 4  ;;  %v2364_v8 = vrot.slane %v2363_v42, 2 }
 0x2b6   : > { %v1816_v51 = vrot.slane %v1815_v54, 2  ;;  %vm2317_vm7 = vcmp.lt.s32.totalorder %v2315_v53, %v2316_v56 }
 0x2b7   : > { %v4362_v22 = vadd.f32 %v1798_v46, %v4252_v61  ;;  %vm1828_vm6 = vcmp.eq.f32.partialorder %v4320_v59, %v1798_v46  ;;  %v2360_v23 = vmax.f32 %v2358_v39, %v2359_v33  ;;  %v2318_v61 = vsel %vm2317_vm7, %v2315_v53, %v2316_v56 }
 0x2b8   : > { %v1834_v28 = vsel %vm1828_vm6, %v3828_v41, 9  ;;  %v1817_v24 = vmax.f32 %v1815_v54, %v1816_v51  ;;  %v2365_v5 = vmax.f32 %v2363_v42, %v2364_v8  ;;  %v2319_v15 = vrot.slane %v2318_v61, 1 }
 0x2b9   : > { %v1858_v3 = vsel %vm1651_vm11, %v1834_v28, 2147483647  ;;  %v4369_v57 = vadd.f32 %v2360_v23, %v4266_v63  ;;  %vm2402_vm1 = vcmp.eq.f32.partialorder %v4328_v4, %v2360_v23  ;;  %vm2304_vm8 = vcmp.lt.s32.totalorder %v2302_v13, %v2303_v17  ;;  %v417_v23 = vld [vmem:[%s4264_s21 + $0x8] sm:$0x7] }
 0x2ba   : > { %v1859_v45 = vrot.slane %v1858_v3, 4  ;;  %v2408_v9 = vsel %vm2402_vm1, %v3828_v41, 9  ;;  %v1818_v19 = vrot.slane %v1817_v24, 1  ;;  %v2366_v63 = vrot.slane %v2365_v5, 1 }
 0x2bb   : > { %v2414_v47 = vsel %vm1651_vm11, %v2408_v9, 2147483647  ;;  %vm2320_vm10 = vcmp.lt.s32.totalorder %v2318_v61, %v2319_v15  ;;  %v4378_v26 = vsel %vm2304_vm8, %v2302_v13, %v2303_v17  ;;  %v4383_v46 = vmax.f32 %v4337_v44, %v2259_v48 }
 0x2bc   : > { %vm1860_vm9 = vcmp.lt.s32.totalorder %v1858_v3, %v1859_v45  ;;  %v2415_v14 = vrot.slane %v2414_v47, 4  ;;  %v1819_v39 = vmax.f32 %v1817_v24, %v1818_v19  ;;  %v2367_v20 = vmax.f32 %v2365_v5, %v2366_v63  ;;  %v418_v24 = vld [vmem:[%s4264_s21 + $0xc] sm:$0x7] }
 0x2bd   : > { %v1861_v27 = vsel %vm1860_vm9, %v1858_v3, %v1859_v45  ;;  %v2321_v11 = vsel %vm2320_vm10, %v2318_v61, %v2319_v15  ;;  %v2306_v52 = vrot.slane %v4378_v26, 2  ;;  %v4406_v45 = vmul.f32 %v2855_v58, %v417_v23 }
 0x2be   : > { %v1862_v32 = vrot.slane %v1861_v27, 2  ;;  %vm2416_vm12 = vcmp.lt.s32.totalorder %v2414_v47, %v2415_v14  ;;  %v4386_v53 = vadd.f32 %v1819_v39, %v4301_v62  ;;  %vm1831_vm14 = vcmp.eq.f32.partialorder %v4346_v30, %v1819_v39 }
 0x2bf   : > { %v2417_v7 = vsel %vm2416_vm12, %v2414_v47, %v2415_v14  ;;  %v1837_v54 = vsel %vm1831_vm14, %v3828_v41, 9  ;;  %v4391_v42 = vadd.f32 %v2367_v20, %v4299_v6  ;;  %vm2403_vm15 = vcmp.eq.f32.partialorder %v4349_v0, %v2367_v20 }
 0x2c0   : > { %vm1863_vm13 = vcmp.lt.s32.totalorder %v1861_v27, %v1862_v32  ;;  %v2418_v33 = vrot.slane %v2417_v7, 2  ;;  %v1888_v44 = vsel %vm1651_vm11, %v1837_v54, 2147483647  ;;  %v2409_v13 = vsel %vm2403_vm15, %v3828_v41, 9 }
 0x2c1   : > { %v1864_v10 = vsel %vm1863_vm13, %v1861_v27, %v1862_v32  ;;  %v1889_v28 = vrot.slane %v1888_v44, 4  ;;  %v2424_v12 = vsel %vm1651_vm11, %v2409_v13, 2147483647  ;;  %vm2345_vm2 = vcmp.eq.s32.totalorder %v3828_v41, %v2321_v11 }
 0x2c2   : > { %v1865_v56 = vrot.slane %v1864_v10, 1  ;;  %vm2419_vm0 = vcmp.lt.s32.totalorder %v2417_v7, %v2418_v33  ;;  %v2425_v51 = vrot.slane %v2424_v12, 4  ;;  %v4400_v8 = vsel %vm2345_vm2, -1e+30, %v4246_v50 }
 0x2c3   : > { %v2420_v17 = vsel %vm2419_vm0, %v2417_v7, %v2418_v33  ;;  %vm1890_vm3 = vcmp.lt.s32.totalorder %v1888_v44, %v1889_v28  ;;  %v2375_v61 = vsel %vm1651_vm11, %v4400_v8, -inf  ;;  %v4421_v48 = vmul.f32 %v2877_v49, %v418_v24 }
 0x2c4   : > { %vm1866_vm4 = vcmp.lt.s32.totalorder %v1864_v10, %v1865_v56  ;;  %v2421_v6 = vrot.slane %v2420_v17, 1  ;;  %v1891_v9 = vsel %vm1890_vm3, %v1888_v44, %v1889_v28  ;;  %vm2426_vm7 = vcmp.lt.s32.totalorder %v2424_v12, %v2425_v51 }
 0x2c5   : > { %v1867_v3 = vsel %vm1866_vm4, %v1864_v10, %v1865_v56  ;;  %v1892_v47 = vrot.slane %v1891_v9, 2  ;;  %v2427_v15 = vsel %vm2426_vm7, %v2424_v12, %v2425_v51  ;;  %v2376_v19 = vrot.slane %v2375_v61, 4 }
 0x2c6   : > { %vm1900_vm5 = vcmp.eq.s32.totalorder %v3828_v41, %v1867_v3  ;;  %vm2422_vm6 = vcmp.lt.s32.totalorder %v2420_v17, %v2421_v6  ;;  %v2428_v58 = vrot.slane %v2427_v15, 2  ;;  %vm2307_vm10 = vcmp.lt.s32.totalorder %v4378_v26, %v2306_v52 }
 0x2c7   : > { %v4411_v5 = vsel %vm1900_vm5, -1e+30, %v4320_v59  ;;  %v2423_v50 = vsel %vm2422_vm6, %v2420_v17, %v2421_v6  ;;  %vm1893_vm8 = vcmp.lt.s32.totalorder %v1891_v9, %v1892_v47  ;;  %v2377_v39 = vmax.f32 %v2375_v61, %v2376_v19 }
 0x2c8   : > { %v1924_v14 = vsel %vm1651_vm11, %v4411_v5, -inf  ;;  %vm2474_vm1 = vcmp.eq.s32.totalorder %v3828_v41, %v2423_v50  ;;  %v1894_v32 = vsel %vm1893_vm8, %v1891_v9, %v1892_v47  ;;  %vm2429_vm9 = vcmp.lt.s32.totalorder %v2427_v15, %v2428_v58 }
 0x2c9   : > { %v1925_v63 = vrot.slane %v1924_v14, 4  ;;  %v4417_v27 = vsel %vm2474_vm1, -1e+30, %v4328_v4  ;;  %v1895_v11 = vrot.slane %v1894_v32, 1  ;;  %v2430_v33 = vsel %vm2429_vm9, %v2427_v15, %v2428_v58 }
 0x2ca   : > { %v2486_v59 = vsel %vm1651_vm11, %v4417_v27, -inf  ;;  %v2431_v10 = vrot.slane %v2430_v33, 1  ;;  %v2378_v54 = vrot.slane %v2377_v39, 2  ;;  %v2261_v4 = vrot.slane %v4383_v46, 1 }
 0x2cb   : > { %v1926_v20 = vmax.f32 %v1924_v14, %v1925_v63  ;;  %v2487_v7 = vrot.slane %v2486_v59, 4  ;;  %vm1896_vm12 = vcmp.lt.s32.totalorder %v1894_v32, %v1895_v11  ;;  %v2308_v49 = vsel %vm2307_vm10, %v4378_v26, %v2306_v52 }
 0x2cc   : > { %v1897_v13 = vsel %vm1896_vm12, %v1894_v32, %v1895_v11  ;;  %vm2432_vm13 = vcmp.lt.s32.totalorder %v2430_v33, %v2431_v10  ;;  %v2379_v23 = vmax.f32 %v2377_v39, %v2378_v54  ;;  %v2309_v17 = vrot.slane %v2308_v49, 1 }
 0x2cd   : > { %v1927_v56 = vrot.slane %v1926_v20, 2  ;;  %v2488_v44 = vmax.f32 %v2486_v59, %v2487_v7  ;;  %vm1903_vm14 = vcmp.eq.s32.totalorder %v3828_v41, %v1897_v13  ;;  %v2433_v6 = vsel %vm2432_vm13, %v2430_v33, %v2431_v10 }
 0x2ce   : > { %v4430_v51 = vsel %vm1903_vm14, -1e+30, %v4346_v30  ;;  %vm2475_vm15 = vcmp.eq.s32.totalorder %v3828_v41, %v2433_v6  ;;  %v2380_v3 = vrot.slane %v2379_v23, 1  ;;  %vm2310_vm0 = vcmp.lt.s32.totalorder %v2308_v49, %v2309_v17 }
 0x2cf   : > { %v1928_v28 = vmax.f32 %v1926_v20, %v1927_v56  ;;  %v2489_v12 = vrot.slane %v2488_v44, 2  ;;  %v1945_v26 = vsel %vm1651_vm11, %v4430_v51, -inf  ;;  %v4436_v52 = vsel %vm2475_vm15, -1e+30, %v4349_v0 }
 0x2d0   : > { %v1946_v24 = vrot.slane %v1945_v26, 4  ;;  %v2493_v50 = vsel %vm1651_vm11, %v4436_v52, -inf  ;;  %v2381_v47 = vmax.f32 %v2379_v23, %v2380_v3  ;;  %v2311_v15 = vsel %vm2310_vm0, %v2308_v49, %v2309_v17 }
 0x2d1   : > { %v1929_v61 = vrot.slane %v1928_v28, 1  ;;  %v2490_v9 = vmax.f32 %v2488_v44, %v2489_v12  ;;  %v2494_v58 = vrot.slane %v2493_v50, 4  ;;  %vm2344_vm2 = vcmp.eq.s32.totalorder %v3828_v41, %v2311_v15 }
 0x2d2   : > { %v1947_v19 = vmax.f32 %v1945_v26, %v1946_v24  ;;  %v4442_v63 = vadd.f32 %v2381_v47, %v4325_v16  ;;  %vm2405_vm4 = vcmp.eq.f32.partialorder %v4400_v8, %v2381_v47  ;;  %v4446_v0 = vsel %vm2344_vm2, -1e+30, %v4250_v25 }
 0x2d3   : > { %v1930_v30 = vmax.f32 %v1928_v28, %v1929_v61  ;;  %v2491_v14 = vrot.slane %v2490_v9, 1  ;;  %v2495_v39 = vmax.f32 %v2493_v50, %v2494_v58  ;;  %v2411_v11 = vsel %vm2405_vm4, %v3828_v41, 9 }
 0x2d4   : > { %v1948_v7 = vrot.slane %v1947_v19, 2  ;;  %v2368_v16 = vsel %vm1651_vm11, %v4446_v0, -inf  ;;  %v2444_v44 = vsel %vm1651_vm11, %v2411_v11, 2147483647 }
 0x2d5   : > { %v4449_v59 = vadd.f32 %v1930_v30, %v4362_v22  ;;  %vm1960_vm3 = vcmp.eq.f32.partialorder %v4411_v5, %v1930_v30  ;;  %v2492_v32 = vmax.f32 %v2490_v9, %v2491_v14  ;;  %v2496_v22 = vrot.slane %v2495_v39, 2 }
 0x2d6   : > { %v1966_v20 = vsel %vm1960_vm3, %v3828_v41, 9  ;;  %v1949_v56 = vmax.f32 %v1947_v19, %v1948_v7  ;;  %v2445_v23 = vrot.slane %v2444_v44, 4  ;;  %v2369_v17 = vrot.slane %v2368_v16, 4 }
 0x2d7   : > { %v1990_v33 = vsel %vm1651_vm11, %v1966_v20, 2147483647  ;;  %v4458_v25 = vadd.f32 %v2492_v32, %v4369_v57  ;;  %vm2534_vm5 = vcmp.eq.f32.partialorder %v4417_v27, %v2492_v32  ;;  %v2497_v13 = vmax.f32 %v2495_v39, %v2496_v22 }
 0x2d8   : > { %v1991_v10 = vrot.slane %v1990_v33, 4  ;;  %v2540_v54 = vsel %vm2534_vm5, %v3828_v41, 9  ;;  %v1950_v12 = vrot.slane %v1949_v56, 1  ;;  %v4465_v57 = vmax.f32 %v4383_v46, %v2261_v4 }
 0x2d9   : > { %v2546_v49 = vsel %vm1651_vm11, %v2540_v54, 2147483647  ;;  %v2498_v3 = vrot.slane %v2497_v13, 1  ;;  %vm2446_vm7 = vcmp.lt.s32.totalorder %v2444_v44, %v2445_v23  ;;  %v2370_v61 = vmax.f32 %v2368_v16, %v2369_v17 }
 0x2da   : > { %vm1992_vm6 = vcmp.lt.s32.totalorder %v1990_v33, %v1991_v10  ;;  %v2547_v28 = vrot.slane %v2546_v49, 4  ;;  %v1951_v26 = vmax.f32 %v1949_v56, %v1950_v12  ;;  %v2447_v24 = vsel %vm2446_vm7, %v2444_v44, %v2445_v23 }
 0x2db   : > { %v1993_v6 = vsel %vm1992_vm6, %v1990_v33, %v1991_v10  ;;  %v2499_v47 = vmax.f32 %v2497_v13, %v2498_v3  ;;  %v2448_v15 = vrot.slane %v2447_v24, 2  ;;  %v2371_v30 = vrot.slane %v2370_v61, 2 }
 0x2dc   : > { %v1994_v9 = vrot.slane %v1993_v6, 2  ;;  %vm2548_vm1 = vcmp.lt.s32.totalorder %v2546_v49, %v2547_v28  ;;  %v4468_v58 = vadd.f32 %v1951_v26, %v4386_v53  ;;  %vm1963_vm9 = vcmp.eq.f32.partialorder %v4430_v51, %v1951_v26 }
 0x2dd   : > { %v2549_v50 = vsel %vm2548_vm1, %v2546_v49, %v2547_v28  ;;  %v1969_v4 = vsel %vm1963_vm9, %v3828_v41, 9  ;;  %v4473_v19 = vadd.f32 %v2499_v47, %v4391_v42  ;;  %vm2535_vm10 = vcmp.eq.f32.partialorder %v4436_v52, %v2499_v47 }
 0x2de   : > { %vm1995_vm8 = vcmp.lt.s32.totalorder %v1993_v6, %v1994_v9  ;;  %v2550_v14 = vrot.slane %v2549_v50, 2  ;;  %v2020_v39 = vsel %vm1651_vm11, %v1969_v4, 2147483647  ;;  %v2541_v20 = vsel %vm2535_vm10, %v3828_v41, 9 }
 0x2df   : > { %v1996_v46 = vsel %vm1995_vm8, %v1993_v6, %v1994_v9  ;;  %v2021_v11 = vrot.slane %v2020_v39, 4  ;;  %v2556_v53 = vsel %vm1651_vm11, %v2541_v20, 2147483647  ;;  %vm2449_vm13 = vcmp.lt.s32.totalorder %v2447_v24, %v2448_v15 }
 0x2e0   : > { %v1997_v32 = vrot.slane %v1996_v46, 1  ;;  %vm2551_vm12 = vcmp.lt.s32.totalorder %v2549_v50, %v2550_v14  ;;  %v2557_v33 = vrot.slane %v2556_v53, 4  ;;  %v2450_v22 = vsel %vm2449_vm13, %v2447_v24, %v2448_v15 }
 0x2e1   : > { %v2552_v7 = vsel %vm2551_vm12, %v2549_v50, %v2550_v14  ;;  %vm2022_vm15 = vcmp.lt.s32.totalorder %v2020_v39, %v2021_v11  ;;  %v2451_v42 = vrot.slane %v2450_v22, 1  ;;  %v2372_v54 = vmax.f32 %v2370_v61, %v2371_v30 }
 0x2e2   : > { %vm1998_vm14 = vcmp.lt.s32.totalorder %v1996_v46, %v1997_v32  ;;  %v2553_v16 = vrot.slane %v2552_v7, 1  ;;  %v2023_v56 = vsel %vm2022_vm15, %v2020_v39, %v2021_v11  ;;  %vm2558_vm4 = vcmp.lt.s32.totalorder %v2556_v53, %v2557_v33 }
 0x2e3   : > { %v1999_v10 = vsel %vm1998_vm14, %v1996_v46, %v1997_v32  ;;  %v2024_v13 = vrot.slane %v2023_v56, 2  ;;  %v2559_v23 = vsel %vm2558_vm4, %v2556_v53, %v2557_v33  ;;  %vm2452_vm5 = vcmp.lt.s32.totalorder %v2450_v22, %v2451_v42 }
 0x2e4   : > { %vm2032_vm0 = vcmp.eq.s32.totalorder %v3828_v41, %v1999_v10  ;;  %vm2554_vm2 = vcmp.lt.s32.totalorder %v2552_v7, %v2553_v16  ;;  %v2560_v28 = vrot.slane %v2559_v23, 2  ;;  %v2453_v3 = vsel %vm2452_vm5, %v2450_v22, %v2451_v42 }
 0x2e5   : > { %v4481_v44 = vsel %vm2032_vm0, -1e+30, %v4411_v5  ;;  %v2555_v49 = vsel %vm2554_vm2, %v2552_v7, %v2553_v16  ;;  %vm2025_vm6 = vcmp.lt.s32.totalorder %v2023_v56, %v2024_v13  ;;  %vm2477_vm1 = vcmp.eq.s32.totalorder %v3828_v41, %v2453_v3 }
 0x2e6   : > { %v2056_v17 = vsel %vm1651_vm11, %v4481_v44, -inf  ;;  %vm2606_vm3 = vcmp.eq.s32.totalorder %v3828_v41, %v2555_v49  ;;  %v2026_v61 = vsel %vm2025_vm6, %v2023_v56, %v2024_v13  ;;  %vm2561_vm7 = vcmp.lt.s32.totalorder %v2559_v23, %v2560_v28 }
 0x2e7   : > { %v2057_v12 = vrot.slane %v2056_v17, 4  ;;  %v4487_v6 = vsel %vm2606_vm3, -1e+30, %v4417_v27  ;;  %v2027_v24 = vrot.slane %v2026_v61, 1  ;;  %v2562_v50 = vsel %vm2561_vm7, %v2559_v23, %v2560_v28 }
 0x2e8   : > { %v2618_v5 = vsel %vm1651_vm11, %v4487_v6, -inf  ;;  %v2563_v47 = vrot.slane %v2562_v50, 1  ;;  %v4493_v15 = vsel %vm2477_vm1, -1e+30, %v4400_v8  ;;  %v2373_v30 = vrot.slane %v2372_v54, 1 }
 0x2e9   : > { %v2058_v9 = vmax.f32 %v2056_v17, %v2057_v12  ;;  %v2619_v26 = vrot.slane %v2618_v5, 4  ;;  %vm2274_vm8 = vcmp.eq.f32.partialorder %v4271_v40, %v4465_v57  ;;  %vm2028_vm9 = vcmp.lt.s32.totalorder %v2026_v61, %v2027_v24 }
 0x2ea   : > { %v2507_v46 = vsel %vm1651_vm11, %v4493_v15, -inf  ;;  %v2029_v4 = vsel %vm2028_vm9, %v2026_v61, %v2027_v24  ;;  %vm2564_vm10 = vcmp.lt.s32.totalorder %v2562_v50, %v2563_v47  ;;  %v2374_v39 = vmax.f32 %v2372_v54, %v2373_v30 }
 0x2eb   : > { %v2059_v27 = vrot.slane %v2058_v9, 2  ;;  %v2620_v14 = vmax.f32 %v2618_v5, %v2619_v26  ;;  %v2508_v32 = vrot.slane %v2507_v46, 4  ;;  %vm2035_vm12 = vcmp.eq.s32.totalorder %v3828_v41, %v2029_v4 }
 0x2ec   : > { %v2565_v8 = vsel %vm2564_vm10, %v2562_v50, %v2563_v47  ;;  %v4501_v11 = vsel %vm2035_vm12, -1e+30, %v4430_v51  ;;  %v4505_v16 = vadd.f32 %v2374_v39, %v4351_v43  ;;  %vm2404_vm14 = vcmp.eq.f32.partialorder %v4446_v0, %v2374_v39 }
 0x2ed   : > { %v2060_v20 = vmax.f32 %v2058_v9, %v2059_v27  ;;  %v2621_v7 = vrot.slane %v2620_v14, 2  ;;  %vm2607_vm13 = vcmp.eq.s32.totalorder %v3828_v41, %v2565_v8  ;;  %v2509_v53 = vmax.f32 %v2507_v46, %v2508_v32 }
 0x2ee   : > { %v2077_v10 = vsel %vm1651_vm11, %v4501_v11, -inf  ;;  %v4510_v42 = vsel %vm2607_vm13, -1e+30, %v4436_v52  ;;  %v2410_v17 = vsel %vm2404_vm14, %v3828_v41, 9  ;;  %v2280_v52 = vsel %vm2274_vm8, %v3828_v41, 9 }
 0x2ef   : > { %v2061_v33 = vrot.slane %v2060_v20, 1  ;;  %v2622_v22 = vmax.f32 %v2620_v14, %v2621_v7  ;;  %v2078_v54 = vrot.slane %v2077_v10, 4  ;;  %v2625_v56 = vsel %vm1651_vm11, %v4510_v42, -inf }
 0x2f0   : > { %v2510_v51 = vrot.slane %v2509_v53, 2  ;;  %v2626_v23 = vrot.slane %v2625_v56, 4  ;;  %v2434_v3 = vsel %vm1651_vm11, %v2410_v17, 2147483647  ;;  %v4534_v7 = vsel %vm1651_vm11, %v2280_v52, 2147483647 }
 0x2f1   : > { %v2062_v49 = vmax.f32 %v2060_v20, %v2061_v33  ;;  %v2623_v13 = vrot.slane %v2622_v22, 1  ;;  %v2079_v28 = vmax.f32 %v2077_v10, %v2078_v54  ;;  %v2435_v47 = vrot.slane %v2434_v3, 4 }
 0x2f2   : > { %v2511_v12 = vmax.f32 %v2509_v53, %v2510_v51  ;;  %v2627_v9 = vmax.f32 %v2625_v56, %v2626_v23 }
 0x2f3   : > { %v4522_v5 = vadd.f32 %v2062_v49, %v4449_v59  ;;  %vm2092_vm15 = vcmp.eq.f32.partialorder %v4481_v44, %v2062_v49  ;;  %v2624_v61 = vmax.f32 %v2622_v22, %v2623_v13  ;;  %v2080_v24 = vrot.slane %v2079_v28, 2 }
 0x2f4   : > { %v2098_v26 = vsel %vm2092_vm15, %v3828_v41, 9  ;;  %v2512_v50 = vrot.slane %v2511_v12, 1  ;;  %v2628_v14 = vrot.slane %v2627_v9, 2  ;;  %vm2436_vm2 = vcmp.lt.s32.totalorder %v2434_v3, %v2435_v47 }
 0x2f5   : > { %v2122_v30 = vsel %vm1651_vm11, %v2098_v26, 2147483647  ;;  %v4528_v27 = vadd.f32 %v2624_v61, %v4458_v25  ;;  %vm2666_vm0 = vcmp.eq.f32.partialorder %v4487_v6, %v2624_v61  ;;  %v2081_v4 = vmax.f32 %v2079_v28, %v2080_v24 }
 0x2f6   : > { %v2123_v46 = vrot.slane %v2122_v30, 4  ;;  %v2672_v59 = vsel %vm2666_vm0, %v3828_v41, 9  ;;  %v2513_v32 = vmax.f32 %v2511_v12, %v2512_v50  ;;  %v2629_v20 = vmax.f32 %v2627_v9, %v2628_v14 }
 0x2f7   : > { %v2678_v39 = vsel %vm1651_vm11, %v2672_v59, 2147483647  ;;  %v2082_v53 = vrot.slane %v2081_v4, 1  ;;  %v2437_v10 = vsel %vm2436_vm2, %v2434_v3, %v2435_v47 }
 0x2f8   : > { %vm2124_vm4 = vcmp.lt.s32.totalorder %v2122_v30, %v2123_v46  ;;  %v2679_v8 = vrot.slane %v2678_v39, 4  ;;  %v4537_v25 = vadd.f32 %v2513_v32, %v4442_v63  ;;  %v2630_v22 = vrot.slane %v2629_v20, 1 }
 0x2f9   : > { %v2125_v33 = vsel %vm2124_vm4, %v2122_v30, %v2123_v46  ;;  %vm2537_vm3 = vcmp.eq.f32.partialorder %v4493_v15, %v2513_v32  ;;  %v2083_v56 = vmax.f32 %v2081_v4, %v2082_v53  ;;  %v2438_v17 = vrot.slane %v2437_v10, 2 }
 0x2fa   : > { %v2126_v54 = vrot.slane %v2125_v33, 2  ;;  %vm2680_vm5 = vcmp.lt.s32.totalorder %v2678_v39, %v2679_v8  ;;  %v2543_v51 = vsel %vm2537_vm3, %v3828_v41, 9  ;;  %v2631_v13 = vmax.f32 %v2629_v20, %v2630_v22 }
 0x2fb   : > { %v2681_v49 = vsel %vm2680_vm5, %v2678_v39, %v2679_v8  ;;  %v2576_v23 = vsel %vm1651_vm11, %v2543_v51, 2147483647  ;;  %v4543_v63 = vadd.f32 %v2083_v56, %v4468_v58  ;;  %vm2095_vm7 = vcmp.eq.f32.partialorder %v4501_v11, %v2083_v56 }
 0x2fc   : > { %vm2127_vm6 = vcmp.lt.s32.totalorder %v2125_v33, %v2126_v54  ;;  %v2682_v28 = vrot.slane %v2681_v49, 2  ;;  %v2101_v3 = vsel %vm2095_vm7, %v3828_v41, 9  ;;  %v4548_v52 = vadd.f32 %v2631_v13, %v4473_v19 }
 0x2fd   : > { %v2128_v12 = vsel %vm2127_vm6, %v2125_v33, %v2126_v54  ;;  %vm2667_vm1 = vcmp.eq.f32.partialorder %v4510_v42, %v2631_v13  ;;  %v2152_v9 = vsel %vm1651_vm11, %v2101_v3, 2147483647  ;;  %v2577_v47 = vrot.slane %v2576_v23, 4 }
 0x2fe   : > { %v2129_v61 = vrot.slane %v2128_v12, 1  ;;  %vm2683_vm8 = vcmp.lt.s32.totalorder %v2681_v49, %v2682_v28  ;;  %v2673_v26 = vsel %vm2667_vm1, %v3828_v41, 9  ;;  %v2153_v50 = vrot.slane %v2152_v9, 4 }
 0x2ff   : > { %v2684_v24 = vsel %vm2683_vm8, %v2681_v49, %v2682_v28  ;;  %v2688_v58 = vsel %vm1651_vm11, %v2673_v26, 2147483647  ;;  %vm2439_vm10 = vcmp.lt.s32.totalorder %v2437_v10, %v2438_v17  ;;  %vm2578_vm13 = vcmp.lt.s32.totalorder %v2576_v23, %v2577_v47 }
 0x300   : > { %vm2130_vm9 = vcmp.lt.s32.totalorder %v2128_v12, %v2129_v61  ;;  %v2685_v30 = vrot.slane %v2684_v24, 1  ;;  %v2689_v14 = vrot.slane %v2688_v58, 4  ;;  %vm2154_vm12 = vcmp.lt.s32.totalorder %v2152_v9, %v2153_v50 }
 0x301   : > { %v2131_v46 = vsel %vm2130_vm9, %v2128_v12, %v2129_v61  ;;  %v2440_v19 = vsel %vm2439_vm10, %v2437_v10, %v2438_v17  ;;  %v2155_v59 = vsel %vm2154_vm12, %v2152_v9, %v2153_v50  ;;  %v2579_v33 = vsel %vm2578_vm13, %v2576_v23, %v2577_v47 }
 0x302   : > { %vm2164_vm14 = vcmp.eq.s32.totalorder %v3828_v41, %v2131_v46  ;;  %vm2686_vm15 = vcmp.lt.s32.totalorder %v2684_v24, %v2685_v30  ;;  %vm2690_vm0 = vcmp.lt.s32.totalorder %v2688_v58, %v2689_v14  ;;  %v2156_v39 = vrot.slane %v2155_v59, 2 }
 0x303   : > { %v2170_v4 = vsel %vm2164_vm14, -1e+30, %v4481_v44  ;;  %v2687_v32 = vsel %vm2686_vm15, %v2684_v24, %v2685_v30  ;;  %v2691_v20 = vsel %vm2690_vm0, %v2688_v58, %v2689_v14  ;;  %v2580_v10 = vrot.slane %v2579_v33, 2 }
 0x304   : > { %v2188_v8 = vsel %vm1651_vm11, %v2170_v4, -inf  ;;  %vm2738_vm2 = vcmp.eq.s32.totalorder %v3828_v41, %v2687_v32  ;;  %v2692_v53 = vrot.slane %v2691_v20, 2  ;;  %vm2157_vm4 = vcmp.lt.s32.totalorder %v2155_v59, %v2156_v39 }
 0x305   : > { %v2189_v22 = vrot.slane %v2188_v8, 4  ;;  %v2744_v54 = vsel %vm2738_vm2, -1e+30, %v4487_v6  ;;  %v2158_v51 = vsel %vm2157_vm4, %v2155_v59, %v2156_v39  ;;  %v2441_v49 = vrot.slane %v2440_v19, 1 }
 0x306   : > { %v2750_v56 = vsel %vm1651_vm11, %v2744_v54, -inf  ;;  %vm2693_vm3 = vcmp.lt.s32.totalorder %v2691_v20, %v2692_v53  ;;  %v2159_v17 = vrot.slane %v2158_v51, 1  ;;  %vm2581_vm5 = vcmp.lt.s32.totalorder %v2579_v33, %v2580_v10 }
 0x307   : > { %v2190_v44 = vmax.f32 %v2188_v8, %v2189_v22  ;;  %v2751_v13 = vrot.slane %v2750_v56, 4  ;;  %v2694_v28 = vsel %vm2693_vm3, %v2691_v20, %v2692_v53  ;;  %vm2442_vm6 = vcmp.lt.s32.totalorder %v2440_v19, %v2441_v49 }
 0x308   : > { %v2695_v12 = vrot.slane %v2694_v28, 1  ;;  %v2323_v3 = vrot.slane %v4534_v7, 4  ;;  %vm2160_vm7 = vcmp.lt.s32.totalorder %v2158_v51, %v2159_v17  ;;  %v2582_v6 = vsel %vm2581_vm5, %v2579_v33, %v2580_v10 }
 0x309   : > { %v2191_v23 = vrot.slane %v2190_v44, 2  ;;  %v2752_v61 = vmax.f32 %v2750_v56, %v2751_v13  ;;  %v2161_v9 = vsel %vm2160_vm7, %v2158_v51, %v2159_v17  ;;  %v2583_v26 = vrot.slane %v2582_v6, 1 }
 0x30a   : > { %vm2696_vm1 = vcmp.lt.s32.totalorder %v2694_v28, %v2695_v12  ;;  %v2443_v24 = vsel %vm2442_vm6, %v2440_v19, %v2441_v49  ;;  %vm2167_vm8 = vcmp.eq.s32.totalorder %v3828_v41, %v2161_v9  ;;  %vm2324_vm14 = vcmp.lt.s32.totalorder %v4534_v7, %v2323_v3 }
 0x30b   : > { %v2192_v50 = vmax.f32 %v2190_v44, %v2191_v23  ;;  %v2753_v58 = vrot.slane %v2752_v61, 2  ;;  %v2697_v47 = vsel %vm2696_vm1, %v2694_v28, %v2695_v12  ;;  %v2173_v30 = vsel %vm2167_vm8, -1e+30, %v4501_v11 }
 0x30c   : > { %vm2739_vm9 = vcmp.eq.s32.totalorder %v3828_v41, %v2697_v47  ;;  %vm2584_vm10 = vcmp.lt.s32.totalorder %v2582_v6, %v2583_v26  ;;  %vm2476_vm12 = vcmp.eq.s32.totalorder %v3828_v41, %v2443_v24  ;;  %v2209_v59 = vsel %vm1651_vm11, %v2173_v30, -inf }
 0x30d   : > { %v2193_v14 = vrot.slane %v2192_v50, 1  ;;  %v2754_v46 = vmax.f32 %v2752_v61, %v2753_v58  ;;  %v2745_v4 = vsel %vm2739_vm9, -1e+30, %v4510_v42  ;;  %v2210_v32 = vrot.slane %v2209_v59, 4 }
 0x30e   : > { %v2757_v19 = vsel %vm1651_vm11, %v2745_v4, -inf  ;;  %v2585_v39 = vsel %vm2584_vm10, %v2582_v6, %v2583_v26  ;;  %v4569_v20 = vsel %vm2476_vm12, -1e+30, %v4446_v0  ;;  %v2325_v13 = vsel %vm2324_vm14, %v4534_v7, %v2323_v3 }
 0x30f   : > { %v2194_v8 = vmax.f32 %v2192_v50, %v2193_v14  ;;  %v2755_v11 = vrot.slane %v2754_v46, 1  ;;  %v2758_v53 = vrot.slane %v2757_v19, 4  ;;  %vm2609_vm13 = vcmp.eq.s32.totalorder %v3828_v41, %v2585_v39 }
 0x310   : > { %v2211_v33 = vmax.f32 %v2209_v59, %v2210_v32  ;;  %v4573_v22 = vsel %vm2609_vm13, -1e+30, %v4493_v15  ;;  %v2500_v54 = vsel %vm1651_vm11, %v4569_v20, -inf  ;;  %v2326_v12 = vrot.slane %v2325_v13, 2 }
 0x311   : > { %v2218_v42 = vadd.f32 %v2194_v8, %v4522_v5  ;;  %v2756_v10 = vmax.f32 %v2754_v46, %v2755_v11  ;;  %v2759_v56 = vmax.f32 %v2757_v19, %v2758_v53  ;;  %v2639_v0 = vsel %vm1651_vm11, %v4573_v22, -inf }
 0x312   : > { %v2212_v51 = vrot.slane %v2211_v33, 2  ;;  %v2640_v49 = vrot.slane %v2639_v0, 4  ;;  %v2501_v44 = vrot.slane %v2500_v54, 4  ;;  %v2830_v5 = vmul.f32 %v4257_v31, %v4351_v43 }
 0x313   : > { %v2224_v17 = vmul.f32 0.2, %v2218_v42  ;;  %v2792_v15 = vadd.f32 %v2756_v10, %v4528_v27  ;;  %v2760_v28 = vrot.slane %v2759_v56, 2  ;;  %vm2327_vm15 = vcmp.lt.s32.totalorder %v2325_v13, %v2326_v12 }
 0x314   : > { %v2213_v23 = vmax.f32 %v2211_v33, %v2212_v51  ;;  %v2641_v61 = vmax.f32 %v2639_v0, %v2640_v49  ;;  %v2502_v6 = vmax.f32 %v2500_v54, %v2501_v44  ;;  %v2328_v7 = vsel %vm2327_vm15, %v2325_v13, %v2326_v12 }
 0x315   : > { %v2816_v9 = vmul.f32 %v4198_v1, %v2224_v17  ;;  %v2798_v26 = vmul.f32 0.2, %v2792_v15  ;;  %v2761_v24 = vmax.f32 %v2759_v56, %v2760_v28  ;;  %v2329_v14 = vrot.slane %v2328_v7, 1 }
 0x316   : > { %v2214_v50 = vrot.slane %v2213_v23, 1  ;;  %v2642_v58 = vrot.slane %v2641_v61, 2  ;;  %v2503_v47 = vrot.slane %v2502_v6, 2  ;;  %v2860_v59 = vrot.slane %v4296_v36, 1 }
 0x317   : > { %v2822_v3 = vadd.f32 %v2816_v9, %v4279_v55  ;;  %v2842_v27 = vmul.f32 %v4269_v34, %v2798_v26  ;;  %v2762_v30 = vrot.slane %v2761_v24, 1  ;;  %vm2330_vm0 = vcmp.lt.s32.totalorder %v2328_v7, %v2329_v14 }
 0x318   : > { %v2215_v46 = vmax.f32 %v2213_v23, %v2214_v50  ;;  %v2643_v4 = vmax.f32 %v2641_v61, %v2642_v58  ;;  %v2504_v43 = vmax.f32 %v2502_v6, %v2503_v47  ;;  %v2331_v55 = vsel %vm2330_vm0, %v2328_v7, %v2329_v14 }
 0x319   : > { %v2848_v32 = vadd.f32 %v2842_v27, %v4290_v60  ;;  %v2763_v19 = vmax.f32 %v2761_v24, %v2762_v30  ;;  %v4590_v39 = vadd.f32 %v2830_v5, %v2822_v3  ;;  %v2811_v54 = vmul.f32 %v4194_v18, %v4301_v62 }
 0x31a   : > { %v2221_v8 = vadd.f32 %v2215_v46, %v4543_v63  ;;  %v2644_v11 = vrot.slane %v2643_v4, 1  ;;  %v2505_v53 = vrot.slane %v2504_v43, 1  ;;  %vm2346_vm2 = vcmp.eq.s32.totalorder %v3828_v41, %v2331_v55 }
 0x31b   : > { %v2870_v33 = vadd.f32 %v4296_v36, %v2848_v32  ;;  %v2793_v42 = vadd.f32 %v2763_v19, %v4548_v52  ;;  %v4599_v0 = vsel %vm2346_vm2, -1e+30, %v4271_v40  ;;  %v2263_v44 = vsel %vm1651_vm11, %v4292_v37, -inf }
 0x31c   : > { %v2227_v10 = vmul.f32 0.2, %v2221_v8  ;;  %v2645_v60 = vmax.f32 %v2643_v4, %v2644_v11  ;;  %v2506_v56 = vmax.f32 %v2504_v43, %v2505_v53  ;;  %v2382_v49 = vsel %vm1651_vm11, %v4599_v0, -inf }
 0x31d   : > { %v2892_v63 = vadd.f32 %v4376_v2, %v2870_v33  ;;  %v2799_v51 = vmul.f32 0.2, %v2793_v42  ;;  %v2383_v17 = vrot.slane %v2382_v49, 4  ;;  %v4623_v24 = vstv %s2898_s22 }
 0x31e   : > { %v2819_v18 = vmul.f32 %v4198_v1, %v2227_v10  ;;  %v4608_v62 = vadd.f32 %v2645_v60, %v4537_v25  ;;  %vm2669_vm4 = vcmp.eq.f32.partialorder %v4573_v22, %v2645_v60  ;;  %v4612_v40 = vadd.f32 %v2506_v56, %v4505_v16 }
 0x31f   : > { %v2843_v52 = vmul.f32 %v4269_v34, %v2799_v51  ;;  %v2675_v13 = vsel %vm2669_vm4, %v3828_v41, 9  ;;  %vm2536_vm3 = vcmp.eq.f32.partialorder %v4569_v20, %v2506_v56  ;;  %v2264_v25 = vrot.slane %v2263_v44, 4 }
 0x320   : > { %v4617_v15 = vadd.f32 %v2819_v18, %v2811_v54  ;;  %v2708_v28 = vsel %vm1651_vm11, %v2675_v13, 2147483647  ;;  %v2542_v1 = vsel %vm2536_vm3, %v3828_v41, 9  ;;  %v2384_v61 = vmax.f32 %v2382_v49, %v2383_v17 }
 0x321   : > { %v2849_v12 = vadd.f32 %v2843_v52, %v4314_v35  ;;  %v2709_v23 = vrot.slane %v2708_v28, 4  ;;  %v2566_v16 = vsel %vm1651_vm11, %v2542_v1, 2147483647  ;;  %v2265_v5 = vmax.f32 %v2263_v44, %v2264_v25 }
 0x322   : > { %v2567_v6 = vrot.slane %v2566_v16, 4  ;;  %v2385_v26 = vrot.slane %v2384_v61, 2  ;;  %v2882_v47 = vrot.slane %v4376_v2, 1  ;;  %v2900_v35 = vadd.f32 %v4623_v24, %v2892_v63 }
 0x323   : > { %v2871_v9 = vadd.f32 %v2860_v59, %v2849_v12  ;;  %vm2710_vm5 = vcmp.lt.s32.totalorder %v2708_v28, %v2709_v23  ;;  %v2266_v58 = vrot.slane %v2265_v5, 2 }
 0x324   : > { %v2711_v50 = vsel %vm2710_vm5, %v2708_v28, %v2709_v23  ;;  %vm2568_vm6 = vcmp.lt.s32.totalorder %v2566_v16, %v2567_v6  ;;  %v2386_v27 = vmax.f32 %v2384_v61, %v2385_v26  ;;  %v3168_v59 = vmul.f32 -1.442695, %v2900_v35 }
 0x325   : > { %v2712_v7 = vrot.slane %v2711_v50, 2  ;;  %v2569_v3 = vsel %vm2568_vm6, %v2566_v16, %v2567_v6  ;;  %v2267_v14 = vmax.f32 %v2265_v5, %v2266_v58  ;;  %v2893_v46 = vadd.f32 %v2882_v47, %v2871_v9 }
 0x326   : > { %v2570_v30 = vrot.slane %v2569_v3, 2  ;;  %v2387_v4 = vrot.slane %v2386_v27, 1  ;;  %3492 = vpow2.f32 %v3168_v59 }
 0x327   : > { %vm2713_vm7 = vcmp.lt.s32.totalorder %v2711_v50, %v2712_v7  ;;  %v2268_v32 = vrot.slane %v2267_v14, 1  ;;  %v2901_v53 = vadd.f32 %v4623_v24, %v2893_v46 }
 0x328   : > { %v2714_v43 = vsel %vm2713_vm7, %v2711_v50, %v2712_v7  ;;  %vm2571_vm1 = vcmp.lt.s32.totalorder %v2569_v3, %v2570_v30  ;;  %v4627_v11 = vmax.f32 %v2386_v27, %v2387_v4 }
 0x329   : > { %v2715_v19 = vrot.slane %v2714_v43, 1  ;;  %v2572_v8 = vsel %vm2571_vm1, %v2569_v3, %v2570_v30  ;;  %v4630_v33 = vmax.f32 %v2267_v14, %v2268_v32  ;;  %v3169_v54 = vmul.f32 -1.442695, %v2901_v53 }
 0x32a   : > { %v2573_v55 = vrot.slane %v2572_v8, 1  ;;  %vm2406_vm9 = vcmp.eq.f32.partialorder %v4599_v0, %v4627_v11 }
 0x32b   : > { %vm2716_vm8 = vcmp.lt.s32.totalorder %v2714_v43, %v2715_v19  ;;  %v2412_v10 = vsel %vm2406_vm9, %v3828_v41, 9  ;;  %vm2275_vm12 = vcmp.eq.f32.partialorder %v4292_v37, %v4630_v33  ;;  %v2833_v17 = vmul.f32 %v4257_v31, %v4630_v33 }
 0x32c   : > { %v2717_v42 = vsel %vm2716_vm8, %v2714_v43, %v2715_v19  ;;  %vm2574_vm10 = vcmp.lt.s32.totalorder %v2572_v8, %v2573_v55  ;;  %v2454_v56 = vsel %vm1651_vm11, %v2412_v10, 2147483647  ;;  %v2281_v63 = vsel %vm2275_vm12, %v3828_v41, 9 }
 0x32d   : > { %vm2741_vm13 = vcmp.eq.s32.totalorder %v3828_v41, %v2717_v42  ;;  %v2575_v60 = vsel %vm2574_vm10, %v2572_v8, %v2573_v55  ;;  %v2455_v49 = vrot.slane %v2454_v56, 4  ;;  %v2332_v44 = vsel %vm1651_vm11, %v2281_v63, 2147483647 }
 0x32e   : > { %v2747_v51 = vsel %vm2741_vm13, -1e+30, %v4573_v22  ;;  %vm2608_vm14 = vcmp.eq.s32.totalorder %v3828_v41, %v2575_v60  ;;  %v2333_v13 = vrot.slane %v2332_v44, 4  ;;  %3494 = vpow2.f32 %v3169_v54 }
 0x32f   : > { %v2771_v18 = vsel %vm1651_vm11, %v2747_v51, -inf  ;;  %v4645_v52 = vsel %vm2608_vm14, -1e+30, %v4569_v20  ;;  %vm2456_vm15 = vcmp.lt.s32.totalorder %v2454_v56, %v2455_v49  ;;  %v4652_v12 = vadd.f32 %v2833_v17, %v4617_v15 }
 0x330   : > { %v2772_v28 = vrot.slane %v2771_v18, 4  ;;  %v2632_v1 = vsel %vm1651_vm11, %v4645_v52, -inf  ;;  %v2457_v25 = vsel %vm2456_vm15, %v2454_v56, %v2455_v49  ;;  %vm2334_vm0 = vcmp.lt.s32.totalorder %v2332_v44, %v2333_v13  ;;  %v3493_v9 = vpop.eup %3492 }
 0x331   : > { %v2633_v22 = vrot.slane %v2632_v1, 4  ;;  %v2458_v16 = vrot.slane %v2457_v25, 2  ;;  %v2335_v20 = vsel %vm2334_vm0, %v2332_v44, %v2333_v13  ;;  %v2924_v55 = vadd.f32 1.0, %v3493_v9 }
 0x332   : > { %v2773_v23 = vmax.f32 %v2771_v18, %v2772_v28  ;;  %v2336_v6 = vrot.slane %v2335_v20, 2  ;;  %vm2949_vm12 = vcmask 1041409  }
 0x333   : > { %v2634_v61 = vmax.f32 %v2632_v1, %v2633_v22  ;;  %vm2459_vm2 = vcmp.lt.s32.totalorder %v2457_v25, %v2458_v16 }
 0x334   : > { %v2774_v5 = vrot.slane %v2773_v23, 2  ;;  %v2460_v50 = vsel %vm2459_vm2, %v2457_v25, %v2458_v16  ;;  %vm2337_vm4 = vcmp.lt.s32.totalorder %v2335_v20, %v2336_v6 }
 0x335   : > { %v2635_v26 = vrot.slane %v2634_v61, 2  ;;  %v2461_v47 = vrot.slane %v2460_v50, 1  ;;  %v2338_v7 = vsel %vm2337_vm4, %v2335_v20, %v2336_v6 }
 0x336   : > { %v2775_v58 = vmax.f32 %v2773_v23, %v2774_v5  ;;  %v2339_v27 = vrot.slane %v2338_v7, 1 }
 0x337   : > { %v2636_v3 = vmax.f32 %v2634_v61, %v2635_v26  ;;  %vm2462_vm3 = vcmp.lt.s32.totalorder %v2460_v50, %v2461_v47  ;;  %v2400_v61 = vadd.f32 %v4627_v11, %v4465_v57 }
 0x338   : > { %v2776_v35 = vrot.slane %v2775_v58, 1  ;;  %v2463_v30 = vsel %vm2462_vm3, %v2460_v50, %v2461_v47  ;;  %vm2340_vm5 = vcmp.lt.s32.totalorder %v2338_v7, %v2339_v27  ;;  %v3495_v14 = vpop.eup %3494 }
 0x339   : > { %v2637_v15 = vrot.slane %v2636_v3, 1  ;;  %vm2478_vm6 = vcmp.eq.s32.totalorder %v3828_v41, %v2463_v30  ;;  %v2341_v4 = vsel %vm2340_vm5, %v2338_v7, %v2339_v27  ;;  %v2925_v32 = vadd.f32 1.0, %v3495_v14 }
 0x33a   : > { %v2777_v46 = vmax.f32 %v2775_v58, %v2776_v35  ;;  %v4656_v43 = vsel %vm2478_vm6, -1e+30, %v4599_v0  ;;  %vm2347_vm7 = vcmp.eq.s32.totalorder %v3828_v41, %v2341_v4 }
 0x33b   : > { %v2638_v59 = vmax.f32 %v2636_v3, %v2637_v15  ;;  %v2514_v8 = vsel %vm1651_vm11, %v4656_v43, -inf  ;;  %v4663_v53 = vsel %vm2347_vm7, -1e+30, %v4292_v37  ;;  %3496 = vrcp.f32 %v2925_v32 }
 0x33c   : > { %v2795_v19 = vadd.f32 %v2777_v46, %v4608_v62  ;;  %v2515_v42 = vrot.slane %v2514_v8, 4  ;;  %v2389_v0 = vsel %vm1651_vm11, %v4663_v53, -inf  ;;  %3498 = vrcp.f32 %v2924_v55 }
 0x33d   : > { %v4666_v54 = vadd.f32 %v2638_v59, %v4612_v40  ;;  %vm2668_vm1 = vcmp.eq.f32.partialorder %v4645_v52, %v2638_v59  ;;  %v2390_v62 = vrot.slane %v2389_v0, 4 }
 0x33e   : > { %v2801_v10 = vmul.f32 0.2, %v2795_v19  ;;  %v2674_v60 = vsel %vm2668_vm1, %v3828_v41, 9  ;;  %v2516_v63 = vmax.f32 %v2514_v8, %v2515_v42 }
 0x33f   : > { %v2698_v56 = vsel %vm1651_vm11, %v2674_v60, 2147483647  ;;  %v2391_v49 = vmax.f32 %v2389_v0, %v2390_v62 }
 0x340   : > { %v2845_v37 = vmul.f32 %v4269_v34, %v2801_v10  ;;  %v2699_v51 = vrot.slane %v2698_v56, 4  ;;  %v2517_v40 = vrot.slane %v2516_v63, 2 }
 0x341   : > { %v2392_v18 = vrot.slane %v2391_v49, 2 }
 0x342   : > { %v2851_v44 = vadd.f32 %v2845_v37, %v4341_v21  ;;  %vm2700_vm8 = vcmp.lt.s32.totalorder %v2698_v56, %v2699_v51  ;;  %v2518_v17 = vmax.f32 %v2516_v63, %v2517_v40 }
 0x343   : > { %v2701_v13 = vsel %vm2700_vm8, %v2698_v56, %v2699_v51  ;;  %v2393_v22 = vmax.f32 %v2391_v49, %v2392_v18 }
 0x344   : > { %v2873_v28 = vadd.f32 %v4406_v45, %v2851_v44  ;;  %v2702_v1 = vrot.slane %v2701_v13, 2  ;;  %v2519_v25 = vrot.slane %v2518_v17, 1 }
 0x345   : > { %v2394_v16 = vrot.slane %v2393_v22, 1  ;;  %v3497_v21 = vpop.eup %3496 }
 0x346   : > { %v4677_v23 = vadd.f32 %v4421_v48, %v2873_v28  ;;  %vm2703_vm9 = vcmp.lt.s32.totalorder %v2701_v13, %v2702_v1  ;;  %v2520_v6 = vmax.f32 %v2518_v17, %v2519_v25  ;;  %v2948_v50 = vrot.slane %v3497_v21, 7  ;;  %v3499_v7 = vpop.eup %3498 }
 0x347   : > { %v2704_v20 = vsel %vm2703_vm9, %v2701_v13, %v2702_v1  ;;  %v2395_v9 = vmax.f32 %v2393_v22, %v2394_v16 }
 0x348   : > { %v2705_v5 = vrot.slane %v2704_v20, 1  ;;  %v4681_v26 = vadd.f32 %v2520_v6, %v2400_v61  ;;  %vm2538_vm10 = vcmp.eq.f32.partialorder %v4656_v43, %v2520_v6  ;;  %v4694_v30 = vsel %vm2949_vm12, %v2948_v50, %v3499_v7 }
 0x349   : > { %v2544_v58 = vsel %vm2538_vm10, %v3828_v41, 9  ;;  %v4686_v47 = vadd.f32 %v2395_v9, %v4630_v33  ;;  %vm2407_vm14 = vcmp.eq.f32.partialorder %v4663_v53, %v2395_v9 }
 0x34a   : > { %vm2706_vm13 = vcmp.lt.s32.totalorder %v2704_v20, %v2705_v5  ;;  %v2586_v3 = vsel %vm1651_vm11, %v2544_v58, 2147483647  ;;  %v2413_v27 = vsel %vm2407_vm14, %v3828_v41, 9 }
 0x34b   : > { %v2707_v11 = vsel %vm2706_vm13, %v2704_v20, %v2705_v5  ;;  %v2587_v35 = vrot.slane %v2586_v3, 4  ;;  %v2464_v15 = vsel %vm1651_vm11, %v2413_v27, 2147483647 }
 0x34c   : > { %vm2740_vm15 = vcmp.eq.s32.totalorder %v3828_v41, %v2707_v11  ;;  %v2465_v33 = vrot.slane %v2464_v15, 4 }
 0x34d   : > { %v2746_v14 = vsel %vm2740_vm15, -1e+30, %v4645_v52  ;;  %vm2588_vm0 = vcmp.lt.s32.totalorder %v2586_v3, %v2587_v35 }
 0x34e   : > { %v2764_v46 = vsel %vm1651_vm11, %v2746_v14, -inf  ;;  %v2589_v59 = vsel %vm2588_vm0, %v2586_v3, %v2587_v35  ;;  %vm2466_vm2 = vcmp.lt.s32.totalorder %v2464_v15, %v2465_v33 }
 0x34f   : > { %v2765_v4 = vrot.slane %v2764_v46, 4  ;;  %v2590_v32 = vrot.slane %v2589_v59, 2  ;;  %v2467_v19 = vsel %vm2466_vm2, %v2464_v15, %v2465_v33 }
 0x350   : > { %v2468_v55 = vrot.slane %v2467_v19, 2 }
 0x351   : > { %v2766_v8 = vmax.f32 %v2764_v46, %v2765_v4  ;;  %vm2591_vm4 = vcmp.lt.s32.totalorder %v2589_v59, %v2590_v32 }
 0x352   : > { %v2592_v0 = vsel %vm2591_vm4, %v2589_v59, %v2590_v32  ;;  %vm2469_vm3 = vcmp.lt.s32.totalorder %v2467_v19, %v2468_v55 }
 0x353   : > { %v2767_v42 = vrot.slane %v2766_v8, 2  ;;  %v2593_v10 = vrot.slane %v2592_v0, 1  ;;  %v2470_v60 = vsel %vm2469_vm3, %v2467_v19, %v2468_v55 }
 0x354   : > { %v2471_v56 = vrot.slane %v2470_v60, 1 }
 0x355   : > { %v2768_v62 = vmax.f32 %v2766_v8, %v2767_v42  ;;  %vm2594_vm5 = vcmp.lt.s32.totalorder %v2592_v0, %v2593_v10 }
 0x356   : > { %v2595_v63 = vsel %vm2594_vm5, %v2592_v0, %v2593_v10  ;;  %vm2472_vm6 = vcmp.lt.s32.totalorder %v2470_v60, %v2471_v56  ;;  %vm2952_vm5 = vcmask 1042434  }
 0x357   : > { %v2769_v52 = vrot.slane %v2768_v62, 1  ;;  %vm2610_vm7 = vcmp.eq.s32.totalorder %v3828_v41, %v2595_v63  ;;  %v2473_v37 = vsel %vm2472_vm6, %v2470_v60, %v2471_v56  ;;  %vm2960_vm6 = vcmask 59392  }
 0x358   : > { %v2616_v49 = vsel %vm2610_vm7, -1e+30, %v4656_v43  ;;  %vm2479_vm1 = vcmp.eq.s32.totalorder %v3828_v41, %v2473_v37  ;;  %v2861_v43 = vrot.slane %v4296_v36, 2 }
 0x359   : > { %v2770_v51 = vmax.f32 %v2768_v62, %v2769_v52  ;;  %v2646_v40 = vsel %vm1651_vm11, %v2616_v49, -inf  ;;  %v2485_v44 = vsel %vm2479_vm1, -1e+30, %v4663_v53  ;;  %v2883_v53 = vrot.slane %v4376_v2, 2 }
 0x35a   : > { %v2647_v13 = vrot.slane %v2646_v40, 4  ;;  %v2521_v17 = vsel %vm1651_vm11, %v2485_v44, -inf }
 0x35b   : > { %v2794_v18 = vadd.f32 %v2770_v51, %v4666_v54  ;;  %v2522_v28 = vrot.slane %v2521_v17, 4 }
 0x35c   : > { %v2648_v22 = vmax.f32 %v2646_v40, %v2647_v13 }
 0x35d   : > { %v2800_v1 = vmul.f32 0.2, %v2794_v18  ;;  %v2523_v25 = vmax.f32 %v2521_v17, %v2522_v28 }
 0x35e   : > { %v2649_v20 = vrot.slane %v2648_v22, 2 }
 0x35f   : > { %v2844_v16 = vmul.f32 %v4269_v34, %v2800_v1  ;;  %v2524_v61 = vrot.slane %v2523_v25, 2 }
 0x360   : > { %v2650_v21 = vmax.f32 %v2648_v22, %v2649_v20 }
 0x361   : > { %v2850_v6 = vadd.f32 %v2844_v16, %v4590_v39  ;;  %v2525_v5 = vmax.f32 %v2523_v25, %v2524_v61  ;;  %v2832_v61 = vmul.f32 %v4257_v31, %v4465_v57 }
 0x362   : > { %v2651_v54 = vrot.slane %v2650_v21, 1 }
 0x363   : > { %v2872_v9 = vadd.f32 %v2861_v43, %v2850_v6  ;;  %v2526_v50 = vrot.slane %v2525_v5, 1 }
 0x364   : > { %v2652_v58 = vmax.f32 %v2650_v21, %v2651_v54 }
 0x365   : > { %v2894_v7 = vadd.f32 %v2883_v53, %v2872_v9  ;;  %v2527_v11 = vmax.f32 %v2525_v5, %v2526_v50  ;;  %v2838_v50 = vadd.f32 %v2832_v61, %v4222_v29 }
 0x366   : > { %v2664_v3 = vadd.f32 %v2652_v58, %v4681_v26  ;;  %vm2670_vm8 = vcmp.eq.f32.partialorder %v2616_v49, %v2652_v58 }
 0x367   : > { %v2902_v27 = vadd.f32 %v4623_v24, %v2894_v7  ;;  %v2676_v36 = vsel %vm2670_vm8, %v3828_v41, 9  ;;  %v2533_v35 = vadd.f32 %v2527_v11, %v4686_v47  ;;  %vm2539_vm9 = vcmp.eq.f32.partialorder %v2485_v44, %v2527_v11 }
 0x368   : > { %v2718_v39 = vsel %vm1651_vm11, %v2676_v36, 2147483647  ;;  %v2545_v2 = vsel %vm2539_vm9, %v3828_v41, 9  ;;  %v2862_v7 = vrot.slane %v4406_v45, 1  ;;  %v2884_v11 = vrot.slane %v4421_v48, 1 }
 0x369   : > { %v3170_v15 = vmul.f32 -1.442695, %v2902_v27  ;;  %v2719_v14 = vrot.slane %v2718_v39, 4  ;;  %v2596_v33 = vsel %vm1651_vm11, %v2545_v2, 2147483647 }
 0x36a   : > { %v2597_v46 = vrot.slane %v2596_v33, 4 }
 0x36b   : > { %3500 = vpow2.f32 %v3170_v15  ;;  %vm2720_vm10 = vcmp.lt.s32.totalorder %v2718_v39, %v2719_v14 }
 0x36c   : > { %v2721_v26 = vsel %vm2720_vm10, %v2718_v39, %v2719_v14  ;;  %vm2598_vm13 = vcmp.lt.s32.totalorder %v2596_v33, %v2597_v46 }
 0x36d   : > { %v2722_v4 = vrot.slane %v2721_v26, 2  ;;  %v2599_v59 = vsel %vm2598_vm13, %v2596_v33, %v2597_v46 }
 0x36e   : > { %v2600_v32 = vrot.slane %v2599_v59, 2 }
 0x36f   : > { %vm2723_vm14 = vcmp.lt.s32.totalorder %v2721_v26, %v2722_v4 }
 0x370   : > { %v2724_v19 = vsel %vm2723_vm14, %v2721_v26, %v2722_v4  ;;  %vm2601_vm15 = vcmp.lt.s32.totalorder %v2599_v59, %v2600_v32 }
 0x371   : > { %v2725_v47 = vrot.slane %v2724_v19, 1  ;;  %v2602_v8 = vsel %vm2601_vm15, %v2599_v59, %v2600_v32 }
 0x372   : > { %v2603_v55 = vrot.slane %v2602_v8, 1 }
 0x373   : > { %vm2726_vm0 = vcmp.lt.s32.totalorder %v2724_v19, %v2725_v47 }
 0x374   : > { %v2727_v0 = vsel %vm2726_vm0, %v2724_v19, %v2725_v47  ;;  %vm2604_vm2 = vcmp.lt.s32.totalorder %v2602_v8, %v2603_v55 }
 0x375   : > { %v3501_v42 = vpop.eup %3500  ;;  %vm2742_vm4 = vcmp.eq.s32.totalorder %v3828_v41, %v2727_v0  ;;  %v2605_v10 = vsel %vm2604_vm2, %v2602_v8, %v2603_v55 }
 0x376   : > { %v2926_v60 = vadd.f32 1.0, %v3501_v42  ;;  %v2748_v62 = vsel %vm2742_vm4, -1e+30, %v2616_v49  ;;  %vm2611_vm3 = vcmp.eq.s32.totalorder %v3828_v41, %v2605_v10 }
 0x377   : > { %v2778_v56 = vsel %vm1651_vm11, %v2748_v62, -inf  ;;  %v2617_v52 = vsel %vm2611_vm3, -1e+30, %v2485_v44 }
 0x378   : > { %3502 = vrcp.f32 %v2926_v60  ;;  %v2779_v63 = vrot.slane %v2778_v56, 4  ;;  %v2653_v37 = vsel %vm1651_vm11, %v2617_v52, -inf }
 0x379   : > { %v2654_v51 = vrot.slane %v2653_v37, 4 }
 0x37a   : > { %v2780_v40 = vmax.f32 %v2778_v56, %v2779_v63  ;;  %v2863_v56 = vrot.slane %v4406_v45, 2  ;;  %v2885_v63 = vrot.slane %v4421_v48, 2 }
 0x37b   : > { %v2655_v18 = vmax.f32 %v2653_v37, %v2654_v51 }
 0x37c   : > { %v2781_v13 = vrot.slane %v2780_v40, 2 }
 0x37d   : > { %v2656_v17 = vrot.slane %v2655_v18, 2 }
 0x37e   : > { %v2782_v28 = vmax.f32 %v2780_v40, %v2781_v13 }
 0x37f   : > { %v2657_v1 = vmax.f32 %v2655_v18, %v2656_v17 }
 0x380   : > { %v2783_v22 = vrot.slane %v2782_v28, 1 }
 0x381   : > { %v2658_v16 = vrot.slane %v2657_v1, 1 }
 0x382   : > { %v3503_v25 = vpop.eup %3502  ;;  %v2784_v49 = vmax.f32 %v2782_v28, %v2783_v22 }
 0x383   : > { %v2951_v20 = vrot.slane %v3503_v25, 6  ;;  %v2659_v43 = vmax.f32 %v2657_v1, %v2658_v16  ;;  %v2972_v16 = vand.u32 127, %v1098_v38 }
 0x384   : > { %v2796_v44 = vadd.f32 %v2784_v49, %v2664_v3 }
 0x385   : > { %v2953_v6 = vsel %vm2952_vm5, %v2951_v20, %v4694_v30  ;;  %v2665_v21 = vadd.f32 %v2659_v43, %v2533_v35  ;;  %vm2671_vm7 = vcmp.eq.f32.partialorder %v2617_v52, %v2659_v43  ;;  %v2903_v30 = vadd.f32 %v4623_v24, %v4677_v23 }
 0x386   : > { %v2961_v53 = vsel %vm2960_vm6, %v2953_v6, 0.0  ;;  %v2802_v5 = vmul.f32 0.2, %v2796_v44  ;;  %v2677_v54 = vsel %vm2671_vm7, %v3828_v41, 9  ;;  %v2975_v20 = vsub.s32 %v2972_v16, %v3828_v41 }
 0x387   : > { %2962 = vadd.xlane.f32.xlu0 %v2961_v53  ;;  %v2728_v9 = vsel %vm1651_vm11, %v2677_v54, 2147483647  ;;  %v3171_v35 = vmul.f32 -1.442695, %v2903_v30 }
 0x388   : > { %v2846_v58 = vmul.f32 %v4269_v34, %v2802_v5  ;;  %v2729_v31 = vrot.slane %v2728_v9, 4 }
 0x389   : > { %3504 = vpow2.f32 %v3171_v35 }
 0x38a   : > { %v2852_v57 = vadd.f32 %v2846_v58, %v2838_v50  ;;  %vm2730_vm1 = vcmp.lt.s32.totalorder %v2728_v9, %v2729_v31 }
 0x38b   : > { %v2731_v3 = vsel %vm2730_vm1, %v2728_v9, %v2729_v31 }
 0x38c   : > { %v2874_v27 = vadd.f32 %v2862_v7, %v2852_v57  ;;  %v2732_v36 = vrot.slane %v2731_v3, 2 }
 0x38e   : > { %vm2733_vm8 = vcmp.lt.s32.totalorder %v2731_v3, %v2732_v36  ;;  %v2896_v39 = vadd.f32 %v2884_v11, %v2874_v27 }
 0x38f   : > { %v2734_v2 = vsel %vm2733_vm8, %v2731_v3, %v2732_v36 }
 0x390   : > { %v2735_v29 = vrot.slane %v2734_v2, 1  ;;  %v2904_v15 = vadd.f32 %v4623_v24, %v2896_v39 }
 0x392   : > { %vm2736_vm9 = vcmp.lt.s32.totalorder %v2734_v2, %v2735_v29  ;;  %v3172_v14 = vmul.f32 -1.442695, %v2904_v15 }
 0x393   : > { %v2737_v33 = vsel %vm2736_vm9, %v2734_v2, %v2735_v29  ;;  %v3505_v32 = vpop.eup %3504 }
 0x394   : > { %vm2743_vm10 = vcmp.eq.s32.totalorder %v3828_v41, %v2737_v33  ;;  %3506 = vpow2.f32 %v3172_v14  ;;  %v2927_v55 = vadd.f32 1.0, %v3505_v32 }
 0x395   : > { %v2749_v23 = vsel %vm2743_vm10, -1e+30, %v2617_v52 }
 0x396   : > { %v2785_v46 = vsel %vm1651_vm11, %v2749_v23, -inf  ;;  %vm2983_vm11 = vcmask 17408  }
 0x397   : > { %v2786_v26 = vrot.slane %v2785_v46, 4 }
 0x399   : > { %v2787_v4 = vmax.f32 %v2785_v46, %v2786_v26 }
 0x39b   : > { %v2788_v59 = vrot.slane %v2787_v4, 2 }
 0x39d   : > { %v2789_v19 = vmax.f32 %v2787_v4, %v2788_v59 }
 0x39e   : > { %v3507_v47 = vpop.eup %3506 }
 0x39f   : > { %v2790_v8 = vrot.slane %v2789_v19, 1  ;;  %v2928_v42 = vadd.f32 1.0, %v3507_v47 }
 0x3a1   : > { %v2791_v0 = vmax.f32 %v2789_v19, %v2790_v8  ;;  %3508 = vrcp.f32 %v2928_v42 }
 0x3a2   : > { %3510 = vrcp.f32 %v2927_v55 }
 0x3a3   : > { %v2797_v10 = vadd.f32 %v2791_v0, %v2665_v21 }
 0x3a5   : > { %v2803_v60 = vmul.f32 0.2, %v2797_v10 }
 0x3a7   : > { %v2847_v62 = vmul.f32 %v4269_v34, %v2803_v60 }
 0x3a9   : > { %v2853_v52 = vadd.f32 %v2847_v62, %v4652_v12 }
 0x3ab   : > { %v3509_v37 = vpop.eup %3508  ;;  %v2875_v51 = vadd.f32 %v2863_v56, %v2853_v52 }
 0x3ac   : > { %v2954_v40 = vrot.slane %v3509_v37, 7  ;;  %v3511_v18 = vpop.eup %3510 }
 0x3ad   : > { %v2897_v13 = vadd.f32 %v2885_v63, %v2875_v51 }
 0x3ae   : > { %v2955_v17 = vsel %vm2949_vm12, %v2954_v40, %v3511_v18 }
 0x3af   : > { %v2905_v28 = vadd.f32 %v4623_v24, %v2897_v13 }
 0x3b1   : > { %v3173_v1 = vmul.f32 -1.442695, %v2905_v28 }
 0x3b3   : > { %3512 = vpow2.f32 %v3173_v1 }
 0x3bd   : > { %v3513_v22 = vpop.eup %3512 }
 0x3be   : > { %v2929_v34 = vadd.f32 1.0, %v3513_v22 }
 0x3c0   : > { %3514 = vrcp.f32 %v2929_v34 }
 0x3ca   : > { %v3515_v45 = vpop.eup %3514 }
 0x3cb   : > { %v2956_v25 = vrot.slane %v3515_v45, 6 }
 0x3cd   : > { %v2957_v12 = vsel %vm2952_vm5, %v2956_v25, %v2955_v17 }
 0x3ce   : > { %v2964_v48 = vsel %vm2960_vm6, %v2957_v12, 0.0 }
 0x3cf   : > { %2965 = vadd.xlane.f32.xlu1 %v2964_v48 }
 0x414   : > { %v2963_v49 = vpop.xlane.xlu0 %2962 }
 0x415   : > { %v2967_v43 = vmul.f32 0.125, %v2963_v49 }
 0x417   : > { %v2976_v61 = vrot.slane %v2967_v43, %v2975_v20 }
 0x45c   : > { %v2966_v24 = vpop.xlane.xlu1 %2965 }
 0x45d   : > { %v2968_v44 = vmul.f32 0.125, %v2966_v24 }
 0x45f   : > { %v2980_v6 = vrot.slane %v2968_v44, %v2975_v20 }
 0x461   : > { %v2981_v21 = vsel %vm2949_vm12, %v2980_v6, %v2976_v61 }
 0x462   : > { %2984 = vst.msk [vmem:[%s395_s25] sm:$0x3] %vm2983_vm11, %v2981_v21 }
 0x463 PF: > { %s20_s29 = sadd.s32 1, %s3541_s29  }
 0x464   : > { %p17_p1 = scmp.ge.s32.totalorder %s20_s29, 4  }
 0x466   :  { %19 = sbr.rel (!%p17_p1) target bundleno = 3 (0x3), region = 101 }
 0x46d   :  { %3004 = vsyncpa [#allocation4], 1 }
 0x46e   :  { %3006 = vsyncpa [#allocation4 + $0x1], 1 }

</bundles_post_ra>
